<compile_context>
chip_gen: v7x
topology: tpu7x:2x2x1
jax: 0.10.0
libtpu: 0.0.40
codegen_flags: <defaults>
</compile_context>

<pallas_src>
import functools
import math

import jax
import jax.numpy as jnp
from jax import lax
from jax.experimental import pallas as pl
from jax.experimental.pallas import tpu as pltpu

VMEM = pl.BlockSpec(memory_space=pltpu.MemorySpace.VMEM)

# ------------------------------ model config --------------------------------

VOCAB = 100
TYPE_VOCAB = 2
MAX_POS = 32
D_MODEL = 32            # synthetic BERT hidden size (bert_out_dim)
N_HEADS = 4
D_HEAD = D_MODEL // N_HEADS
D_FF = 64
N_BERT_LAYERS = 2
HIDDEN_DIM = 32         # BERT_LSTM hidden_dim (bi-LSTM output width)
HID = HIDDEN_DIM // 2   # per-direction LSTM hidden
TAG_SIZE = 5
LN_EPS = 1e-12
ATT_SCALE = 1.0 / math.sqrt(D_HEAD)


# ------------------------------ helpers (in-kernel) --------------------------


def _ln(x, g, b, eps=LN_EPS):
    mu = jnp.mean(x, axis=-1, keepdims=True)
    var = jnp.mean(jnp.square(x - mu), axis=-1, keepdims=True)
    return (x - mu) * lax.rsqrt(var + eps) * g + b


def _gelu(x):
    # TODO(synk): HF BERT's default "gelu" is the exact erf form; the tanh
    # approximation is used here for Mosaic-safe lowering.
    return 0.5 * x * (1.0 + jnp.tanh(0.7978845608028654 * (x + 0.044715 * x * x * x)))


# ------------------------------ Pallas kernels ------------------------------


def _layernorm_kernel(x_ref, g_ref, b_ref, o_ref, *, eps):
    o_ref[...] = _ln(x_ref[...], g_ref[...], b_ref[...], eps)


def layernorm(x2d, gamma, beta, eps=LN_EPS):
    m, d = x2d.shape
    return pl.pallas_call(
        functools.partial(_layernorm_kernel, eps=eps),
        out_shape=jax.ShapeDtypeStruct((m, d), jnp.float32),
        in_specs=[VMEM, VMEM, VMEM],
        out_specs=VMEM,
    )(x2d, gamma.reshape(1, d), beta.reshape(1, d))


def _bert_layer_kernel(x_ref, madd_ref,
                       wqkv_ref, bqkv_ref, wo_ref, bo_ref, g1_ref, b1_ref,
                       wi_ref, bi_ref, wf_ref, bf_ref, g2_ref, b2_ref,
                       o_ref):
    """Whole BERT encoder layer for one batch element (grid over batch)."""
    x = x_ref[0]                                   # (S, D)
    madd = madd_ref[0]                             # (1, S) additive mask

    # Fused QKV projection: one (S, D) @ (D, 3D) matmul.
    qkv = jnp.dot(x, wqkv_ref[...], preferred_element_type=jnp.float32) + bqkv_ref[...]

    # Per-head attention (static head loop; everything stays 2-D).
    ctx_heads = []
    for h in range(N_HEADS):
        lo = h * D_HEAD
        qh = qkv[:, lo:lo + D_HEAD]
        kh = qkv[:, D_MODEL + lo:D_MODEL + lo + D_HEAD]
        vh = qkv[:, 2 * D_MODEL + lo:2 * D_MODEL + lo + D_HEAD]
        s = lax.dot_general(qh, kh, (((1,), (1,)), ((), ())),
                            preferred_element_type=jnp.float32)          # (S, S)
        s = s * ATT_SCALE + madd
        s = s - jnp.max(s, axis=-1, keepdims=True)
        p = jnp.exp(s)
        p = p * pl.reciprocal(jnp.sum(p, axis=-1, keepdims=True), approx=True)
        ctx_heads.append(jnp.dot(p, vh, preferred_element_type=jnp.float32))
    ctx = jnp.concatenate(ctx_heads, axis=-1)                             # (S, D)

    # Output projection + residual + LN1.
    attn = jnp.dot(ctx, wo_ref[...], preferred_element_type=jnp.float32) + bo_ref[...]
    y = _ln(attn + x, g1_ref[...], b1_ref[...])

    # FFN (GELU) + residual + LN2.
    hdn = jnp.dot(y, wi_ref[...], preferred_element_type=jnp.float32) + bi_ref[...]
    hdn = _gelu(hdn)
    ffn = jnp.dot(hdn, wf_ref[...], preferred_element_type=jnp.float32) + bf_ref[...]
    o_ref[0] = _ln(ffn + y, g2_ref[...], b2_ref[...])


def bert_layer(lp, x, mask_add):
    b, s, d = x.shape
    weights = [lp["wqkv"], lp["bqkv"], lp["wo"], lp["bo"], lp["ln1_g"], lp["ln1_b"],
               lp["wi"], lp["bi"], lp["wf"], lp["bf"], lp["ln2_g"], lp["ln2_b"]]
    in_specs = ([pl.BlockSpec((1, s, d), lambda i: (i, 0, 0)),
                 pl.BlockSpec((1, 1, s), lambda i: (i, 0, 0))]
                + [pl.BlockSpec(w.shape, lambda i: (0, 0)) for w in weights])
    return pl.pallas_call(
        _bert_layer_kernel,
        out_shape=jax.ShapeDtypeStruct((b, s, d), jnp.float32),
        grid=(b,),
        in_specs=in_specs,
        out_specs=pl.BlockSpec((1, s, d), lambda i: (i, 0, 0)),
        compiler_params=pltpu.CompilerParams(dimension_semantics=("parallel",)),
    )(x, mask_add, *weights)


def _bilstm_tag_kernel(x_ref,
                       wih_f_ref, whh_f_ref, b_f_ref,
                       wih_b_ref, whh_b_ref, b_b_ref,
                       wtag_ref, btag_ref,
                       o_ref, *, seq, hid):
    """Bidirectional LSTM + hidden2tag head for one batch element."""
    x = x_ref[0]                                   # (S, D), batch-first input

    # Hoisted input projections: one matmul per direction over ALL timesteps.
    gx_f = jnp.dot(x, wih_f_ref[...], preferred_element_type=jnp.float32) + b_f_ref[...]
    gx_b = jnp.dot(x, wih_b_ref[...], preferred_element_type=jnp.float32) + b_b_ref[...]

    def cell(gates, c):
        # PyTorch nn.LSTM gate order: i | f | g | o.
        i = jax.nn.sigmoid(gates[:, 0 * hid:1 * hid])
        f = jax.nn.sigmoid(gates[:, 1 * hid:2 * hid])
        g = jnp.tanh(gates[:, 2 * hid:3 * hid])
        o = jax.nn.sigmoid(gates[:, 3 * hid:4 * hid])
        c_new = f * c + i * g
        h_new = o * jnp.tanh(c_new)
        return h_new, c_new

    h_f = jnp.zeros((1, hid), jnp.float32)
    c_f = jnp.zeros((1, hid), jnp.float32)
    h_b = jnp.zeros((1, hid), jnp.float32)
    c_b = jnp.zeros((1, hid), jnp.float32)
    outs_f = [None] * seq
    outs_b = [None] * seq

    # Static unroll (seq is small): both directions in the same loop; backward
    # direction indexes t_b = seq-1-t (no wrapper-side reversal needed).
    for t in range(seq):
        tb = seq - 1 - t
        g_f = gx_f[t:t + 1, :] + jnp.dot(h_f, whh_f_ref[...],
                                         preferred_element_type=jnp.float32)
        h_f, c_f = cell(g_f, c_f)
        outs_f[t] = h_f

        g_b = gx_b[tb:tb + 1, :] + jnp.dot(h_b, whh_b_ref[...],
                                           preferred_element_type=jnp.float32)
        h_b, c_b = cell(g_b, c_b)
        outs_b[tb] = h_b

    hf_seq = jnp.concatenate(outs_f, axis=0)                      # (S, H)
    hb_seq = jnp.concatenate(outs_b, axis=0)                      # (S, H)
    lstm_out = jnp.concatenate([hf_seq, hb_seq], axis=-1)         # (S, 2H)

    # Fused hidden2tag head (single small matmul + one store at the end).
    feats = jnp.dot(lstm_out, wtag_ref[...],
                    preferred_element_type=jnp.float32) + btag_ref[...]
    o_ref[0] = feats                                              # (S, TAG_SIZE)


def bilstm_tag(x, lstm_p, wtag, btag):
    b, s, d = x.shape
    weights = [lstm_p["wih_f"], lstm_p["whh_f"], lstm_p["b_f"],
               lstm_p["wih_b"], lstm_p["whh_b"], lstm_p["b_b"],
               wtag, btag]
    in_specs = ([pl.BlockSpec((1, s, d), lambda i: (i, 0, 0))]
                + [pl.BlockSpec(w.shape, lambda i: (0, 0)) for w in weights])
    return pl.pallas_call(
        functools.partial(_bilstm_tag_kernel, seq=s, hid=HID),
        out_shape=jax.ShapeDtypeStruct((b, s, TAG_SIZE), jnp.float32),
        grid=(b,),
        in_specs=in_specs,
        out_specs=pl.BlockSpec((1, s, TAG_SIZE), lambda i: (i, 0, 0)),
        compiler_params=pltpu.CompilerParams(dimension_semantics=("parallel",)),
    )(x, *weights)


# ------------------------------ parameters ----------------------------------


def init_params(key):
    def nrm(k, shape):
        return 0.02 * jax.random.normal(k, shape, dtype=jnp.float32)

    keys = iter(jax.random.split(key, 64))
    p = {
        "word_emb": nrm(next(keys), (VOCAB, D_MODEL)),
        "pos_emb": nrm(next(keys), (MAX_POS, D_MODEL)),
        "type_emb": nrm(next(keys), (TYPE_VOCAB, D_MODEL)),
        "emb_ln_g": jnp.ones((D_MODEL,), jnp.float32),
        "emb_ln_b": jnp.zeros((D_MODEL,), jnp.float32),
        "layers": [],
    }
    for _ in range(N_BERT_LAYERS):
        p["layers"].append({
            # Fused QKV: columns [0:D]=Q, [D:2D]=K, [2D:3D]=V; applied as x @ wqkv.
            "wqkv": nrm(next(keys), (D_MODEL, 3 * D_MODEL)),
            "bqkv": jnp.zeros((1, 3 * D_MODEL), jnp.float32),
            "wo": nrm(next(keys), (D_MODEL, D_MODEL)),
            "bo": jnp.zeros((1, D_MODEL), jnp.float32),
            "ln1_g": jnp.ones((1, D_MODEL), jnp.float32),
            "ln1_b": jnp.zeros((1, D_MODEL), jnp.float32),
            "wi": nrm(next(keys), (D_MODEL, D_FF)),
            "bi": jnp.zeros((1, D_FF), jnp.float32),
            "wf": nrm(next(keys), (D_FF, D_MODEL)),
            "bf": jnp.zeros((1, D_MODEL), jnp.float32),
            "ln2_g": jnp.ones((1, D_MODEL), jnp.float32),
            "ln2_b": jnp.zeros((1, D_MODEL), jnp.float32),
        })
    # LSTM weights stored kernel-ready: (Din, 4H)/(H, 4H) = PyTorch (4H, Din/H).T,
    # gate order i|f|g|o, biases pre-summed (b_ih + b_hh).
    p["lstm"] = {
        "wih_f": nrm(next(keys), (D_MODEL, 4 * HID)),
        "whh_f": nrm(next(keys), (HID, 4 * HID)),
        "b_f": nrm(next(keys), (1, 4 * HID)),
        "wih_b": nrm(next(keys), (D_MODEL, 4 * HID)),
        "whh_b": nrm(next(keys), (HID, 4 * HID)),
        "b_b": nrm(next(keys), (1, 4 * HID)),
    }
    p["hidden2tag_w"] = nrm(next(keys), (HIDDEN_DIM, TAG_SIZE))
    p["hidden2tag_b"] = jnp.zeros((1, TAG_SIZE), jnp.float32)
    return p


# ------------------------------ forward pass --------------------------------


def bert_lstm_forward(p, sent, masks):
    b, s = sent.shape
    # Embedding lookups (gather) are glue in plain JAX.
    emb = (p["word_emb"][sent]
           + p["pos_emb"][:s][None, :, :]
           + p["type_emb"][0][None, None, :])                            # (B, S, D)
    x = layernorm(emb.reshape(b * s, D_MODEL), p["emb_ln_g"], p["emb_ln_b"])
    x = x.reshape(b, s, D_MODEL)

    # Small additive mask (HF convention: (1-mask)*-1e4), broadcast inside kernel.
    mask_add = ((1.0 - masks.astype(jnp.float32)) * -10000.0)[:, None, :]  # (B, 1, S)

    for lp in p["layers"]:
        x = bert_layer(lp, x, mask_add)                                  # (B, S, D)

    # Fused bidirectional LSTM + tag head (single kernel, batch-parallel grid).
    feats = bilstm_tag(x, p["lstm"], p["hidden2tag_w"], p["hidden2tag_b"])
    return feats                                                         # (B, S, TAG)


if __name__ == "__main__":
    key = jax.random.PRNGKey(0)
    pkey, skey = jax.random.split(key)
    params = init_params(pkey)

    B, S = 2, 8
    sent = jax.random.randint(skey, (B, S), 0, VOCAB, dtype=jnp.int32)
    masks = jnp.ones((B, S), jnp.float32).at[1, 6:].set(0.0)

    feats = jax.jit(bert_lstm_forward)(params, sent, masks)
    jax.block_until_ready(feats)
    assert feats.shape == (B, S, TAG_SIZE), feats.shape
    assert bool(jnp.all(jnp.isfinite(feats)))
    print("KERNEL_OK")
</pallas_src>

<mosaic_0001>
module attributes {stable_mosaic.version = 11 : i64} {
  func.func @_layernorm_kernel(%arg0: memref<16x32xf32, #tpu.memory_space<vmem>>, %arg1: memref<1x32xf32, #tpu.memory_space<vmem>>, %arg2: memref<1x32xf32, #tpu.memory_space<vmem>>, %arg3: memref<16x32xf32, #tpu.memory_space<vmem>>) attributes {dimension_semantics = [], scalar_prefetch = 0 : i64, scratch_operands = 0 : i64, tpu.core_type = #tpu.core_type<tc>} {
    %c0 = arith.constant 0 : index
    %c0_0 = arith.constant 0 : index
    %0 = vector.load %arg0[%c0, %c0_0] : memref<16x32xf32, #tpu.memory_space<vmem>>, vector<16x32xf32>
    %c0_1 = arith.constant 0 : index
    %c0_2 = arith.constant 0 : index
    %1 = vector.load %arg1[%c0_1, %c0_2] : memref<1x32xf32, #tpu.memory_space<vmem>>, vector<1x32xf32>
    %c0_3 = arith.constant 0 : index
    %c0_4 = arith.constant 0 : index
    %2 = vector.load %arg2[%c0_3, %c0_4] : memref<1x32xf32, #tpu.memory_space<vmem>>, vector<1x32xf32>
    %cst = arith.constant dense<0.000000e+00> : vector<16xf32>
    %3 = vector.multi_reduction <add>, %0, %cst [1] : vector<16x32xf32> to vector<16xf32>
    %4 = vector.shape_cast %3 : vector<16xf32> to vector<16x1xf32>
    %cst_5 = arith.constant 3.200000e+01 : f32
    %5 = vector.broadcast %cst_5 : f32 to vector<16x1xf32>
    %6 = arith.divf %4, %5 : vector<16x1xf32>
    %7 = vector.broadcast %6 : vector<16x1xf32> to vector<16x32xf32>
    %8 = arith.subf %0, %7 : vector<16x32xf32>
    %9 = arith.mulf %8, %8 : vector<16x32xf32>
    %cst_6 = arith.constant dense<0.000000e+00> : vector<16xf32>
    %10 = vector.multi_reduction <add>, %9, %cst_6 [1] : vector<16x32xf32> to vector<16xf32>
    %11 = vector.shape_cast %10 : vector<16xf32> to vector<16x1xf32>
    %cst_7 = arith.constant 3.200000e+01 : f32
    %12 = vector.broadcast %cst_7 : f32 to vector<16x1xf32>
    %13 = arith.divf %11, %12 : vector<16x1xf32>
    %14 = vector.broadcast %6 : vector<16x1xf32> to vector<16x32xf32>
    %15 = arith.subf %0, %14 : vector<16x32xf32>
    %cst_8 = arith.constant 9.99999996E-13 : f32
    %16 = vector.broadcast %cst_8 : f32 to vector<16x1xf32>
    %17 = arith.addf %13, %16 : vector<16x1xf32>
    %18 = math.rsqrt %17 : vector<16x1xf32>
    %19 = vector.broadcast %18 : vector<16x1xf32> to vector<16x32xf32>
    %20 = arith.mulf %15, %19 : vector<16x32xf32>
    %21 = vector.broadcast %1 : vector<1x32xf32> to vector<16x32xf32>
    %22 = arith.mulf %20, %21 : vector<16x32xf32>
    %23 = vector.broadcast %2 : vector<1x32xf32> to vector<16x32xf32>
    %24 = arith.addf %22, %23 : vector<16x32xf32>
    %c0_9 = arith.constant 0 : index
    %c0_10 = arith.constant 0 : index
    %25 = vector.load %arg3[%c0_9, %c0_10] : memref<16x32xf32, #tpu.memory_space<vmem>>, vector<16x32xf32>
    tpu.vector_store %arg3[%c0_9, %c0_10], %24 {strides = array<i32>} : memref<16x32xf32, #tpu.memory_space<vmem>>, vector<16x32xf32>,
    return
  }
}

module attributes {stable_mosaic.version = 11 : i64} {
  func.func @_bert_layer_kernel(%arg0: i32, %arg1: memref<1x8x32xf32, #tpu.memory_space<vmem>>, %arg2: memref<1x1x8xf32, #tpu.memory_space<vmem>>, %arg3: memref<32x96xf32, #tpu.memory_space<vmem>>, %arg4: memref<1x96xf32, #tpu.memory_space<vmem>>, %arg5: memref<32x32xf32, #tpu.memory_space<vmem>>, %arg6: memref<1x32xf32, #tpu.memory_space<vmem>>, %arg7: memref<1x32xf32, #tpu.memory_space<vmem>>, %arg8: memref<1x32xf32, #tpu.memory_space<vmem>>, %arg9: memref<32x64xf32, #tpu.memory_space<vmem>>, %arg10: memref<1x64xf32, #tpu.memory_space<vmem>>, %arg11: memref<64x32xf32, #tpu.memory_space<vmem>>, %arg12: memref<1x32xf32, #tpu.memory_space<vmem>>, %arg13: memref<1x32xf32, #tpu.memory_space<vmem>>, %arg14: memref<1x32xf32, #tpu.memory_space<vmem>>, %arg15: memref<1x8x32xf32, #tpu.memory_space<vmem>>) attributes {dimension_semantics = [#tpu.dimension_semantics<parallel>], iteration_bounds = array<i64: 2>, scalar_prefetch = 0 : i64, scratch_operands = 0 : i64, tpu.core_type = #tpu.core_type<tc>, window_params = [{transform_indices = @transform_0, window_bounds = array<i64: 1, 8, 32>}, {transform_indices = @transform_1, window_bounds = array<i64: 1, 1, 8>}, {pipeline_mode = #tpu.pipeline_mode<synchronous>, transform_indices = @transform_2, window_bounds = array<i64: 32, 96>}, {pipeline_mode = #tpu.pipeline_mode<synchronous>, transform_indices = @transform_3, window_bounds = array<i64: 1, 96>}, {pipeline_mode = #tpu.pipeline_mode<synchronous>, transform_indices = @transform_4, window_bounds = array<i64: 32, 32>}, {pipeline_mode = #tpu.pipeline_mode<synchronous>, transform_indices = @transform_5, window_bounds = array<i64: 1, 32>}, {pipeline_mode = #tpu.pipeline_mode<synchronous>, transform_indices = @transform_6, window_bounds = array<i64: 1, 32>}, {pipeline_mode = #tpu.pipeline_mode<synchronous>, transform_indices = @transform_7, window_bounds = array<i64: 1, 32>}, {pipeline_mode = #tpu.pipeline_mode<synchronous>, transform_indices = @transform_8, window_bounds = array<i64: 32, 64>}, {pipeline_mode = #tpu.pipeline_mode<synchronous>, transform_indices = @transform_9, window_bounds = array<i64: 1, 64>}, {pipeline_mode = #tpu.pipeline_mode<synchronous>, transform_indices = @transform_10, window_bounds = array<i64: 64, 32>}, {pipeline_mode = #tpu.pipeline_mode<synchronous>, transform_indices = @transform_11, window_bounds = array<i64: 1, 32>}, {pipeline_mode = #tpu.pipeline_mode<synchronous>, transform_indices = @transform_12, window_bounds = array<i64: 1, 32>}, {pipeline_mode = #tpu.pipeline_mode<synchronous>, transform_indices = @transform_13, window_bounds = array<i64: 1, 32>}, {transform_indices = @transform_14, window_bounds = array<i64: 1, 8, 32>}]} {
    %c0 = arith.constant 0 : index
    %c0_0 = arith.constant 0 : index
    %c0_1 = arith.constant 0 : index
    %0 = vector.load %arg1[%c0, %c0_0, %c0_1] : memref<1x8x32xf32, #tpu.memory_space<vmem>>, vector<1x8x32xf32>
    %1 = vector.shape_cast %0 : vector<1x8x32xf32> to vector<8x32xf32>
    %c0_2 = arith.constant 0 : index
    %c0_3 = arith.constant 0 : index
    %c0_4 = arith.constant 0 : index
    %2 = vector.load %arg2[%c0_2, %c0_3, %c0_4] : memref<1x1x8xf32, #tpu.memory_space<vmem>>, vector<1x1x8xf32>
    %3 = vector.shape_cast %2 : vector<1x1x8xf32> to vector<1x8xf32>
    %c0_5 = arith.constant 0 : index
    %c0_6 = arith.constant 0 : index
    %4 = vector.load %arg3[%c0_5, %c0_6] : memref<32x96xf32, #tpu.memory_space<vmem>>, vector<32x96xf32>
    %cst = arith.constant dense<0.000000e+00> : vector<8x96xf32>
    %5 = tpu.matmul %1, %4, %cst {dimension_numbers = #tpu.dot_dimension_numbers<[1], [0], [0], [1], [0, 0, 1, 1], [], []>} : vector<8x32xf32>, vector<32x96xf32>, vector<8x96xf32> -> vector<8x96xf32>
    %c0_7 = arith.constant 0 : index
    %c0_8 = arith.constant 0 : index
    %6 = vector.load %arg4[%c0_7, %c0_8] : memref<1x96xf32, #tpu.memory_space<vmem>>, vector<1x96xf32>
    %7 = vector.broadcast %6 : vector<1x96xf32> to vector<8x96xf32>
    %8 = arith.addf %5, %7 : vector<8x96xf32>
    %9 = vector.extract_strided_slice %8 {offsets = [0, 0], sizes = [8, 8], strides = [1, 1]} : vector<8x96xf32> to vector<8x8xf32>
    %10 = vector.extract_strided_slice %8 {offsets = [0, 32], sizes = [8, 8], strides = [1, 1]} : vector<8x96xf32> to vector<8x8xf32>
    %11 = vector.extract_strided_slice %8 {offsets = [0, 64], sizes = [8, 8], strides = [1, 1]} : vector<8x96xf32> to vector<8x8xf32>
    %cst_9 = arith.constant dense<0.000000e+00> : vector<8x8xf32>
    %12 = tpu.matmul %9, %10, %cst_9 {dimension_numbers = #tpu.dot_dimension_numbers<[1], [1], [0], [0], [0, 0, 1, 0], [], []>} : vector<8x8xf32>, vector<8x8xf32>, vector<8x8xf32> -> vector<8x8xf32>
    %cst_10 = arith.constant 0.353553385 : f32
    %13 = vector.broadcast %cst_10 : f32 to vector<8x8xf32>
    %14 = arith.mulf %12, %13 : vector<8x8xf32>
    %15 = vector.broadcast %3 : vector<1x8xf32> to vector<8x8xf32>
    %16 = arith.addf %14, %15 : vector<8x8xf32>
    %cst_11 = arith.constant dense<0xFF800000> : vector<8xf32>
    %17 = vector.multi_reduction <maximumf>, %16, %cst_11 [1] : vector<8x8xf32> to vector<8xf32>
    %18 = vector.shape_cast %17 : vector<8xf32> to vector<8x1xf32>
    %19 = vector.broadcast %18 : vector<8x1xf32> to vector<8x8xf32>
    %20 = arith.subf %16, %19 : vector<8x8xf32>
    %21 = math.exp %20 : vector<8x8xf32>
    %cst_12 = arith.constant dense<0.000000e+00> : vector<8xf32>
    %22 = vector.multi_reduction <add>, %21, %cst_12 [1] : vector<8x8xf32> to vector<8xf32>
    %23 = vector.shape_cast %22 : vector<8xf32> to vector<8x1xf32>
    %24 = tpu.reciprocal %23 {approx = true} : vector<8x1xf32> -> vector<8x1xf32>
    %25 = vector.broadcast %24 : vector<8x1xf32> to vector<8x8xf32>
    %26 = arith.mulf %21, %25 : vector<8x8xf32>
    %cst_13 = arith.constant dense<0.000000e+00> : vector<8x8xf32>
    %27 = tpu.matmul %26, %11, %cst_13 {dimension_numbers = #tpu.dot_dimension_numbers<[1], [0], [0], [1], [0, 0, 1, 1], [], []>} : vector<8x8xf32>, vector<8x8xf32>, vector<8x8xf32> -> vector<8x8xf32>
    %28 = vector.extract_strided_slice %8 {offsets = [0, 8], sizes = [8, 8], strides = [1, 1]} : vector<8x96xf32> to vector<8x8xf32>
    %29 = vector.extract_strided_slice %8 {offsets = [0, 40], sizes = [8, 8], strides = [1, 1]} : vector<8x96xf32> to vector<8x8xf32>
    %30 = vector.extract_strided_slice %8 {offsets = [0, 72], sizes = [8, 8], strides = [1, 1]} : vector<8x96xf32> to vector<8x8xf32>
    %cst_14 = arith.constant dense<0.000000e+00> : vector<8x8xf32>
    %31 = tpu.matmul %28, %29, %cst_14 {dimension_numbers = #tpu.dot_dimension_numbers<[1], [1], [0], [0], [0, 0, 1, 0], [], []>} : vector<8x8xf32>, vector<8x8xf32>, vector<8x8xf32> -> vector<8x8xf32>
    %cst_15 = arith.constant 0.353553385 : f32
    %32 = vector.broadcast %cst_15 : f32 to vector<8x8xf32>
    %33 = arith.mulf %31, %32 : vector<8x8xf32>
    %34 = vector.broadcast %3 : vector<1x8xf32> to vector<8x8xf32>
    %35 = arith.addf %33, %34 : vector<8x8xf32>
    %cst_16 = arith.constant dense<0xFF800000> : vector<8xf32>
    %36 = vector.multi_reduction <maximumf>, %35, %cst_16 [1] : vector<8x8xf32> to vector<8xf32>
    %37 = vector.shape_cast %36 : vector<8xf32> to vector<8x1xf32>
    %38 = vector.broadcast %37 : vector<8x1xf32> to vector<8x8xf32>
    %39 = arith.subf %35, %38 : vector<8x8xf32>
    %40 = math.exp %39 : vector<8x8xf32>
    %cst_17 = arith.constant dense<0.000000e+00> : vector<8xf32>
    %41 = vector.multi_reduction <add>, %40, %cst_17 [1] : vector<8x8xf32> to vector<8xf32>
    %42 = vector.shape_cast %41 : vector<8xf32> to vector<8x1xf32>
    %43 = tpu.reciprocal %42 {approx = true} : vector<8x1xf32> -> vector<8x1xf32>
    %44 = vector.broadcast %43 : vector<8x1xf32> to vector<8x8xf32>
    %45 = arith.mulf %40, %44 : vector<8x8xf32>
    %cst_18 = arith.constant dense<0.000000e+00> : vector<8x8xf32>
    %46 = tpu.matmul %45, %30, %cst_18 {dimension_numbers = #tpu.dot_dimension_numbers<[1], [0], [0], [1], [0, 0, 1, 1], [], []>} : vector<8x8xf32>, vector<8x8xf32>, vector<8x8xf32> -> vector<8x8xf32>
    %47 = vector.extract_strided_slice %8 {offsets = [0, 16], sizes = [8, 8], strides = [1, 1]} : vector<8x96xf32> to vector<8x8xf32>
    %48 = vector.extract_strided_slice %8 {offsets = [0, 48], sizes = [8, 8], strides = [1, 1]} : vector<8x96xf32> to vector<8x8xf32>
    %49 = vector.extract_strided_slice %8 {offsets = [0, 80], sizes = [8, 8], strides = [1, 1]} : vector<8x96xf32> to vector<8x8xf32>
    %cst_19 = arith.constant dense<0.000000e+00> : vector<8x8xf32>
    %50 = tpu.matmul %47, %48, %cst_19 {dimension_numbers = #tpu.dot_dimension_numbers<[1], [1], [0], [0], [0, 0, 1, 0], [], []>} : vector<8x8xf32>, vector<8x8xf32>, vector<8x8xf32> -> vector<8x8xf32>
    %cst_20 = arith.constant 0.353553385 : f32
    %51 = vector.broadcast %cst_20 : f32 to vector<8x8xf32>
    %52 = arith.mulf %50, %51 : vector<8x8xf32>
    %53 = vector.broadcast %3 : vector<1x8xf32> to vector<8x8xf32>
    %54 = arith.addf %52, %53 : vector<8x8xf32>
    %cst_21 = arith.constant dense<0xFF800000> : vector<8xf32>
    %55 = vector.multi_reduction <maximumf>, %54, %cst_21 [1] : vector<8x8xf32> to vector<8xf32>
    %56 = vector.shape_cast %55 : vector<8xf32> to vector<8x1xf32>
    %57 = vector.broadcast %56 : vector<8x1xf32> to vector<8x8xf32>
    %58 = arith.subf %54, %57 : vector<8x8xf32>
    %59 = math.exp %58 : vector<8x8xf32>
    %cst_22 = arith.constant dense<0.000000e+00> : vector<8xf32>
    %60 = vector.multi_reduction <add>, %59, %cst_22 [1] : vector<8x8xf32> to vector<8xf32>
    %61 = vector.shape_cast %60 : vector<8xf32> to vector<8x1xf32>
    %62 = tpu.reciprocal %61 {approx = true} : vector<8x1xf32> -> vector<8x1xf32>
    %63 = vector.broadcast %62 : vector<8x1xf32> to vector<8x8xf32>
    %64 = arith.mulf %59, %63 : vector<8x8xf32>
    %cst_23 = arith.constant dense<0.000000e+00> : vector<8x8xf32>
    %65 = tpu.matmul %64, %49, %cst_23 {dimension_numbers = #tpu.dot_dimension_numbers<[1], [0], [0], [1], [0, 0, 1, 1], [], []>} : vector<8x8xf32>, vector<8x8xf32>, vector<8x8xf32> -> vector<8x8xf32>
    %66 = vector.extract_strided_slice %8 {offsets = [0, 24], sizes = [8, 8], strides = [1, 1]} : vector<8x96xf32> to vector<8x8xf32>
    %67 = vector.extract_strided_slice %8 {offsets = [0, 56], sizes = [8, 8], strides = [1, 1]} : vector<8x96xf32> to vector<8x8xf32>
    %68 = vector.extract_strided_slice %8 {offsets = [0, 88], sizes = [8, 8], strides = [1, 1]} : vector<8x96xf32> to vector<8x8xf32>
    %cst_24 = arith.constant dense<0.000000e+00> : vector<8x8xf32>
    %69 = tpu.matmul %66, %67, %cst_24 {dimension_numbers = #tpu.dot_dimension_numbers<[1], [1], [0], [0], [0, 0, 1, 0], [], []>} : vector<8x8xf32>, vector<8x8xf32>, vector<8x8xf32> -> vector<8x8xf32>
    %cst_25 = arith.constant 0.353553385 : f32
    %70 = vector.broadcast %cst_25 : f32 to vector<8x8xf32>
    %71 = arith.mulf %69, %70 : vector<8x8xf32>
    %72 = vector.broadcast %3 : vector<1x8xf32> to vector<8x8xf32>
    %73 = arith.addf %71, %72 : vector<8x8xf32>
    %cst_26 = arith.constant dense<0xFF800000> : vector<8xf32>
    %74 = vector.multi_reduction <maximumf>, %73, %cst_26 [1] : vector<8x8xf32> to vector<8xf32>
    %75 = vector.shape_cast %74 : vector<8xf32> to vector<8x1xf32>
    %76 = vector.broadcast %75 : vector<8x1xf32> to vector<8x8xf32>
    %77 = arith.subf %73, %76 : vector<8x8xf32>
    %78 = math.exp %77 : vector<8x8xf32>
    %cst_27 = arith.constant dense<0.000000e+00> : vector<8xf32>
    %79 = vector.multi_reduction <add>, %78, %cst_27 [1] : vector<8x8xf32> to vector<8xf32>
    %80 = vector.shape_cast %79 : vector<8xf32> to vector<8x1xf32>
    %81 = tpu.reciprocal %80 {approx = true} : vector<8x1xf32> -> vector<8x1xf32>
    %82 = vector.broadcast %81 : vector<8x1xf32> to vector<8x8xf32>
    %83 = arith.mulf %78, %82 : vector<8x8xf32>
    %cst_28 = arith.constant dense<0.000000e+00> : vector<8x8xf32>
    %84 = tpu.matmul %83, %68, %cst_28 {dimension_numbers = #tpu.dot_dimension_numbers<[1], [0], [0], [1], [0, 0, 1, 1], [], []>} : vector<8x8xf32>, vector<8x8xf32>, vector<8x8xf32> -> vector<8x8xf32>
    %85 = tpu.concatenate %27, %46, %65, %84 in 1 : vector<8x8xf32>, vector<8x8xf32>, vector<8x8xf32>, vector<8x8xf32> -> vector<8x32xf32>
    %c0_29 = arith.constant 0 : index
    %c0_30 = arith.constant 0 : index
    %86 = vector.load %arg5[%c0_29, %c0_30] : memref<32x32xf32, #tpu.memory_space<vmem>>, vector<32x32xf32>
    %cst_31 = arith.constant dense<0.000000e+00> : vector<8x32xf32>
    %87 = tpu.matmul %85, %86, %cst_31 {dimension_numbers = #tpu.dot_dimension_numbers<[1], [0], [0], [1], [0, 0, 1, 1], [], []>} : vector<8x32xf32>, vector<32x32xf32>, vector<8x32xf32> -> vector<8x32xf32>
    %c0_32 = arith.constant 0 : index
    %c0_33 = arith.constant 0 : index
    %88 = vector.load %arg6[%c0_32, %c0_33] : memref<1x32xf32, #tpu.memory_space<vmem>>, vector<1x32xf32>
    %89 = vector.broadcast %88 : vector<1x32xf32> to vector<8x32xf32>
    %90 = arith.addf %87, %89 : vector<8x32xf32>
    %91 = arith.addf %90, %1 : vector<8x32xf32>
    %c0_34 = arith.constant 0 : index
    %c0_35 = arith.constant 0 : index
    %92 = vector.load %arg7[%c0_34, %c0_35] : memref<1x32xf32, #tpu.memory_space<vmem>>, vector<1x32xf32>
    %c0_36 = arith.constant 0 : index
    %c0_37 = arith.constant 0 : index
    %93 = vector.load %arg8[%c0_36, %c0_37] : memref<1x32xf32, #tpu.memory_space<vmem>>, vector<1x32xf32>
    %cst_38 = arith.constant dense<0.000000e+00> : vector<8xf32>
    %94 = vector.multi_reduction <add>, %91, %cst_38 [1] : vector<8x32xf32> to vector<8xf32>
    %95 = vector.shape_cast %94 : vector<8xf32> to vector<8x1xf32>
    %cst_39 = arith.constant 3.200000e+01 : f32
    %96 = vector.broadcast %cst_39 : f32 to vector<8x1xf32>
    %97 = arith.divf %95, %96 : vector<8x1xf32>
    %98 = vector.broadcast %97 : vector<8x1xf32> to vector<8x32xf32>
    %99 = arith.subf %91, %98 : vector<8x32xf32>
    %100 = arith.mulf %99, %99 : vector<8x32xf32>
    %cst_40 = arith.constant dense<0.000000e+00> : vector<8xf32>
    %101 = vector.multi_reduction <add>, %100, %cst_40 [1] : vector<8x32xf32> to vector<8xf32>
    %102 = vector.shape_cast %101 : vector<8xf32> to vector<8x1xf32>
    %cst_41 = arith.constant 3.200000e+01 : f32
    %103 = vector.broadcast %cst_41 : f32 to vector<8x1xf32>
    %104 = arith.divf %102, %103 : vector<8x1xf32>
    %105 = vector.broadcast %97 : vector<8x1xf32> to vector<8x32xf32>
    %106 = arith.subf %91, %105 : vector<8x32xf32>
    %cst_42 = arith.constant 9.99999996E-13 : f32
    %107 = vector.broadcast %cst_42 : f32 to vector<8x1xf32>
    %108 = arith.addf %104, %107 : vector<8x1xf32>
    %109 = math.rsqrt %108 : vector<8x1xf32>
    %110 = vector.broadcast %109 : vector<8x1xf32> to vector<8x32xf32>
    %111 = arith.mulf %106, %110 : vector<8x32xf32>
    %112 = vector.broadcast %92 : vector<1x32xf32> to vector<8x32xf32>
    %113 = arith.mulf %111, %112 : vector<8x32xf32>
    %114 = vector.broadcast %93 : vector<1x32xf32> to vector<8x32xf32>
    %115 = arith.addf %113, %114 : vector<8x32xf32>
    %c0_43 = arith.constant 0 : index
    %c0_44 = arith.constant 0 : index
    %116 = vector.load %arg9[%c0_43, %c0_44] : memref<32x64xf32, #tpu.memory_space<vmem>>, vector<32x64xf32>
    %cst_45 = arith.constant dense<0.000000e+00> : vector<8x64xf32>
    %117 = tpu.matmul %115, %116, %cst_45 {dimension_numbers = #tpu.dot_dimension_numbers<[1], [0], [0], [1], [0, 0, 1, 1], [], []>} : vector<8x32xf32>, vector<32x64xf32>, vector<8x64xf32> -> vector<8x64xf32>
    %c0_46 = arith.constant 0 : index
    %c0_47 = arith.constant 0 : index
    %118 = vector.load %arg10[%c0_46, %c0_47] : memref<1x64xf32, #tpu.memory_space<vmem>>, vector<1x64xf32>
    %119 = vector.broadcast %118 : vector<1x64xf32> to vector<8x64xf32>
    %120 = arith.addf %117, %119 : vector<8x64xf32>
    %cst_48 = arith.constant 5.000000e-01 : f32
    %121 = vector.broadcast %cst_48 : f32 to vector<8x64xf32>
    %122 = arith.mulf %121, %120 : vector<8x64xf32>
    %cst_49 = arith.constant 4.471500e-02 : f32
    %123 = vector.broadcast %cst_49 : f32 to vector<8x64xf32>
    %124 = arith.mulf %123, %120 : vector<8x64xf32>
    %125 = arith.mulf %124, %120 : vector<8x64xf32>
    %126 = arith.mulf %125, %120 : vector<8x64xf32>
    %127 = arith.addf %120, %126 : vector<8x64xf32>
    %cst_50 = arith.constant 0.797884583 : f32
    %128 = vector.broadcast %cst_50 : f32 to vector<8x64xf32>
    %129 = arith.mulf %128, %127 : vector<8x64xf32>
    %130 = math.tanh %129 : vector<8x64xf32>
    %cst_51 = arith.constant 1.000000e+00 : f32
    %131 = vector.broadcast %cst_51 : f32 to vector<8x64xf32>
    %132 = arith.addf %131, %130 : vector<8x64xf32>
    %133 = arith.mulf %122, %132 : vector<8x64xf32>
    %c0_52 = arith.constant 0 : index
    %c0_53 = arith.constant 0 : index
    %134 = vector.load %arg11[%c0_52, %c0_53] : memref<64x32xf32, #tpu.memory_space<vmem>>, vector<64x32xf32>
    %cst_54 = arith.constant dense<0.000000e+00> : vector<8x32xf32>
    %135 = tpu.matmul %133, %134, %cst_54 {dimension_numbers = #tpu.dot_dimension_numbers<[1], [0], [0], [1], [0, 0, 1, 1], [], []>} : vector<8x64xf32>, vector<64x32xf32>, vector<8x32xf32> -> vector<8x32xf32>
    %c0_55 = arith.constant 0 : index
    %c0_56 = arith.constant 0 : index
    %136 = vector.load %arg12[%c0_55, %c0_56] : memref<1x32xf32, #tpu.memory_space<vmem>>, vector<1x32xf32>
    %137 = vector.broadcast %136 : vector<1x32xf32> to vector<8x32xf32>
    %138 = arith.addf %135, %137 : vector<8x32xf32>
    %139 = arith.addf %138, %115 : vector<8x32xf32>
    %c0_57 = arith.constant 0 : index
    %c0_58 = arith.constant 0 : index
    %140 = vector.load %arg13[%c0_57, %c0_58] : memref<1x32xf32, #tpu.memory_space<vmem>>, vector<1x32xf32>
    %c0_59 = arith.constant 0 : index
    %c0_60 = arith.constant 0 : index
    %141 = vector.load %arg14[%c0_59, %c0_60] : memref<1x32xf32, #tpu.memory_space<vmem>>, vector<1x32xf32>
    %cst_61 = arith.constant dense<0.000000e+00> : vector<8xf32>
    %142 = vector.multi_reduction <add>, %139, %cst_61 [1] : vector<8x32xf32> to vector<8xf32>
    %143 = vector.shape_cast %142 : vector<8xf32> to vector<8x1xf32>
    %cst_62 = arith.constant 3.200000e+01 : f32
    %144 = vector.broadcast %cst_62 : f32 to vector<8x1xf32>
    %145 = arith.divf %143, %144 : vector<8x1xf32>
    %146 = vector.broadcast %145 : vector<8x1xf32> to vector<8x32xf32>
    %147 = arith.subf %139, %146 : vector<8x32xf32>
    %148 = arith.mulf %147, %147 : vector<8x32xf32>
    %cst_63 = arith.constant dense<0.000000e+00> : vector<8xf32>
    %149 = vector.multi_reduction <add>, %148, %cst_63 [1] : vector<8x32xf32> to vector<8xf32>
    %150 = vector.shape_cast %149 : vector<8xf32> to vector<8x1xf32>
    %cst_64 = arith.constant 3.200000e+01 : f32
    %151 = vector.broadcast %cst_64 : f32 to vector<8x1xf32>
    %152 = arith.divf %150, %151 : vector<8x1xf32>
    %153 = vector.broadcast %145 : vector<8x1xf32> to vector<8x32xf32>
    %154 = arith.subf %139, %153 : vector<8x32xf32>
    %cst_65 = arith.constant 9.99999996E-13 : f32
    %155 = vector.broadcast %cst_65 : f32 to vector<8x1xf32>
    %156 = arith.addf %152, %155 : vector<8x1xf32>
    %157 = math.rsqrt %156 : vector<8x1xf32>
    %158 = vector.broadcast %157 : vector<8x1xf32> to vector<8x32xf32>
    %159 = arith.mulf %154, %158 : vector<8x32xf32>
    %160 = vector.broadcast %140 : vector<1x32xf32> to vector<8x32xf32>
    %161 = arith.mulf %159, %160 : vector<8x32xf32>
    %162 = vector.broadcast %141 : vector<1x32xf32> to vector<8x32xf32>
    %163 = arith.addf %161, %162 : vector<8x32xf32>
    %c0_66 = arith.constant 0 : index
    %c0_67 = arith.constant 0 : index
    %c0_68 = arith.constant 0 : index
    %164 = vector.load %arg15[%c0_66, %c0_67, %c0_68] : memref<1x8x32xf32, #tpu.memory_space<vmem>>, vector<1x8x32xf32>
    %165 = vector.shape_cast %164 : vector<1x8x32xf32> to vector<8x32xf32>
    %166 = vector.shape_cast %163 : vector<8x32xf32> to vector<1x8x32xf32>
    tpu.vector_store %arg15[%c0_66, %c0_67, %c0_68], %166 {strides = array<i32>} : memref<1x8x32xf32, #tpu.memory_space<vmem>>, vector<1x8x32xf32>,
    return
  }
  func.func @transform_0(%arg0: i32) -> (i32, i32, i32) {
    %c0_i32 = arith.constant 0 : i32
    %c0_i32_0 = arith.constant 0 : i32
    %c0_i32_1 = arith.constant 0 : i32
    return %arg0, %c0_i32, %c0_i32_0 : i32, i32, i32
  }
  func.func @transform_1(%arg0: i32) -> (i32, i32, i32) {
    %c0_i32 = arith.constant 0 : i32
    %c0_i32_0 = arith.constant 0 : i32
    %c0_i32_1 = arith.constant 0 : i32
    return %arg0, %c0_i32, %c0_i32_0 : i32, i32, i32
  }
  func.func @transform_2(%arg0: i32) -> (i32, i32) {
    %c0_i32 = arith.constant 0 : i32
    %c0_i32_0 = arith.constant 0 : i32
    %c0_i32_1 = arith.constant 0 : i32
    return %c0_i32, %c0_i32_0 : i32, i32
  }
  func.func @transform_3(%arg0: i32) -> (i32, i32) {
    %c0_i32 = arith.constant 0 : i32
    %c0_i32_0 = arith.constant 0 : i32
    %c0_i32_1 = arith.constant 0 : i32
    return %c0_i32, %c0_i32_0 : i32, i32
  }
  func.func @transform_4(%arg0: i32) -> (i32, i32) {
    %c0_i32 = arith.constant 0 : i32
    %c0_i32_0 = arith.constant 0 : i32
    %c0_i32_1 = arith.constant 0 : i32
    return %c0_i32, %c0_i32_0 : i32, i32
  }
  func.func @transform_5(%arg0: i32) -> (i32, i32) {
    %c0_i32 = arith.constant 0 : i32
    %c0_i32_0 = arith.constant 0 : i32
    %c0_i32_1 = arith.constant 0 : i32
    return %c0_i32, %c0_i32_0 : i32, i32
  }
  func.func @transform_6(%arg0: i32) -> (i32, i32) {
    %c0_i32 = arith.constant 0 : i32
    %c0_i32_0 = arith.constant 0 : i32
    %c0_i32_1 = arith.constant 0 : i32
    return %c0_i32, %c0_i32_0 : i32, i32
  }
  func.func @transform_7(%arg0: i32) -> (i32, i32) {
    %c0_i32 = arith.constant 0 : i32
    %c0_i32_0 = arith.constant 0 : i32
    %c0_i32_1 = arith.constant 0 : i32
    return %c0_i32, %c0_i32_0 : i32, i32
  }
  func.func @transform_8(%arg0: i32) -> (i32, i32) {
    %c0_i32 = arith.constant 0 : i32
    %c0_i32_0 = arith.constant 0 : i32
    %c0_i32_1 = arith.constant 0 : i32
    return %c0_i32, %c0_i32_0 : i32, i32
  }
  func.func @transform_9(%arg0: i32) -> (i32, i32) {
    %c0_i32 = arith.constant 0 : i32
    %c0_i32_0 = arith.constant 0 : i32
    %c0_i32_1 = arith.constant 0 : i32
    return %c0_i32, %c0_i32_0 : i32, i32
  }
  func.func @transform_10(%arg0: i32) -> (i32, i32) {
    %c0_i32 = arith.constant 0 : i32
    %c0_i32_0 = arith.constant 0 : i32
    %c0_i32_1 = arith.constant 0 : i32
    return %c0_i32, %c0_i32_0 : i32, i32
  }
  func.func @transform_11(%arg0: i32) -> (i32, i32) {
    %c0_i32 = arith.constant 0 : i32
    %c0_i32_0 = arith.constant 0 : i32
    %c0_i32_1 = arith.constant 0 : i32
    return %c0_i32, %c0_i32_0 : i32, i32
  }
  func.func @transform_12(%arg0: i32) -> (i32, i32) {
    %c0_i32 = arith.constant 0 : i32
    %c0_i32_0 = arith.constant 0 : i32
    %c0_i32_1 = arith.constant 0 : i32
    return %c0_i32, %c0_i32_0 : i32, i32
  }
  func.func @transform_13(%arg0: i32) -> (i32, i32) {
    %c0_i32 = arith.constant 0 : i32
    %c0_i32_0 = arith.constant 0 : i32
    %c0_i32_1 = arith.constant 0 : i32
    return %c0_i32, %c0_i32_0 : i32, i32
  }
  func.func @transform_14(%arg0: i32) -> (i32, i32, i32) {
    %c0_i32 = arith.constant 0 : i32
    %c0_i32_0 = arith.constant 0 : i32
    %c0_i32_1 = arith.constant 0 : i32
    return %arg0, %c0_i32, %c0_i32_0 : i32, i32, i32
  }
}

module attributes {stable_mosaic.version = 11 : i64} {
  func.func @_bilstm_tag_kernel(%arg0: i32, %arg1: memref<1x8x32xf32, #tpu.memory_space<vmem>>, %arg2: memref<32x64xf32, #tpu.memory_space<vmem>>, %arg3: memref<16x64xf32, #tpu.memory_space<vmem>>, %arg4: memref<1x64xf32, #tpu.memory_space<vmem>>, %arg5: memref<32x64xf32, #tpu.memory_space<vmem>>, %arg6: memref<16x64xf32, #tpu.memory_space<vmem>>, %arg7: memref<1x64xf32, #tpu.memory_space<vmem>>, %arg8: memref<32x5xf32, #tpu.memory_space<vmem>>, %arg9: memref<1x5xf32, #tpu.memory_space<vmem>>, %arg10: memref<1x8x5xf32, #tpu.memory_space<vmem>>) attributes {dimension_semantics = [#tpu.dimension_semantics<parallel>], iteration_bounds = array<i64: 2>, scalar_prefetch = 0 : i64, scratch_operands = 0 : i64, tpu.core_type = #tpu.core_type<tc>, window_params = [{transform_indices = @transform_0, window_bounds = array<i64: 1, 8, 32>}, {pipeline_mode = #tpu.pipeline_mode<synchronous>, transform_indices = @transform_1, window_bounds = array<i64: 32, 64>}, {pipeline_mode = #tpu.pipeline_mode<synchronous>, transform_indices = @transform_2, window_bounds = array<i64: 16, 64>}, {pipeline_mode = #tpu.pipeline_mode<synchronous>, transform_indices = @transform_3, window_bounds = array<i64: 1, 64>}, {pipeline_mode = #tpu.pipeline_mode<synchronous>, transform_indices = @transform_4, window_bounds = array<i64: 32, 64>}, {pipeline_mode = #tpu.pipeline_mode<synchronous>, transform_indices = @transform_5, window_bounds = array<i64: 16, 64>}, {pipeline_mode = #tpu.pipeline_mode<synchronous>, transform_indices = @transform_6, window_bounds = array<i64: 1, 64>}, {pipeline_mode = #tpu.pipeline_mode<synchronous>, transform_indices = @transform_7, window_bounds = array<i64: 32, 5>}, {pipeline_mode = #tpu.pipeline_mode<synchronous>, transform_indices = @transform_8, window_bounds = array<i64: 1, 5>}, {transform_indices = @transform_9, window_bounds = array<i64: 1, 8, 5>}]} {
    %c0 = arith.constant 0 : index
    %c0_0 = arith.constant 0 : index
    %c0_1 = arith.constant 0 : index
    %0 = vector.load %arg1[%c0, %c0_0, %c0_1] : memref<1x8x32xf32, #tpu.memory_space<vmem>>, vector<1x8x32xf32>
    %1 = vector.shape_cast %0 : vector<1x8x32xf32> to vector<8x32xf32>
    %c0_2 = arith.constant 0 : index
    %c0_3 = arith.constant 0 : index
    %2 = vector.load %arg2[%c0_2, %c0_3] : memref<32x64xf32, #tpu.memory_space<vmem>>, vector<32x64xf32>
    %cst = arith.constant dense<0.000000e+00> : vector<8x64xf32>
    %3 = tpu.matmul %1, %2, %cst {dimension_numbers = #tpu.dot_dimension_numbers<[1], [0], [0], [1], [0, 0, 1, 1], [], []>} : vector<8x32xf32>, vector<32x64xf32>, vector<8x64xf32> -> vector<8x64xf32>
    %c0_4 = arith.constant 0 : index
    %c0_5 = arith.constant 0 : index
    %4 = vector.load %arg4[%c0_4, %c0_5] : memref<1x64xf32, #tpu.memory_space<vmem>>, vector<1x64xf32>
    %5 = vector.broadcast %4 : vector<1x64xf32> to vector<8x64xf32>
    %6 = arith.addf %3, %5 : vector<8x64xf32>
    %c0_6 = arith.constant 0 : index
    %c0_7 = arith.constant 0 : index
    %7 = vector.load %arg5[%c0_6, %c0_7] : memref<32x64xf32, #tpu.memory_space<vmem>>, vector<32x64xf32>
    %cst_8 = arith.constant dense<0.000000e+00> : vector<8x64xf32>
    %8 = tpu.matmul %1, %7, %cst_8 {dimension_numbers = #tpu.dot_dimension_numbers<[1], [0], [0], [1], [0, 0, 1, 1], [], []>} : vector<8x32xf32>, vector<32x64xf32>, vector<8x64xf32> -> vector<8x64xf32>
    %c0_9 = arith.constant 0 : index
    %c0_10 = arith.constant 0 : index
    %9 = vector.load %arg7[%c0_9, %c0_10] : memref<1x64xf32, #tpu.memory_space<vmem>>, vector<1x64xf32>
    %10 = vector.broadcast %9 : vector<1x64xf32> to vector<8x64xf32>
    %11 = arith.addf %8, %10 : vector<8x64xf32>
    %cst_11 = arith.constant 0.000000e+00 : f32
    %12 = vector.broadcast %cst_11 : f32 to vector<1x16xf32>
    %cst_12 = arith.constant 0.000000e+00 : f32
    %13 = vector.broadcast %cst_12 : f32 to vector<1x16xf32>
    %cst_13 = arith.constant 0.000000e+00 : f32
    %14 = vector.broadcast %cst_13 : f32 to vector<1x16xf32>
    %cst_14 = arith.constant 0.000000e+00 : f32
    %15 = vector.broadcast %cst_14 : f32 to vector<1x16xf32>
    %16 = vector.extract_strided_slice %6 {offsets = [0, 0], sizes = [1, 64], strides = [1, 1]} : vector<8x64xf32> to vector<1x64xf32>
    %c0_15 = arith.constant 0 : index
    %c0_16 = arith.constant 0 : index
    %17 = vector.load %arg3[%c0_15, %c0_16] : memref<16x64xf32, #tpu.memory_space<vmem>>, vector<16x64xf32>
    %cst_17 = arith.constant dense<0.000000e+00> : vector<1x64xf32>
    %18 = tpu.matmul %12, %17, %cst_17 {dimension_numbers = #tpu.dot_dimension_numbers<[1], [0], [0], [1], [0, 0, 1, 1], [], []>} : vector<1x16xf32>, vector<16x64xf32>, vector<1x64xf32> -> vector<1x64xf32>
    %19 = arith.addf %16, %18 : vector<1x64xf32>
    %20 = vector.extract_strided_slice %19 {offsets = [0, 0], sizes = [1, 16], strides = [1, 1]} : vector<1x64xf32> to vector<1x16xf32>
    %21 = arith.negf %20 : vector<1x16xf32>
    %22 = math.exp %21 : vector<1x16xf32>
    %cst_18 = arith.constant 1.000000e+00 : f32
    %23 = vector.broadcast %cst_18 : f32 to vector<1x16xf32>
    %24 = arith.addf %23, %22 : vector<1x16xf32>
    %25 = arith.divf %23, %24 : vector<1x16xf32>
    %26 = vector.extract_strided_slice %19 {offsets = [0, 16], sizes = [1, 16], strides = [1, 1]} : vector<1x64xf32> to vector<1x16xf32>
    %27 = arith.negf %26 : vector<1x16xf32>
    %28 = math.exp %27 : vector<1x16xf32>
    %cst_19 = arith.constant 1.000000e+00 : f32
    %29 = vector.broadcast %cst_19 : f32 to vector<1x16xf32>
    %30 = arith.addf %29, %28 : vector<1x16xf32>
    %31 = arith.divf %29, %30 : vector<1x16xf32>
    %32 = vector.extract_strided_slice %19 {offsets = [0, 32], sizes = [1, 16], strides = [1, 1]} : vector<1x64xf32> to vector<1x16xf32>
    %33 = math.tanh %32 : vector<1x16xf32>
    %34 = vector.extract_strided_slice %19 {offsets = [0, 48], sizes = [1, 16], strides = [1, 1]} : vector<1x64xf32> to vector<1x16xf32>
    %35 = arith.negf %34 : vector<1x16xf32>
    %36 = math.exp %35 : vector<1x16xf32>
    %cst_20 = arith.constant 1.000000e+00 : f32
    %37 = vector.broadcast %cst_20 : f32 to vector<1x16xf32>
    %38 = arith.addf %37, %36 : vector<1x16xf32>
    %39 = arith.divf %37, %38 : vector<1x16xf32>
    %40 = arith.mulf %31, %13 : vector<1x16xf32>
    %41 = arith.mulf %25, %33 : vector<1x16xf32>
    %42 = arith.addf %40, %41 : vector<1x16xf32>
    %43 = math.tanh %42 : vector<1x16xf32>
    %44 = arith.mulf %39, %43 : vector<1x16xf32>
    %45 = vector.extract_strided_slice %11 {offsets = [7, 0], sizes = [1, 64], strides = [1, 1]} : vector<8x64xf32> to vector<1x64xf32>
    %c0_21 = arith.constant 0 : index
    %c0_22 = arith.constant 0 : index
    %46 = vector.load %arg6[%c0_21, %c0_22] : memref<16x64xf32, #tpu.memory_space<vmem>>, vector<16x64xf32>
    %cst_23 = arith.constant dense<0.000000e+00> : vector<1x64xf32>
    %47 = tpu.matmul %14, %46, %cst_23 {dimension_numbers = #tpu.dot_dimension_numbers<[1], [0], [0], [1], [0, 0, 1, 1], [], []>} : vector<1x16xf32>, vector<16x64xf32>, vector<1x64xf32> -> vector<1x64xf32>
    %48 = arith.addf %45, %47 : vector<1x64xf32>
    %49 = vector.extract_strided_slice %48 {offsets = [0, 0], sizes = [1, 16], strides = [1, 1]} : vector<1x64xf32> to vector<1x16xf32>
    %50 = arith.negf %49 : vector<1x16xf32>
    %51 = math.exp %50 : vector<1x16xf32>
    %cst_24 = arith.constant 1.000000e+00 : f32
    %52 = vector.broadcast %cst_24 : f32 to vector<1x16xf32>
    %53 = arith.addf %52, %51 : vector<1x16xf32>
    %54 = arith.divf %52, %53 : vector<1x16xf32>
    %55 = vector.extract_strided_slice %48 {offsets = [0, 16], sizes = [1, 16], strides = [1, 1]} : vector<1x64xf32> to vector<1x16xf32>
    %56 = arith.negf %55 : vector<1x16xf32>
    %57 = math.exp %56 : vector<1x16xf32>
    %cst_25 = arith.constant 1.000000e+00 : f32
    %58 = vector.broadcast %cst_25 : f32 to vector<1x16xf32>
    %59 = arith.addf %58, %57 : vector<1x16xf32>
    %60 = arith.divf %58, %59 : vector<1x16xf32>
    %61 = vector.extract_strided_slice %48 {offsets = [0, 32], sizes = [1, 16], strides = [1, 1]} : vector<1x64xf32> to vector<1x16xf32>
    %62 = math.tanh %61 : vector<1x16xf32>
    %63 = vector.extract_strided_slice %48 {offsets = [0, 48], sizes = [1, 16], strides = [1, 1]} : vector<1x64xf32> to vector<1x16xf32>
    %64 = arith.negf %63 : vector<1x16xf32>
    %65 = math.exp %64 : vector<1x16xf32>
    %cst_26 = arith.constant 1.000000e+00 : f32
    %66 = vector.broadcast %cst_26 : f32 to vector<1x16xf32>
    %67 = arith.addf %66, %65 : vector<1x16xf32>
    %68 = arith.divf %66, %67 : vector<1x16xf32>
    %69 = arith.mulf %60, %15 : vector<1x16xf32>
    %70 = arith.mulf %54, %62 : vector<1x16xf32>
    %71 = arith.addf %69, %70 : vector<1x16xf32>
    %72 = math.tanh %71 : vector<1x16xf32>
    %73 = arith.mulf %68, %72 : vector<1x16xf32>
    %74 = vector.extract_strided_slice %6 {offsets = [1, 0], sizes = [1, 64], strides = [1, 1]} : vector<8x64xf32> to vector<1x64xf32>
    %c0_27 = arith.constant 0 : index
    %c0_28 = arith.constant 0 : index
    %75 = vector.load %arg3[%c0_27, %c0_28] : memref<16x64xf32, #tpu.memory_space<vmem>>, vector<16x64xf32>
    %cst_29 = arith.constant dense<0.000000e+00> : vector<1x64xf32>
    %76 = tpu.matmul %44, %75, %cst_29 {dimension_numbers = #tpu.dot_dimension_numbers<[1], [0], [0], [1], [0, 0, 1, 1], [], []>} : vector<1x16xf32>, vector<16x64xf32>, vector<1x64xf32> -> vector<1x64xf32>
    %77 = arith.addf %74, %76 : vector<1x64xf32>
    %78 = vector.extract_strided_slice %77 {offsets = [0, 0], sizes = [1, 16], strides = [1, 1]} : vector<1x64xf32> to vector<1x16xf32>
    %79 = arith.negf %78 : vector<1x16xf32>
    %80 = math.exp %79 : vector<1x16xf32>
    %cst_30 = arith.constant 1.000000e+00 : f32
    %81 = vector.broadcast %cst_30 : f32 to vector<1x16xf32>
    %82 = arith.addf %81, %80 : vector<1x16xf32>
    %83 = arith.divf %81, %82 : vector<1x16xf32>
    %84 = vector.extract_strided_slice %77 {offsets = [0, 16], sizes = [1, 16], strides = [1, 1]} : vector<1x64xf32> to vector<1x16xf32>
    %85 = arith.negf %84 : vector<1x16xf32>
    %86 = math.exp %85 : vector<1x16xf32>
    %cst_31 = arith.constant 1.000000e+00 : f32
    %87 = vector.broadcast %cst_31 : f32 to vector<1x16xf32>
    %88 = arith.addf %87, %86 : vector<1x16xf32>
    %89 = arith.divf %87, %88 : vector<1x16xf32>
    %90 = vector.extract_strided_slice %77 {offsets = [0, 32], sizes = [1, 16], strides = [1, 1]} : vector<1x64xf32> to vector<1x16xf32>
    %91 = math.tanh %90 : vector<1x16xf32>
    %92 = vector.extract_strided_slice %77 {offsets = [0, 48], sizes = [1, 16], strides = [1, 1]} : vector<1x64xf32> to vector<1x16xf32>
    %93 = arith.negf %92 : vector<1x16xf32>
    %94 = math.exp %93 : vector<1x16xf32>
    %cst_32 = arith.constant 1.000000e+00 : f32
    %95 = vector.broadcast %cst_32 : f32 to vector<1x16xf32>
    %96 = arith.addf %95, %94 : vector<1x16xf32>
    %97 = arith.divf %95, %96 : vector<1x16xf32>
    %98 = arith.mulf %89, %42 : vector<1x16xf32>
    %99 = arith.mulf %83, %91 : vector<1x16xf32>
    %100 = arith.addf %98, %99 : vector<1x16xf32>
    %101 = math.tanh %100 : vector<1x16xf32>
    %102 = arith.mulf %97, %101 : vector<1x16xf32>
    %103 = vector.extract_strided_slice %11 {offsets = [6, 0], sizes = [1, 64], strides = [1, 1]} : vector<8x64xf32> to vector<1x64xf32>
    %c0_33 = arith.constant 0 : index
    %c0_34 = arith.constant 0 : index
    %104 = vector.load %arg6[%c0_33, %c0_34] : memref<16x64xf32, #tpu.memory_space<vmem>>, vector<16x64xf32>
    %cst_35 = arith.constant dense<0.000000e+00> : vector<1x64xf32>
    %105 = tpu.matmul %73, %104, %cst_35 {dimension_numbers = #tpu.dot_dimension_numbers<[1], [0], [0], [1], [0, 0, 1, 1], [], []>} : vector<1x16xf32>, vector<16x64xf32>, vector<1x64xf32> -> vector<1x64xf32>
    %106 = arith.addf %103, %105 : vector<1x64xf32>
    %107 = vector.extract_strided_slice %106 {offsets = [0, 0], sizes = [1, 16], strides = [1, 1]} : vector<1x64xf32> to vector<1x16xf32>
    %108 = arith.negf %107 : vector<1x16xf32>
    %109 = math.exp %108 : vector<1x16xf32>
    %cst_36 = arith.constant 1.000000e+00 : f32
    %110 = vector.broadcast %cst_36 : f32 to vector<1x16xf32>
    %111 = arith.addf %110, %109 : vector<1x16xf32>
    %112 = arith.divf %110, %111 : vector<1x16xf32>
    %113 = vector.extract_strided_slice %106 {offsets = [0, 16], sizes = [1, 16], strides = [1, 1]} : vector<1x64xf32> to vector<1x16xf32>
    %114 = arith.negf %113 : vector<1x16xf32>
    %115 = math.exp %114 : vector<1x16xf32>
    %cst_37 = arith.constant 1.000000e+00 : f32
    %116 = vector.broadcast %cst_37 : f32 to vector<1x16xf32>
    %117 = arith.addf %116, %115 : vector<1x16xf32>
    %118 = arith.divf %116, %117 : vector<1x16xf32>
    %119 = vector.extract_strided_slice %106 {offsets = [0, 32], sizes = [1, 16], strides = [1, 1]} : vector<1x64xf32> to vector<1x16xf32>
    %120 = math.tanh %119 : vector<1x16xf32>
    %121 = vector.extract_strided_slice %106 {offsets = [0, 48], sizes = [1, 16], strides = [1, 1]} : vector<1x64xf32> to vector<1x16xf32>
    %122 = arith.negf %121 : vector<1x16xf32>
    %123 = math.exp %122 : vector<1x16xf32>
    %cst_38 = arith.constant 1.000000e+00 : f32
    %124 = vector.broadcast %cst_38 : f32 to vector<1x16xf32>
    %125 = arith.addf %124, %123 : vector<1x16xf32>
    %126 = arith.divf %124, %125 : vector<1x16xf32>
    %127 = arith.mulf %118, %71 : vector<1x16xf32>
    %128 = arith.mulf %112, %120 : vector<1x16xf32>
    %129 = arith.addf %127, %128 : vector<1x16xf32>
    %130 = math.tanh %129 : vector<1x16xf32>
    %131 = arith.mulf %126, %130 : vector<1x16xf32>
    %132 = vector.extract_strided_slice %6 {offsets = [2, 0], sizes = [1, 64], strides = [1, 1]} : vector<8x64xf32> to vector<1x64xf32>
    %c0_39 = arith.constant 0 : index
    %c0_40 = arith.constant 0 : index
    %133 = vector.load %arg3[%c0_39, %c0_40] : memref<16x64xf32, #tpu.memory_space<vmem>>, vector<16x64xf32>
    %cst_41 = arith.constant dense<0.000000e+00> : vector<1x64xf32>
    %134 = tpu.matmul %102, %133, %cst_41 {dimension_numbers = #tpu.dot_dimension_numbers<[1], [0], [0], [1], [0, 0, 1, 1], [], []>} : vector<1x16xf32>, vector<16x64xf32>, vector<1x64xf32> -> vector<1x64xf32>
    %135 = arith.addf %132, %134 : vector<1x64xf32>
    %136 = vector.extract_strided_slice %135 {offsets = [0, 0], sizes = [1, 16], strides = [1, 1]} : vector<1x64xf32> to vector<1x16xf32>
    %137 = arith.negf %136 : vector<1x16xf32>
    %138 = math.exp %137 : vector<1x16xf32>
    %cst_42 = arith.constant 1.000000e+00 : f32
    %139 = vector.broadcast %cst_42 : f32 to vector<1x16xf32>
    %140 = arith.addf %139, %138 : vector<1x16xf32>
    %141 = arith.divf %139, %140 : vector<1x16xf32>
    %142 = vector.extract_strided_slice %135 {offsets = [0, 16], sizes = [1, 16], strides = [1, 1]} : vector<1x64xf32> to vector<1x16xf32>
    %143 = arith.negf %142 : vector<1x16xf32>
    %144 = math.exp %143 : vector<1x16xf32>
    %cst_43 = arith.constant 1.000000e+00 : f32
    %145 = vector.broadcast %cst_43 : f32 to vector<1x16xf32>
    %146 = arith.addf %145, %144 : vector<1x16xf32>
    %147 = arith.divf %145, %146 : vector<1x16xf32>
    %148 = vector.extract_strided_slice %135 {offsets = [0, 32], sizes = [1, 16], strides = [1, 1]} : vector<1x64xf32> to vector<1x16xf32>
    %149 = math.tanh %148 : vector<1x16xf32>
    %150 = vector.extract_strided_slice %135 {offsets = [0, 48], sizes = [1, 16], strides = [1, 1]} : vector<1x64xf32> to vector<1x16xf32>
    %151 = arith.negf %150 : vector<1x16xf32>
    %152 = math.exp %151 : vector<1x16xf32>
    %cst_44 = arith.constant 1.000000e+00 : f32
    %153 = vector.broadcast %cst_44 : f32 to vector<1x16xf32>
    %154 = arith.addf %153, %152 : vector<1x16xf32>
    %155 = arith.divf %153, %154 : vector<1x16xf32>
    %156 = arith.mulf %147, %100 : vector<1x16xf32>
    %157 = arith.mulf %141, %149 : vector<1x16xf32>
    %158 = arith.addf %156, %157 : vector<1x16xf32>
    %159 = math.tanh %158 : vector<1x16xf32>
    %160 = arith.mulf %155, %159 : vector<1x16xf32>
    %161 = vector.extract_strided_slice %11 {offsets = [5, 0], sizes = [1, 64], strides = [1, 1]} : vector<8x64xf32> to vector<1x64xf32>
    %c0_45 = arith.constant 0 : index
    %c0_46 = arith.constant 0 : index
    %162 = vector.load %arg6[%c0_45, %c0_46] : memref<16x64xf32, #tpu.memory_space<vmem>>, vector<16x64xf32>
    %cst_47 = arith.constant dense<0.000000e+00> : vector<1x64xf32>
    %163 = tpu.matmul %131, %162, %cst_47 {dimension_numbers = #tpu.dot_dimension_numbers<[1], [0], [0], [1], [0, 0, 1, 1], [], []>} : vector<1x16xf32>, vector<16x64xf32>, vector<1x64xf32> -> vector<1x64xf32>
    %164 = arith.addf %161, %163 : vector<1x64xf32>
    %165 = vector.extract_strided_slice %164 {offsets = [0, 0], sizes = [1, 16], strides = [1, 1]} : vector<1x64xf32> to vector<1x16xf32>
    %166 = arith.negf %165 : vector<1x16xf32>
    %167 = math.exp %166 : vector<1x16xf32>
    %cst_48 = arith.constant 1.000000e+00 : f32
    %168 = vector.broadcast %cst_48 : f32 to vector<1x16xf32>
    %169 = arith.addf %168, %167 : vector<1x16xf32>
    %170 = arith.divf %168, %169 : vector<1x16xf32>
    %171 = vector.extract_strided_slice %164 {offsets = [0, 16], sizes = [1, 16], strides = [1, 1]} : vector<1x64xf32> to vector<1x16xf32>
    %172 = arith.negf %171 : vector<1x16xf32>
    %173 = math.exp %172 : vector<1x16xf32>
    %cst_49 = arith.constant 1.000000e+00 : f32
    %174 = vector.broadcast %cst_49 : f32 to vector<1x16xf32>
    %175 = arith.addf %174, %173 : vector<1x16xf32>
    %176 = arith.divf %174, %175 : vector<1x16xf32>
    %177 = vector.extract_strided_slice %164 {offsets = [0, 32], sizes = [1, 16], strides = [1, 1]} : vector<1x64xf32> to vector<1x16xf32>
    %178 = math.tanh %177 : vector<1x16xf32>
    %179 = vector.extract_strided_slice %164 {offsets = [0, 48], sizes = [1, 16], strides = [1, 1]} : vector<1x64xf32> to vector<1x16xf32>
    %180 = arith.negf %179 : vector<1x16xf32>
    %181 = math.exp %180 : vector<1x16xf32>
    %cst_50 = arith.constant 1.000000e+00 : f32
    %182 = vector.broadcast %cst_50 : f32 to vector<1x16xf32>
    %183 = arith.addf %182, %181 : vector<1x16xf32>
    %184 = arith.divf %182, %183 : vector<1x16xf32>
    %185 = arith.mulf %176, %129 : vector<1x16xf32>
    %186 = arith.mulf %170, %178 : vector<1x16xf32>
    %187 = arith.addf %185, %186 : vector<1x16xf32>
    %188 = math.tanh %187 : vector<1x16xf32>
    %189 = arith.mulf %184, %188 : vector<1x16xf32>
    %190 = vector.extract_strided_slice %6 {offsets = [3, 0], sizes = [1, 64], strides = [1, 1]} : vector<8x64xf32> to vector<1x64xf32>
    %c0_51 = arith.constant 0 : index
    %c0_52 = arith.constant 0 : index
    %191 = vector.load %arg3[%c0_51, %c0_52] : memref<16x64xf32, #tpu.memory_space<vmem>>, vector<16x64xf32>
    %cst_53 = arith.constant dense<0.000000e+00> : vector<1x64xf32>
    %192 = tpu.matmul %160, %191, %cst_53 {dimension_numbers = #tpu.dot_dimension_numbers<[1], [0], [0], [1], [0, 0, 1, 1], [], []>} : vector<1x16xf32>, vector<16x64xf32>, vector<1x64xf32> -> vector<1x64xf32>
    %193 = arith.addf %190, %192 : vector<1x64xf32>
    %194 = vector.extract_strided_slice %193 {offsets = [0, 0], sizes = [1, 16], strides = [1, 1]} : vector<1x64xf32> to vector<1x16xf32>
    %195 = arith.negf %194 : vector<1x16xf32>
    %196 = math.exp %195 : vector<1x16xf32>
    %cst_54 = arith.constant 1.000000e+00 : f32
    %197 = vector.broadcast %cst_54 : f32 to vector<1x16xf32>
    %198 = arith.addf %197, %196 : vector<1x16xf32>
    %199 = arith.divf %197, %198 : vector<1x16xf32>
    %200 = vector.extract_strided_slice %193 {offsets = [0, 16], sizes = [1, 16], strides = [1, 1]} : vector<1x64xf32> to vector<1x16xf32>
    %201 = arith.negf %200 : vector<1x16xf32>
    %202 = math.exp %201 : vector<1x16xf32>
    %cst_55 = arith.constant 1.000000e+00 : f32
    %203 = vector.broadcast %cst_55 : f32 to vector<1x16xf32>
    %204 = arith.addf %203, %202 : vector<1x16xf32>
    %205 = arith.divf %203, %204 : vector<1x16xf32>
    %206 = vector.extract_strided_slice %193 {offsets = [0, 32], sizes = [1, 16], strides = [1, 1]} : vector<1x64xf32> to vector<1x16xf32>
    %207 = math.tanh %206 : vector<1x16xf32>
    %208 = vector.extract_strided_slice %193 {offsets = [0, 48], sizes = [1, 16], strides = [1, 1]} : vector<1x64xf32> to vector<1x16xf32>
    %209 = arith.negf %208 : vector<1x16xf32>
    %210 = math.exp %209 : vector<1x16xf32>
    %cst_56 = arith.constant 1.000000e+00 : f32
    %211 = vector.broadcast %cst_56 : f32 to vector<1x16xf32>
    %212 = arith.addf %211, %210 : vector<1x16xf32>
    %213 = arith.divf %211, %212 : vector<1x16xf32>
    %214 = arith.mulf %205, %158 : vector<1x16xf32>
    %215 = arith.mulf %199, %207 : vector<1x16xf32>
    %216 = arith.addf %214, %215 : vector<1x16xf32>
    %217 = math.tanh %216 : vector<1x16xf32>
    %218 = arith.mulf %213, %217 : vector<1x16xf32>
    %219 = vector.extract_strided_slice %11 {offsets = [4, 0], sizes = [1, 64], strides = [1, 1]} : vector<8x64xf32> to vector<1x64xf32>
    %c0_57 = arith.constant 0 : index
    %c0_58 = arith.constant 0 : index
    %220 = vector.load %arg6[%c0_57, %c0_58] : memref<16x64xf32, #tpu.memory_space<vmem>>, vector<16x64xf32>
    %cst_59 = arith.constant dense<0.000000e+00> : vector<1x64xf32>
    %221 = tpu.matmul %189, %220, %cst_59 {dimension_numbers = #tpu.dot_dimension_numbers<[1], [0], [0], [1], [0, 0, 1, 1], [], []>} : vector<1x16xf32>, vector<16x64xf32>, vector<1x64xf32> -> vector<1x64xf32>
    %222 = arith.addf %219, %221 : vector<1x64xf32>
    %223 = vector.extract_strided_slice %222 {offsets = [0, 0], sizes = [1, 16], strides = [1, 1]} : vector<1x64xf32> to vector<1x16xf32>
    %224 = arith.negf %223 : vector<1x16xf32>
    %225 = math.exp %224 : vector<1x16xf32>
    %cst_60 = arith.constant 1.000000e+00 : f32
    %226 = vector.broadcast %cst_60 : f32 to vector<1x16xf32>
    %227 = arith.addf %226, %225 : vector<1x16xf32>
    %228 = arith.divf %226, %227 : vector<1x16xf32>
    %229 = vector.extract_strided_slice %222 {offsets = [0, 16], sizes = [1, 16], strides = [1, 1]} : vector<1x64xf32> to vector<1x16xf32>
    %230 = arith.negf %229 : vector<1x16xf32>
    %231 = math.exp %230 : vector<1x16xf32>
    %cst_61 = arith.constant 1.000000e+00 : f32
    %232 = vector.broadcast %cst_61 : f32 to vector<1x16xf32>
    %233 = arith.addf %232, %231 : vector<1x16xf32>
    %234 = arith.divf %232, %233 : vector<1x16xf32>
    %235 = vector.extract_strided_slice %222 {offsets = [0, 32], sizes = [1, 16], strides = [1, 1]} : vector<1x64xf32> to vector<1x16xf32>
    %236 = math.tanh %235 : vector<1x16xf32>
    %237 = vector.extract_strided_slice %222 {offsets = [0, 48], sizes = [1, 16], strides = [1, 1]} : vector<1x64xf32> to vector<1x16xf32>
    %238 = arith.negf %237 : vector<1x16xf32>
    %239 = math.exp %238 : vector<1x16xf32>
    %cst_62 = arith.constant 1.000000e+00 : f32
    %240 = vector.broadcast %cst_62 : f32 to vector<1x16xf32>
    %241 = arith.addf %240, %239 : vector<1x16xf32>
    %242 = arith.divf %240, %241 : vector<1x16xf32>
    %243 = arith.mulf %234, %187 : vector<1x16xf32>
    %244 = arith.mulf %228, %236 : vector<1x16xf32>
    %245 = arith.addf %243, %244 : vector<1x16xf32>
    %246 = math.tanh %245 : vector<1x16xf32>
    %247 = arith.mulf %242, %246 : vector<1x16xf32>
    %248 = vector.extract_strided_slice %6 {offsets = [4, 0], sizes = [1, 64], strides = [1, 1]} : vector<8x64xf32> to vector<1x64xf32>
    %c0_63 = arith.constant 0 : index
    %c0_64 = arith.constant 0 : index
    %249 = vector.load %arg3[%c0_63, %c0_64] : memref<16x64xf32, #tpu.memory_space<vmem>>, vector<16x64xf32>
    %cst_65 = arith.constant dense<0.000000e+00> : vector<1x64xf32>
    %250 = tpu.matmul %218, %249, %cst_65 {dimension_numbers = #tpu.dot_dimension_numbers<[1], [0], [0], [1], [0, 0, 1, 1], [], []>} : vector<1x16xf32>, vector<16x64xf32>, vector<1x64xf32> -> vector<1x64xf32>
    %251 = arith.addf %248, %250 : vector<1x64xf32>
    %252 = vector.extract_strided_slice %251 {offsets = [0, 0], sizes = [1, 16], strides = [1, 1]} : vector<1x64xf32> to vector<1x16xf32>
    %253 = arith.negf %252 : vector<1x16xf32>
    %254 = math.exp %253 : vector<1x16xf32>
    %cst_66 = arith.constant 1.000000e+00 : f32
    %255 = vector.broadcast %cst_66 : f32 to vector<1x16xf32>
    %256 = arith.addf %255, %254 : vector<1x16xf32>
    %257 = arith.divf %255, %256 : vector<1x16xf32>
    %258 = vector.extract_strided_slice %251 {offsets = [0, 16], sizes = [1, 16], strides = [1, 1]} : vector<1x64xf32> to vector<1x16xf32>
    %259 = arith.negf %258 : vector<1x16xf32>
    %260 = math.exp %259 : vector<1x16xf32>
    %cst_67 = arith.constant 1.000000e+00 : f32
    %261 = vector.broadcast %cst_67 : f32 to vector<1x16xf32>
    %262 = arith.addf %261, %260 : vector<1x16xf32>
    %263 = arith.divf %261, %262 : vector<1x16xf32>
    %264 = vector.extract_strided_slice %251 {offsets = [0, 32], sizes = [1, 16], strides = [1, 1]} : vector<1x64xf32> to vector<1x16xf32>
    %265 = math.tanh %264 : vector<1x16xf32>
    %266 = vector.extract_strided_slice %251 {offsets = [0, 48], sizes = [1, 16], strides = [1, 1]} : vector<1x64xf32> to vector<1x16xf32>
    %267 = arith.negf %266 : vector<1x16xf32>
    %268 = math.exp %267 : vector<1x16xf32>
    %cst_68 = arith.constant 1.000000e+00 : f32
    %269 = vector.broadcast %cst_68 : f32 to vector<1x16xf32>
    %270 = arith.addf %269, %268 : vector<1x16xf32>
    %271 = arith.divf %269, %270 : vector<1x16xf32>
    %272 = arith.mulf %263, %216 : vector<1x16xf32>
    %273 = arith.mulf %257, %265 : vector<1x16xf32>
    %274 = arith.addf %272, %273 : vector<1x16xf32>
    %275 = math.tanh %274 : vector<1x16xf32>
    %276 = arith.mulf %271, %275 : vector<1x16xf32>
    %277 = vector.extract_strided_slice %11 {offsets = [3, 0], sizes = [1, 64], strides = [1, 1]} : vector<8x64xf32> to vector<1x64xf32>
    %c0_69 = arith.constant 0 : index
    %c0_70 = arith.constant 0 : index
    %278 = vector.load %arg6[%c0_69, %c0_70] : memref<16x64xf32, #tpu.memory_space<vmem>>, vector<16x64xf32>
    %cst_71 = arith.constant dense<0.000000e+00> : vector<1x64xf32>
    %279 = tpu.matmul %247, %278, %cst_71 {dimension_numbers = #tpu.dot_dimension_numbers<[1], [0], [0], [1], [0, 0, 1, 1], [], []>} : vector<1x16xf32>, vector<16x64xf32>, vector<1x64xf32> -> vector<1x64xf32>
    %280 = arith.addf %277, %279 : vector<1x64xf32>
    %281 = vector.extract_strided_slice %280 {offsets = [0, 0], sizes = [1, 16], strides = [1, 1]} : vector<1x64xf32> to vector<1x16xf32>
    %282 = arith.negf %281 : vector<1x16xf32>
    %283 = math.exp %282 : vector<1x16xf32>
    %cst_72 = arith.constant 1.000000e+00 : f32
    %284 = vector.broadcast %cst_72 : f32 to vector<1x16xf32>
    %285 = arith.addf %284, %283 : vector<1x16xf32>
    %286 = arith.divf %284, %285 : vector<1x16xf32>
    %287 = vector.extract_strided_slice %280 {offsets = [0, 16], sizes = [1, 16], strides = [1, 1]} : vector<1x64xf32> to vector<1x16xf32>
    %288 = arith.negf %287 : vector<1x16xf32>
    %289 = math.exp %288 : vector<1x16xf32>
    %cst_73 = arith.constant 1.000000e+00 : f32
    %290 = vector.broadcast %cst_73 : f32 to vector<1x16xf32>
    %291 = arith.addf %290, %289 : vector<1x16xf32>
    %292 = arith.divf %290, %291 : vector<1x16xf32>
    %293 = vector.extract_strided_slice %280 {offsets = [0, 32], sizes = [1, 16], strides = [1, 1]} : vector<1x64xf32> to vector<1x16xf32>
    %294 = math.tanh %293 : vector<1x16xf32>
    %295 = vector.extract_strided_slice %280 {offsets = [0, 48], sizes = [1, 16], strides = [1, 1]} : vector<1x64xf32> to vector<1x16xf32>
    %296 = arith.negf %295 : vector<1x16xf32>
    %297 = math.exp %296 : vector<1x16xf32>
    %cst_74 = arith.constant 1.000000e+00 : f32
    %298 = vector.broadcast %cst_74 : f32 to vector<1x16xf32>
    %299 = arith.addf %298, %297 : vector<1x16xf32>
    %300 = arith.divf %298, %299 : vector<1x16xf32>
    %301 = arith.mulf %292, %245 : vector<1x16xf32>
    %302 = arith.mulf %286, %294 : vector<1x16xf32>
    %303 = arith.addf %301, %302 : vector<1x16xf32>
    %304 = math.tanh %303 : vector<1x16xf32>
    %305 = arith.mulf %300, %304 : vector<1x16xf32>
    %306 = vector.extract_strided_slice %6 {offsets = [5, 0], sizes = [1, 64], strides = [1, 1]} : vector<8x64xf32> to vector<1x64xf32>
    %c0_75 = arith.constant 0 : index
    %c0_76 = arith.constant 0 : index
    %307 = vector.load %arg3[%c0_75, %c0_76] : memref<16x64xf32, #tpu.memory_space<vmem>>, vector<16x64xf32>
    %cst_77 = arith.constant dense<0.000000e+00> : vector<1x64xf32>
    %308 = tpu.matmul %276, %307, %cst_77 {dimension_numbers = #tpu.dot_dimension_numbers<[1], [0], [0], [1], [0, 0, 1, 1], [], []>} : vector<1x16xf32>, vector<16x64xf32>, vector<1x64xf32> -> vector<1x64xf32>
    %309 = arith.addf %306, %308 : vector<1x64xf32>
    %310 = vector.extract_strided_slice %309 {offsets = [0, 0], sizes = [1, 16], strides = [1, 1]} : vector<1x64xf32> to vector<1x16xf32>
    %311 = arith.negf %310 : vector<1x16xf32>
    %312 = math.exp %311 : vector<1x16xf32>
    %cst_78 = arith.constant 1.000000e+00 : f32
    %313 = vector.broadcast %cst_78 : f32 to vector<1x16xf32>
    %314 = arith.addf %313, %312 : vector<1x16xf32>
    %315 = arith.divf %313, %314 : vector<1x16xf32>
    %316 = vector.extract_strided_slice %309 {offsets = [0, 16], sizes = [1, 16], strides = [1, 1]} : vector<1x64xf32> to vector<1x16xf32>
    %317 = arith.negf %316 : vector<1x16xf32>
    %318 = math.exp %317 : vector<1x16xf32>
    %cst_79 = arith.constant 1.000000e+00 : f32
    %319 = vector.broadcast %cst_79 : f32 to vector<1x16xf32>
    %320 = arith.addf %319, %318 : vector<1x16xf32>
    %321 = arith.divf %319, %320 : vector<1x16xf32>
    %322 = vector.extract_strided_slice %309 {offsets = [0, 32], sizes = [1, 16], strides = [1, 1]} : vector<1x64xf32> to vector<1x16xf32>
    %323 = math.tanh %322 : vector<1x16xf32>
    %324 = vector.extract_strided_slice %309 {offsets = [0, 48], sizes = [1, 16], strides = [1, 1]} : vector<1x64xf32> to vector<1x16xf32>
    %325 = arith.negf %324 : vector<1x16xf32>
    %326 = math.exp %325 : vector<1x16xf32>
    %cst_80 = arith.constant 1.000000e+00 : f32
    %327 = vector.broadcast %cst_80 : f32 to vector<1x16xf32>
    %328 = arith.addf %327, %326 : vector<1x16xf32>
    %329 = arith.divf %327, %328 : vector<1x16xf32>
    %330 = arith.mulf %321, %274 : vector<1x16xf32>
    %331 = arith.mulf %315, %323 : vector<1x16xf32>
    %332 = arith.addf %330, %331 : vector<1x16xf32>
    %333 = math.tanh %332 : vector<1x16xf32>
    %334 = arith.mulf %329, %333 : vector<1x16xf32>
    %335 = vector.extract_strided_slice %11 {offsets = [2, 0], sizes = [1, 64], strides = [1, 1]} : vector<8x64xf32> to vector<1x64xf32>
    %c0_81 = arith.constant 0 : index
    %c0_82 = arith.constant 0 : index
    %336 = vector.load %arg6[%c0_81, %c0_82] : memref<16x64xf32, #tpu.memory_space<vmem>>, vector<16x64xf32>
    %cst_83 = arith.constant dense<0.000000e+00> : vector<1x64xf32>
    %337 = tpu.matmul %305, %336, %cst_83 {dimension_numbers = #tpu.dot_dimension_numbers<[1], [0], [0], [1], [0, 0, 1, 1], [], []>} : vector<1x16xf32>, vector<16x64xf32>, vector<1x64xf32> -> vector<1x64xf32>
    %338 = arith.addf %335, %337 : vector<1x64xf32>
    %339 = vector.extract_strided_slice %338 {offsets = [0, 0], sizes = [1, 16], strides = [1, 1]} : vector<1x64xf32> to vector<1x16xf32>
    %340 = arith.negf %339 : vector<1x16xf32>
    %341 = math.exp %340 : vector<1x16xf32>
    %cst_84 = arith.constant 1.000000e+00 : f32
    %342 = vector.broadcast %cst_84 : f32 to vector<1x16xf32>
    %343 = arith.addf %342, %341 : vector<1x16xf32>
    %344 = arith.divf %342, %343 : vector<1x16xf32>
    %345 = vector.extract_strided_slice %338 {offsets = [0, 16], sizes = [1, 16], strides = [1, 1]} : vector<1x64xf32> to vector<1x16xf32>
    %346 = arith.negf %345 : vector<1x16xf32>
    %347 = math.exp %346 : vector<1x16xf32>
    %cst_85 = arith.constant 1.000000e+00 : f32
    %348 = vector.broadcast %cst_85 : f32 to vector<1x16xf32>
    %349 = arith.addf %348, %347 : vector<1x16xf32>
    %350 = arith.divf %348, %349 : vector<1x16xf32>
    %351 = vector.extract_strided_slice %338 {offsets = [0, 32], sizes = [1, 16], strides = [1, 1]} : vector<1x64xf32> to vector<1x16xf32>
    %352 = math.tanh %351 : vector<1x16xf32>
    %353 = vector.extract_strided_slice %338 {offsets = [0, 48], sizes = [1, 16], strides = [1, 1]} : vector<1x64xf32> to vector<1x16xf32>
    %354 = arith.negf %353 : vector<1x16xf32>
    %355 = math.exp %354 : vector<1x16xf32>
    %cst_86 = arith.constant 1.000000e+00 : f32
    %356 = vector.broadcast %cst_86 : f32 to vector<1x16xf32>
    %357 = arith.addf %356, %355 : vector<1x16xf32>
    %358 = arith.divf %356, %357 : vector<1x16xf32>
    %359 = arith.mulf %350, %303 : vector<1x16xf32>
    %360 = arith.mulf %344, %352 : vector<1x16xf32>
    %361 = arith.addf %359, %360 : vector<1x16xf32>
    %362 = math.tanh %361 : vector<1x16xf32>
    %363 = arith.mulf %358, %362 : vector<1x16xf32>
    %364 = vector.extract_strided_slice %6 {offsets = [6, 0], sizes = [1, 64], strides = [1, 1]} : vector<8x64xf32> to vector<1x64xf32>
    %c0_87 = arith.constant 0 : index
    %c0_88 = arith.constant 0 : index
    %365 = vector.load %arg3[%c0_87, %c0_88] : memref<16x64xf32, #tpu.memory_space<vmem>>, vector<16x64xf32>
    %cst_89 = arith.constant dense<0.000000e+00> : vector<1x64xf32>
    %366 = tpu.matmul %334, %365, %cst_89 {dimension_numbers = #tpu.dot_dimension_numbers<[1], [0], [0], [1], [0, 0, 1, 1], [], []>} : vector<1x16xf32>, vector<16x64xf32>, vector<1x64xf32> -> vector<1x64xf32>
    %367 = arith.addf %364, %366 : vector<1x64xf32>
    %368 = vector.extract_strided_slice %367 {offsets = [0, 0], sizes = [1, 16], strides = [1, 1]} : vector<1x64xf32> to vector<1x16xf32>
    %369 = arith.negf %368 : vector<1x16xf32>
    %370 = math.exp %369 : vector<1x16xf32>
    %cst_90 = arith.constant 1.000000e+00 : f32
    %371 = vector.broadcast %cst_90 : f32 to vector<1x16xf32>
    %372 = arith.addf %371, %370 : vector<1x16xf32>
    %373 = arith.divf %371, %372 : vector<1x16xf32>
    %374 = vector.extract_strided_slice %367 {offsets = [0, 16], sizes = [1, 16], strides = [1, 1]} : vector<1x64xf32> to vector<1x16xf32>
    %375 = arith.negf %374 : vector<1x16xf32>
    %376 = math.exp %375 : vector<1x16xf32>
    %cst_91 = arith.constant 1.000000e+00 : f32
    %377 = vector.broadcast %cst_91 : f32 to vector<1x16xf32>
    %378 = arith.addf %377, %376 : vector<1x16xf32>
    %379 = arith.divf %377, %378 : vector<1x16xf32>
    %380 = vector.extract_strided_slice %367 {offsets = [0, 32], sizes = [1, 16], strides = [1, 1]} : vector<1x64xf32> to vector<1x16xf32>
    %381 = math.tanh %380 : vector<1x16xf32>
    %382 = vector.extract_strided_slice %367 {offsets = [0, 48], sizes = [1, 16], strides = [1, 1]} : vector<1x64xf32> to vector<1x16xf32>
    %383 = arith.negf %382 : vector<1x16xf32>
    %384 = math.exp %383 : vector<1x16xf32>
    %cst_92 = arith.constant 1.000000e+00 : f32
    %385 = vector.broadcast %cst_92 : f32 to vector<1x16xf32>
    %386 = arith.addf %385, %384 : vector<1x16xf32>
    %387 = arith.divf %385, %386 : vector<1x16xf32>
    %388 = arith.mulf %379, %332 : vector<1x16xf32>
    %389 = arith.mulf %373, %381 : vector<1x16xf32>
    %390 = arith.addf %388, %389 : vector<1x16xf32>
    %391 = math.tanh %390 : vector<1x16xf32>
    %392 = arith.mulf %387, %391 : vector<1x16xf32>
    %393 = vector.extract_strided_slice %11 {offsets = [1, 0], sizes = [1, 64], strides = [1, 1]} : vector<8x64xf32> to vector<1x64xf32>
    %c0_93 = arith.constant 0 : index
    %c0_94 = arith.constant 0 : index
    %394 = vector.load %arg6[%c0_93, %c0_94] : memref<16x64xf32, #tpu.memory_space<vmem>>, vector<16x64xf32>
    %cst_95 = arith.constant dense<0.000000e+00> : vector<1x64xf32>
    %395 = tpu.matmul %363, %394, %cst_95 {dimension_numbers = #tpu.dot_dimension_numbers<[1], [0], [0], [1], [0, 0, 1, 1], [], []>} : vector<1x16xf32>, vector<16x64xf32>, vector<1x64xf32> -> vector<1x64xf32>
    %396 = arith.addf %393, %395 : vector<1x64xf32>
    %397 = vector.extract_strided_slice %396 {offsets = [0, 0], sizes = [1, 16], strides = [1, 1]} : vector<1x64xf32> to vector<1x16xf32>
    %398 = arith.negf %397 : vector<1x16xf32>
    %399 = math.exp %398 : vector<1x16xf32>
    %cst_96 = arith.constant 1.000000e+00 : f32
    %400 = vector.broadcast %cst_96 : f32 to vector<1x16xf32>
    %401 = arith.addf %400, %399 : vector<1x16xf32>
    %402 = arith.divf %400, %401 : vector<1x16xf32>
    %403 = vector.extract_strided_slice %396 {offsets = [0, 16], sizes = [1, 16], strides = [1, 1]} : vector<1x64xf32> to vector<1x16xf32>
    %404 = arith.negf %403 : vector<1x16xf32>
    %405 = math.exp %404 : vector<1x16xf32>
    %cst_97 = arith.constant 1.000000e+00 : f32
    %406 = vector.broadcast %cst_97 : f32 to vector<1x16xf32>
    %407 = arith.addf %406, %405 : vector<1x16xf32>
    %408 = arith.divf %406, %407 : vector<1x16xf32>
    %409 = vector.extract_strided_slice %396 {offsets = [0, 32], sizes = [1, 16], strides = [1, 1]} : vector<1x64xf32> to vector<1x16xf32>
    %410 = math.tanh %409 : vector<1x16xf32>
    %411 = vector.extract_strided_slice %396 {offsets = [0, 48], sizes = [1, 16], strides = [1, 1]} : vector<1x64xf32> to vector<1x16xf32>
    %412 = arith.negf %411 : vector<1x16xf32>
    %413 = math.exp %412 : vector<1x16xf32>
    %cst_98 = arith.constant 1.000000e+00 : f32
    %414 = vector.broadcast %cst_98 : f32 to vector<1x16xf32>
    %415 = arith.addf %414, %413 : vector<1x16xf32>
    %416 = arith.divf %414, %415 : vector<1x16xf32>
    %417 = arith.mulf %408, %361 : vector<1x16xf32>
    %418 = arith.mulf %402, %410 : vector<1x16xf32>
    %419 = arith.addf %417, %418 : vector<1x16xf32>
    %420 = math.tanh %419 : vector<1x16xf32>
    %421 = arith.mulf %416, %420 : vector<1x16xf32>
    %422 = vector.extract_strided_slice %6 {offsets = [7, 0], sizes = [1, 64], strides = [1, 1]} : vector<8x64xf32> to vector<1x64xf32>
    %c0_99 = arith.constant 0 : index
    %c0_100 = arith.constant 0 : index
    %423 = vector.load %arg3[%c0_99, %c0_100] : memref<16x64xf32, #tpu.memory_space<vmem>>, vector<16x64xf32>
    %cst_101 = arith.constant dense<0.000000e+00> : vector<1x64xf32>
    %424 = tpu.matmul %392, %423, %cst_101 {dimension_numbers = #tpu.dot_dimension_numbers<[1], [0], [0], [1], [0, 0, 1, 1], [], []>} : vector<1x16xf32>, vector<16x64xf32>, vector<1x64xf32> -> vector<1x64xf32>
    %425 = arith.addf %422, %424 : vector<1x64xf32>
    %426 = vector.extract_strided_slice %425 {offsets = [0, 0], sizes = [1, 16], strides = [1, 1]} : vector<1x64xf32> to vector<1x16xf32>
    %427 = arith.negf %426 : vector<1x16xf32>
    %428 = math.exp %427 : vector<1x16xf32>
    %cst_102 = arith.constant 1.000000e+00 : f32
    %429 = vector.broadcast %cst_102 : f32 to vector<1x16xf32>
    %430 = arith.addf %429, %428 : vector<1x16xf32>
    %431 = arith.divf %429, %430 : vector<1x16xf32>
    %432 = vector.extract_strided_slice %425 {offsets = [0, 16], sizes = [1, 16], strides = [1, 1]} : vector<1x64xf32> to vector<1x16xf32>
    %433 = arith.negf %432 : vector<1x16xf32>
    %434 = math.exp %433 : vector<1x16xf32>
    %cst_103 = arith.constant 1.000000e+00 : f32
    %435 = vector.broadcast %cst_103 : f32 to vector<1x16xf32>
    %436 = arith.addf %435, %434 : vector<1x16xf32>
    %437 = arith.divf %435, %436 : vector<1x16xf32>
    %438 = vector.extract_strided_slice %425 {offsets = [0, 32], sizes = [1, 16], strides = [1, 1]} : vector<1x64xf32> to vector<1x16xf32>
    %439 = math.tanh %438 : vector<1x16xf32>
    %440 = vector.extract_strided_slice %425 {offsets = [0, 48], sizes = [1, 16], strides = [1, 1]} : vector<1x64xf32> to vector<1x16xf32>
    %441 = arith.negf %440 : vector<1x16xf32>
    %442 = math.exp %441 : vector<1x16xf32>
    %cst_104 = arith.constant 1.000000e+00 : f32
    %443 = vector.broadcast %cst_104 : f32 to vector<1x16xf32>
    %444 = arith.addf %443, %442 : vector<1x16xf32>
    %445 = arith.divf %443, %444 : vector<1x16xf32>
    %446 = arith.mulf %437, %390 : vector<1x16xf32>
    %447 = arith.mulf %431, %439 : vector<1x16xf32>
    %448 = arith.addf %446, %447 : vector<1x16xf32>
    %449 = math.tanh %448 : vector<1x16xf32>
    %450 = arith.mulf %445, %449 : vector<1x16xf32>
    %451 = vector.extract_strided_slice %11 {offsets = [0, 0], sizes = [1, 64], strides = [1, 1]} : vector<8x64xf32> to vector<1x64xf32>
    %c0_105 = arith.constant 0 : index
    %c0_106 = arith.constant 0 : index
    %452 = vector.load %arg6[%c0_105, %c0_106] : memref<16x64xf32, #tpu.memory_space<vmem>>, vector<16x64xf32>
    %cst_107 = arith.constant dense<0.000000e+00> : vector<1x64xf32>
    %453 = tpu.matmul %421, %452, %cst_107 {dimension_numbers = #tpu.dot_dimension_numbers<[1], [0], [0], [1], [0, 0, 1, 1], [], []>} : vector<1x16xf32>, vector<16x64xf32>, vector<1x64xf32> -> vector<1x64xf32>
    %454 = arith.addf %451, %453 : vector<1x64xf32>
    %455 = vector.extract_strided_slice %454 {offsets = [0, 0], sizes = [1, 16], strides = [1, 1]} : vector<1x64xf32> to vector<1x16xf32>
    %456 = arith.negf %455 : vector<1x16xf32>
    %457 = math.exp %456 : vector<1x16xf32>
    %cst_108 = arith.constant 1.000000e+00 : f32
    %458 = vector.broadcast %cst_108 : f32 to vector<1x16xf32>
    %459 = arith.addf %458, %457 : vector<1x16xf32>
    %460 = arith.divf %458, %459 : vector<1x16xf32>
    %461 = vector.extract_strided_slice %454 {offsets = [0, 16], sizes = [1, 16], strides = [1, 1]} : vector<1x64xf32> to vector<1x16xf32>
    %462 = arith.negf %461 : vector<1x16xf32>
    %463 = math.exp %462 : vector<1x16xf32>
    %cst_109 = arith.constant 1.000000e+00 : f32
    %464 = vector.broadcast %cst_109 : f32 to vector<1x16xf32>
    %465 = arith.addf %464, %463 : vector<1x16xf32>
    %466 = arith.divf %464, %465 : vector<1x16xf32>
    %467 = vector.extract_strided_slice %454 {offsets = [0, 32], sizes = [1, 16], strides = [1, 1]} : vector<1x64xf32> to vector<1x16xf32>
    %468 = math.tanh %467 : vector<1x16xf32>
    %469 = vector.extract_strided_slice %454 {offsets = [0, 48], sizes = [1, 16], strides = [1, 1]} : vector<1x64xf32> to vector<1x16xf32>
    %470 = arith.negf %469 : vector<1x16xf32>
    %471 = math.exp %470 : vector<1x16xf32>
    %cst_110 = arith.constant 1.000000e+00 : f32
    %472 = vector.broadcast %cst_110 : f32 to vector<1x16xf32>
    %473 = arith.addf %472, %471 : vector<1x16xf32>
    %474 = arith.divf %472, %473 : vector<1x16xf32>
    %475 = arith.mulf %466, %419 : vector<1x16xf32>
    %476 = arith.mulf %460, %468 : vector<1x16xf32>
    %477 = arith.addf %475, %476 : vector<1x16xf32>
    %478 = math.tanh %477 : vector<1x16xf32>
    %479 = arith.mulf %474, %478 : vector<1x16xf32>
    %480 = tpu.concatenate %44, %102, %160, %218, %276, %334, %392, %450 in 0 : vector<1x16xf32>, vector<1x16xf32>, vector<1x16xf32>, vector<1x16xf32>, vector<1x16xf32>, vector<1x16xf32>, vector<1x16xf32>, vector<1x16xf32> -> vector<8x16xf32>
    %481 = tpu.concatenate %479, %421, %363, %305, %247, %189, %131, %73 in 0 : vector<1x16xf32>, vector<1x16xf32>, vector<1x16xf32>, vector<1x16xf32>, vector<1x16xf32>, vector<1x16xf32>, vector<1x16xf32>, vector<1x16xf32> -> vector<8x16xf32>
    %482 = tpu.concatenate %480, %481 in 1 : vector<8x16xf32>, vector<8x16xf32> -> vector<8x32xf32>
    %c0_111 = arith.constant 0 : index
    %c0_112 = arith.constant 0 : index
    %483 = vector.load %arg8[%c0_111, %c0_112] : memref<32x5xf32, #tpu.memory_space<vmem>>, vector<32x5xf32>
    %cst_113 = arith.constant dense<0.000000e+00> : vector<8x5xf32>
    %484 = tpu.matmul %482, %483, %cst_113 {dimension_numbers = #tpu.dot_dimension_numbers<[1], [0], [0], [1], [0, 0, 1, 1], [], []>} : vector<8x32xf32>, vector<32x5xf32>, vector<8x5xf32> -> vector<8x5xf32>
    %c0_114 = arith.constant 0 : index
    %c0_115 = arith.constant 0 : index
    %485 = vector.load %arg9[%c0_114, %c0_115] : memref<1x5xf32, #tpu.memory_space<vmem>>, vector<1x5xf32>
    %486 = vector.broadcast %485 : vector<1x5xf32> to vector<8x5xf32>
    %487 = arith.addf %484, %486 : vector<8x5xf32>
    %c0_116 = arith.constant 0 : index
    %c0_117 = arith.constant 0 : index
    %c0_118 = arith.constant 0 : index
    %488 = vector.load %arg10[%c0_116, %c0_117, %c0_118] : memref<1x8x5xf32, #tpu.memory_space<vmem>>, vector<1x8x5xf32>
    %489 = vector.shape_cast %488 : vector<1x8x5xf32> to vector<8x5xf32>
    %490 = vector.shape_cast %487 : vector<8x5xf32> to vector<1x8x5xf32>
    tpu.vector_store %arg10[%c0_116, %c0_117, %c0_118], %490 {strides = array<i32>} : memref<1x8x5xf32, #tpu.memory_space<vmem>>, vector<1x8x5xf32>,
    return
  }
  func.func @transform_0(%arg0: i32) -> (i32, i32, i32) {
    %c0_i32 = arith.constant 0 : i32
    %c0_i32_0 = arith.constant 0 : i32
    %c0_i32_1 = arith.constant 0 : i32
    return %arg0, %c0_i32, %c0_i32_0 : i32, i32, i32
  }
  func.func @transform_1(%arg0: i32) -> (i32, i32) {
    %c0_i32 = arith.constant 0 : i32
    %c0_i32_0 = arith.constant 0 : i32
    %c0_i32_1 = arith.constant 0 : i32
    return %c0_i32, %c0_i32_0 : i32, i32
  }
  func.func @transform_2(%arg0: i32) -> (i32, i32) {
    %c0_i32 = arith.constant 0 : i32
    %c0_i32_0 = arith.constant 0 : i32
    %c0_i32_1 = arith.constant 0 : i32
    return %c0_i32, %c0_i32_0 : i32, i32
  }
  func.func @transform_3(%arg0: i32) -> (i32, i32) {
    %c0_i32 = arith.constant 0 : i32
    %c0_i32_0 = arith.constant 0 : i32
    %c0_i32_1 = arith.constant 0 : i32
    return %c0_i32, %c0_i32_0 : i32, i32
  }
  func.func @transform_4(%arg0: i32) -> (i32, i32) {
    %c0_i32 = arith.constant 0 : i32
    %c0_i32_0 = arith.constant 0 : i32
    %c0_i32_1 = arith.constant 0 : i32
    return %c0_i32, %c0_i32_0 : i32, i32
  }
  func.func @transform_5(%arg0: i32) -> (i32, i32) {
    %c0_i32 = arith.constant 0 : i32
    %c0_i32_0 = arith.constant 0 : i32
    %c0_i32_1 = arith.constant 0 : i32
    return %c0_i32, %c0_i32_0 : i32, i32
  }
  func.func @transform_6(%arg0: i32) -> (i32, i32) {
    %c0_i32 = arith.constant 0 : i32
    %c0_i32_0 = arith.constant 0 : i32
    %c0_i32_1 = arith.constant 0 : i32
    return %c0_i32, %c0_i32_0 : i32, i32
  }
  func.func @transform_7(%arg0: i32) -> (i32, i32) {
    %c0_i32 = arith.constant 0 : i32
    %c0_i32_0 = arith.constant 0 : i32
    %c0_i32_1 = arith.constant 0 : i32
    return %c0_i32, %c0_i32_0 : i32, i32
  }
  func.func @transform_8(%arg0: i32) -> (i32, i32) {
    %c0_i32 = arith.constant 0 : i32
    %c0_i32_0 = arith.constant 0 : i32
    %c0_i32_1 = arith.constant 0 : i32
    return %c0_i32, %c0_i32_0 : i32, i32
  }
  func.func @transform_9(%arg0: i32) -> (i32, i32, i32) {
    %c0_i32 = arith.constant 0 : i32
    %c0_i32_0 = arith.constant 0 : i32
    %c0_i32_1 = arith.constant 0 : i32
    return %arg0, %c0_i32, %c0_i32_0 : i32, i32, i32
  }
}

</mosaic_0001>

<bundles_post_ra>
// kernel: bert_lstm_forward.4
= control target key start
LH: loop header
LB: loop body
LE: loop exit
PB: predicated region body
PF: predicated region fallthrough
CT: control target
= control target key end

     0   :  { %vm18_vm0 = vcmask 261120   ;;  %s118_s0 = inlined_call_operand.vmem [shape: f32[16,32], index: 0, kind: input, shape index: {}]   ;;  %s119_s1 = inlined_call_operand.vmem [shape: f32[1,32], index: 1, kind: input, shape index: {}]   ;;  %s120_s2 = inlined_call_operand.vmem [shape: f32[1,32], index: 2, kind: input, shape index: {}]   ;;  %s121_s3 = inlined_call_operand.vmem [shape: f32[16,32], index: 3, kind: output, shape index: {}]  }
   0x1   :  { %v14_v0 = vld [vmem:[%s118_s0] sm:$0xff]  ;;  %v15_v1 = vld [vmem:[%s118_s0 + $0x8] sm:$0xff] }
   0x2   :  { %v19_v2 = vsel %vm18_vm0, %v14_v0, 0.0  ;;  %v22_v3 = vsel %vm18_vm0, %v15_v1, 0.0  ;;  %v68_v21 = vld [vmem:[%s119_s1] ss:$0 sm:$0xff] }
   0x3   :  { %20 = vadd.xlane.f32.xlu0 %v19_v2  ;;  %v69_v23 = vld [vmem:[%s120_s2] ss:$0 sm:$0xff] }
   0x7   :  { %23 = vadd.xlane.f32.xlu0 %v22_v3 }
  0x90   :  { %v21_v4 = vpop.xlane.xlu0 %20 }
  0x91   :  { %v26_v5 = vmul.f32 0.03125, %v21_v4 }
  0x93   :  { %v28_v6 = vsub.f32 %v14_v0, %v26_v5 }
  0x94   :  { %v24_v7 = vpop.xlane.xlu0 %23 }
  0x95   :  { %v27_v8 = vmul.f32 0.03125, %v24_v7  ;;  %v30_v9 = vmul.f32 %v28_v6, %v28_v6 }
  0x97   :  { %v29_v10 = vsub.f32 %v15_v1, %v27_v8  ;;  %v32_v11 = vsel %vm18_vm0, %v30_v9, 0.0 }
  0x98   :  { %33 = vadd.xlane.f32.xlu1 %v32_v11 }
  0x99   :  { %v31_v12 = vmul.f32 %v29_v10, %v29_v10 }
  0x9b   :  { %v35_v13 = vsel %vm18_vm0, %v31_v12, 0.0 }
  0x9c   :  { %36 = vadd.xlane.f32.xlu1 %v35_v13 }
 0x125   :  { %v34_v14 = vpop.xlane.xlu1 %33 }
 0x126   :  { %v38_v15 = vmul.f32 0.03125, %v34_v14 }
 0x128   :  { %v40_v16 = vadd.f32 1e-12, %v38_v15 }
 0x129   :  { %v37_v17 = vpop.xlane.xlu1 %36 }
 0x12a   :  { %70 = vrsqrt.f32 %v40_v16  ;;  %v39_v18 = vmul.f32 0.03125, %v37_v17 }
 0x12c   :  { %v41_v19 = vadd.f32 1e-12, %v39_v18 }
 0x12e   :  { %72 = vrsqrt.f32 %v41_v19 }
 0x134   :  { %v71_v20 = vpop.eup %70 }
 0x135   :  { %v44_v22 = vmul.f32 %v71_v20, %v28_v6 }
 0x137   :  { %v52_v24 = vmul.f32 %v68_v21, %v44_v22 }
 0x138   :  { %v73_v25 = vpop.eup %72 }
 0x139   :  { %v60_v26 = vadd.f32 %v69_v23, %v52_v24  ;;  %v45_v27 = vmul.f32 %v73_v25, %v29_v10 }
 0x13b   :  { %62 = vst.msk [vmem:[%s121_s3] sm:$0xff] %vm18_vm0, %v60_v26  ;;  %v53_v28 = vmul.f32 %v68_v21, %v45_v27 }
 0x13d   :  { %v61_v29 = vadd.f32 %v69_v23, %v53_v28 }
 0x13f   :  { %63 = vst.msk [vmem:[%s121_s3 + $0x8] sm:$0xff] %vm18_vm0, %v61_v29 }

// kernel: bert_lstm_forward.5
= control target key start
LH: loop header
LB: loop body
LE: loop exit
PB: predicated region body
PF: predicated region fallthrough
CT: control target
= control target key end

     0   :  { %s1988_s29 = smov 0   ;;  %s2189_s0 = inlined_call_operand.vmem [shape: f32[2,8,32], index: 0, kind: input, shape index: {}]   ;;  %s2190_s1 = inlined_call_operand.vmem [shape: f32[2,1,8], index: 1, kind: input, shape index: {}]   ;;  %s2191_s2 = inlined_call_operand.vmem [shape: f32[32,96], index: 2, kind: input, shape index: {}]   ;;  %s2192_s3 = inlined_call_operand.vmem [shape: f32[1,96], index: 3, kind: input, shape index: {}]   ;;  %s2193_s4 = inlined_call_operand.vmem [shape: f32[32,32], index: 4, kind: input, shape index: {}]   ;;  %s2194_s5 = inlined_call_operand.vmem [shape: f32[1,32], index: 5, kind: input, shape index: {}]   ;;  %s2195_s6 = inlined_call_operand.vmem [shape: f32[1,32], index: 6, kind: input, shape index: {}]   ;;  %s2196_s7 = inlined_call_operand.vmem [shape: f32[1,32], index: 7, kind: input, shape index: {}]   ;;  %s2197_s8 = inlined_call_operand.vmem [shape: f32[32,64], index: 8, kind: input, shape index: {}]   ;;  %s2198_s9 = inlined_call_operand.vmem [shape: f32[1,64], index: 9, kind: input, shape index: {}]   ;;  %s2199_s10 = inlined_call_operand.vmem [shape: f32[64,32], index: 10, kind: input, shape index: {}]   ;;  %s2200_s11 = inlined_call_operand.vmem [shape: f32[1,32], index: 11, kind: input, shape index: {}]   ;;  %s2201_s12 = inlined_call_operand.vmem [shape: f32[1,32], index: 12, kind: input, shape index: {}]   ;;  %s2202_s13 = inlined_call_operand.vmem [shape: f32[1,32], index: 13, kind: input, shape index: {}]   ;;  %s2203_s14 = inlined_call_operand.vmem [shape: f32[2,8,32], index: 14, kind: output, shape index: {}]  }
   0x1 LB: > { %s1645_s30 = sadd.s32 4294967295, %s1894_s29   ;;  %p1649_p0 = scmp.ge.s32.totalorder %s1894_s29, 1  ;;  %s1894_s29 = sphi %s1988_s29, %s24_s29  }
   0x2   : > { %p419_p1 = scmp.lt.s32.totalorder %s1894_s29, 3 }
   0x4   : > { %p420_p2 = pnand %p1649_p0, %p419_p1 }
   0x5   : > { %v479_v0 = vld [vmem:[%s2191_s2] sm:$0xff] (!%p420_p2)  ;;  %v480_v1 = vld [vmem:[%s2191_s2 + $0x8] sm:$0xff] (!%p420_p2)  ;;  %v481_v2 = vld [vmem:[%s2191_s2 + $0x10] sm:$0xff] (!%p420_p2)  ;;  %v1896_v3 = vmov (!%p420_p2), 0.0|0.0   ;;  %vm1897_vm0 = vmmov (!%p420_p2), 0   ;;  %v1898_v6 = vmov (!%p420_p2), 0.0  }
   0x6   : > { %423 = sbr.rel (%p420_p2) target bundleno = 2562 (0xa02), region = 76  ;;  %1811 = vmatprep.subr.bf16.mxu1 (!%p420_p2), %v1896_v3  ;;  %v1812_v4 = vpack.c.bf16 (!%p420_p2), %v480_v1, %v479_v0  ;;  %v482_v5 = vld [vmem:[%s2191_s2 + $0x18] sm:$0xff] (!%p420_p2)  ;;  %1727 = vmatprep.mubr.msk.f32.mxu1 (!%p420_p2), %vm1897_vm0, %v1898_v6  ;;  %p466_p3 = scmp.lt.s32.totalorder (!%p420_p2), %s1645_s30, 1  ;;  %vm490_vm1 = vcmask (!%p420_p2), 261120   ;;  %v1652_v9 = vld [vmem:[%s2192_s3] ss:$0 sm:$0xff] (!%p420_p2) }
   0x7   : > { %1740 = vmatprep.subr.mxu0 (!%p420_p2), %v1898_v6  ;;  %1742 = vmatprep.mubr.msk.f32.mxu0 (!%p420_p2), %vm1897_vm0, %v1898_v6  ;;  %v1815_v7 = vpack.c.bf16 (!%p420_p2), %v482_v5, %v481_v2  ;;  %s1899_s15 = smov (!%p420_p2), 120   ;;  %s1900_s16 = smov (!%p420_p2), 96   ;;  %vm567_vm2 = vcmask (!%p420_p2), 64512   ;;  %vm1251_vm3 = vcmask (!%p420_p2), 130048   ;;  %vm1253_vm4 = vcmask (!%p420_p2), 195584  }
   0x8   : > { %1813 = vmatpush3.bf16.msra.mxu1 (!%p420_p2), %v1812_v4  ;;  %s1901_s17 = smov (!%p420_p2), 80   ;;  %s1902_s18 = smov (!%p420_p2), 88   ;;  %vm1478_vm5 = vcmask (!%p420_p2), 523264  }
   0x9   : > { %1814 = vmatprep.subr.bf16.mxu1 (!%p420_p2), %v1896_v3  ;;  %s1903_s19 = smov (!%p420_p2), 72   ;;  %s1904_s20 = smov (!%p420_p2), 112  }
   0xa   : > { %s1905_s21 = smov (!%p420_p2), 104   ;;  %s1907_s27 = smov (!%p420_p2), 64  }
   0xb   : > { %s1908_s28 = smov (!%p420_p2), 48  }
   0xc   : > { %1816 = vmatpush3.bf16.msra.mxu1 (!%p420_p2), %v1815_v7 }
   0xd   : > { %s2205_s30 = smov (!%p466_p3, %s1645_s30), 1  ;;  %1730 = vmatprep.subr.mxu1 %v1898_v6 }
   0xe   : > { %s1650_s23 = sshll.u32 %s2205_s30, 3  ;;  %s472_s25 = scalar_lea.vmem %s2190_s1, %s2205_s30 }
   0xf   : > { %s469_s26 = scalar_lea.vmem %s2189_s0, %s1650_s23  ;;  %v1656_v21 = vld [vmem:[%s472_s25] ss:$0 sm:$0xff] }
  0x10   : > { %v2023_v8 = vld [vmem:[%s469_s26] sm:$0xff]  ;;  %s1906_s26 = smov 56  }
  0x11   : > { %1728 = vmatmul.mubr.msk.f32.vlgmr.msra.gmra.mrb[0].mxu1 %vm490_vm1, %v2023_v8 }
  0x12   : > { %1732 = vmatprep.mubr.msk.f32.mxu1 %vm1897_vm0, %v1898_v6 }
  0xe4   : > { %v560_v10 = vpop.f32.mrb[0].mxu1 }
  0xe5   : > { %v2033_v11 = vadd.f32 %v1652_v9, %v560_v10  ;;  %v1729_v12 = vpop.f32.mrb[1].mxu1 }
  0xe7   : > { %737 = vrot.lane.b32.xlu1 %v2033_v11, %s1899_s15  ;;  %565 = vrot.lane.b32.xlu0 %v2033_v11, %s1900_s16  ;;  %s1909_s15 = smov 40  }
  0xeb   : > { %906 = vrot.lane.b32.xlu1 %v2033_v11, %s1901_s17  ;;  %739 = vrot.lane.b32.xlu0 %v2033_v11, %s1902_s18 }
  0xef   : > { %1073 = vrot.lane.b32.xlu1 %v2033_v11, %s1903_s19  ;;  %904 = vrot.lane.b32.xlu0 %v2033_v11, %s1904_s20  ;;  %s1910_s20 = smov 8  }
  0xf3   : > { %1071 = vrot.lane.b32.xlu0 %v2033_v11, %s1905_s21 }
 0x159   : > { %v738_v13 = vpop.permute.xlu1 %737  ;;  %v566_v14 = vpop.permute.xlu0 %565 }
 0x15a   : > { %1731 = vmatpush3.xpose.msk.msra.mxu1 %vm567_vm2, %v566_v14 }
 0x15b   : > { %1735 = vmatprep.subr.mxu1 %v1898_v6 }
 0x15d   : > { %1733 = vmatmul.mubr.msk.f32.vlgmr.msra.gmra.mrb[2].mxu1 %vm567_vm2, %v2033_v11  ;;  %v740_v15 = vpop.permute.xlu0 %739  ;;  %v907_v16 = vpop.permute.xlu1 %906 }
 0x15e   : > { %1741 = vmatpush3.xpose.msk.msra.mxu0 %vm567_vm2, %v740_v15  ;;  %1737 = vmatprep.mubr.msk.f32.mxu1 %vm1897_vm0, %v1898_v6 }
 0x15f   : > { %1750 = vmatprep.subr.mxu0 %v1898_v6 }
 0x161   : > { %1743 = vmatmul.mubr.msk.f32.vlgmr.msra.gmra.mrb[0].mxu0 %vm567_vm2, %v738_v13  ;;  %v905_v17 = vpop.permute.xlu0 %904  ;;  %v1074_v18 = vpop.permute.xlu1 %1073 }
 0x162   : > { %1751 = vmatpush3.xpose.msk.msra.mxu0 %vm567_vm2, %v907_v16  ;;  %1752 = vmatprep.mubr.msk.f32.mxu0 %vm1897_vm0, %v1898_v6  ;;  %v1255_v16 = vld [vmem:[%s2193_s4] sm:$0xff] }
 0x163   : > { %1760 = vmatprep.subr.mxu0 %v1898_v6 }
 0x165   : > { %1753 = vmatmul.mubr.msk.f32.vlgmr.msra.gmra.mrb[2].mxu0 %vm567_vm2, %v905_v17  ;;  %v1072_v19 = vpop.permute.xlu0 %1071  ;;  %v1256_v17 = vld [vmem:[%s2193_s4 + $0x8] sm:$0xff] }
 0x166   : > { %1761 = vmatpush3.xpose.msk.msra.mxu0 %vm567_vm2, %v1074_v18  ;;  %1762 = vmatprep.mubr.msk.f32.mxu0 %vm1897_vm0, %v1898_v6  ;;  %v1818_v18 = vpack.c.bf16 %v1256_v17, %v1255_v16 }
 0x167   : > { %1817 = vmatprep.subr.bf16.mxu0 %v1896_v3 }
 0x169   : > { %1763 = vmatmul.mubr.msk.f32.vlgmr.msra.gmra.mrb[4].mxu0 %vm567_vm2, %v1072_v19 }
 0x16a   : > { %1778 = vmatprep.mubr.msk.f32.mxu0 %vm1897_vm0, %v1898_v6  ;;  %1819 = vmatpush3.bf16.msra.mxu0 %v1818_v18 }
 0x16b   : > { %1820 = vmatprep.subr.bf16.mxu0 %v1896_v3 }
 0x230   : > { %v638_v20 = vpop.f32.mrb[2].mxu1 }
 0x231   : > { %v642_v22 = vmul.f32 0.35355338, %v638_v20  ;;  %v1734_v23 = vpop.f32.mrb[3].mxu1 }
 0x232   : > { %v1257_v23 = vld [vmem:[%s2193_s4 + $0x10] sm:$0xff] }
 0x233   : > { %v649_v24 = vadd.f32 %v1656_v21, %v642_v22 }
 0x234   : > { %v811_v25 = vpop.f32.mrb[0].mxu0 }
 0x235   : > { %v815_v26 = vmul.f32 0.35355338, %v811_v25  ;;  %v1744_v27 = vpop.f32.mrb[1].mxu0  ;;  %v650_v28 = vsel %vm567_vm2, %v649_v24, -inf }
 0x236   : > { %651 = vmax.xlane.f32.xlu1 %v650_v28 }
 0x237   : > { %v816_v29 = vadd.f32 %v1656_v21, %v815_v26 }
 0x238   : > { %v978_v30 = vpop.f32.mrb[2].mxu0 }
 0x239   : > { %v982_v31 = vmul.f32 0.35355338, %v978_v30  ;;  %v1754_v32 = vpop.f32.mrb[3].mxu0  ;;  %v817_v33 = vsel %vm567_vm2, %v816_v29, -inf }
 0x23a   : > { %818 = vmax.xlane.f32.xlu0 %v817_v33 }
 0x23b   : > { %v983_v34 = vadd.f32 %v1656_v21, %v982_v31 }
 0x23c   : > { %v1145_v35 = vpop.f32.mrb[4].mxu0 }
 0x23d   : > { %v1149_v36 = vmul.f32 0.35355338, %v1145_v35  ;;  %v1764_v37 = vpop.f32.mrb[5].mxu0  ;;  %v984_v38 = vsel %vm567_vm2, %v983_v34, -inf }
 0x23e   : > { %985 = vmax.xlane.f32.xlu0 %v984_v38 }
 0x23f   : > { %v1150_v39 = vadd.f32 %v1656_v21, %v1149_v36  ;;  %v1667_v36 = vld [vmem:[%s2194_s5] ss:$0 sm:$0xff] }
 0x241   : > { %v1151_v40 = vsel %vm567_vm2, %v1150_v39, -inf }
 0x242   : > { %1152 = vmax.xlane.f32.xlu1 %v1151_v40 }
 0x253   : > { %828 = vrot.lane.b32.xlu1 %v2033_v11, %s1906_s26  ;;  %s1911_s26 = smov 16  }
 0x2c3   : > { %v652_v41 = vpop.xlane.xlu1 %651 }
 0x2c4   : > { %v653_v42 = vsub.f32 %v649_v24, %v652_v41  ;;  %v1258_v24 = vld [vmem:[%s2193_s4 + $0x18] sm:$0xff] }
 0x2c5   : > { %v1821_v25 = vpack.c.bf16 %v1258_v24, %v1257_v23 }
 0x2c6   : > { %v654_v43 = vmul.f32 1.442695, %v653_v42 }
 0x2c7   : > { %v819_v44 = vpop.xlane.xlu0 %818  ;;  %1822 = vmatpush3.bf16.msra.mxu0 %v1821_v25 }
 0x2c8   : > { %1866 = vpow2.f32 %v654_v43  ;;  %v820_v45 = vsub.f32 %v816_v29, %v819_v44  ;;  %1829 = vmatprep.subr.bf16.mxu0 %v1896_v3 }
 0x2ca   : > { %v821_v46 = vmul.f32 1.442695, %v820_v45 }
 0x2cb   : > { %v986_v56 = vpop.xlane.xlu0 %985 }
 0x2cc   : > { %1868 = vpow2.f32 %v821_v46  ;;  %v987_v57 = vsub.f32 %v983_v34, %v986_v56 }
 0x2ce   : > { %v988_v58 = vmul.f32 1.442695, %v987_v57  ;;  %v1670_v57 = vld [vmem:[%s2196_s7] ss:$0 sm:$0xff] }
 0x2cf   : > { %v1153_v47 = vpop.xlane.xlu1 %1152 }
 0x2d0   : > { %v1154_v48 = vsub.f32 %v1150_v39, %v1153_v47  ;;  %v1371_v47 = vld [vmem:[%s2197_s8 + $0x8] sm:$0xff] }
 0x2d2   : > { %v1867_v49 = vpop.eup %1866  ;;  %v1155_v50 = vmul.f32 1.442695, %v1154_v48 }
 0x2d3   : > { %v656_v51 = vsel %vm567_vm2, %v1867_v49, 0.0  ;;  %v829_v61 = vpop.permute.xlu1 %828 }
 0x2d4   : > { %1870 = vpow2.f32 %v1155_v50  ;;  %657 = vadd.xlane.f32.xlu0 %v656_v51 }
 0x2d5   : > { %1872 = vpow2.f32 %v988_v58 }
 0x2d6   : > { %v1869_v52 = vpop.eup %1868 }
 0x2d7   : > { %v823_v53 = vsel %vm567_vm2, %v1869_v52, 0.0 }
 0x2d8   : > { %824 = vadd.xlane.f32.xlu1 %v823_v53 }
 0x2de   : > { %v1871_v54 = vpop.eup %1870 }
 0x2df   : > { %v1157_v55 = vsel %vm567_vm2, %v1871_v54, 0.0  ;;  %v1873_v59 = vpop.eup %1872 }
 0x2e0   : > { %1158 = vadd.xlane.f32.xlu1 %v1157_v55  ;;  %v990_v60 = vsel %vm567_vm2, %v1873_v59, 0.0  ;;  %v1669_v55 = vld [vmem:[%s2195_s6] ss:$0 sm:$0xff] }
 0x2ea   : > { %661 = vrot.lane.b32.xlu0 %v2033_v11, %s1907_s27  ;;  %s1912_s27 = smov 24  }
 0x2f1   : > { %995 = vrot.lane.b32.xlu1 %v2033_v11, %s1908_s28 }
 0x309   : > { %991 = vadd.xlane.f32.xlu0 %v990_v60  ;;  %v1463_v60 = vld [vmem:[%s2199_s10] sm:$0xff] }
 0x31f   : > { %1162 = vrot.lane.b32.xlu0 %v2033_v11, %s1909_s15  ;;  %s476_s15 = scalar_lea.vmem %s2203_s14, %s1650_s23 }
 0x361   : > { %v658_v62 = vpop.xlane.xlu0 %657 }
 0x362   : > { %1874 = vrcp.f32 %v658_v62 }
 0x365   : > { %v662_v63 = vpop.permute.xlu0 %661  ;;  %v825_v0 = vpop.xlane.xlu1 %824 }
 0x366   : > { %1876 = vrcp.f32 %v825_v0  ;;  %1736 = vmatpush3.msra.mxu1 %v662_v63  ;;  %v1465_v63 = vld [vmem:[%s2199_s10 + $0x10] sm:$0xff]  ;;  %v1466_v0 = vld [vmem:[%s2199_s10 + $0x18] sm:$0xff] }
 0x367   : > { %1745 = vmatprep.subr.mxu1 %v1898_v6 }
 0x36c   : > { %v1875_v1 = vpop.eup %1874 }
 0x36d   : > { %v660_v2 = vmul.f32 %v1875_v1, %v1867_v49  ;;  %v1159_v4 = vpop.xlane.xlu1 %1158  ;;  %v1373_v49 = vld [vmem:[%s2197_s8 + $0x18] sm:$0xff]  ;;  %v1833_v1 = vpack.c.bf16 %v1466_v0, %v1465_v63 }
 0x36f   : > { %1738 = vmatmul.mubr.msk.f32.vlgmr.msra.gmra.mrb[4].mxu1 %vm567_vm2, %v660_v2  ;;  %v1467_v2 = vld [vmem:[%s2199_s10 + $0x20] sm:$0xff] }
 0x370   : > { %v1877_v5 = vpop.eup %1876  ;;  %1746 = vmatpush3.msra.mxu1 %v829_v61  ;;  %1747 = vmatprep.mubr.msk.f32.mxu1 %vm1897_vm0, %v1898_v6  ;;  %v1464_v61 = vld [vmem:[%s2199_s10 + $0x8] sm:$0xff] }
 0x371   : > { %v827_v7 = vmul.f32 %v1877_v5, %v1869_v52  ;;  %v996_v9 = vpop.permute.xlu1 %995  ;;  %1755 = vmatprep.subr.mxu1 %v1898_v6  ;;  %v1830_v62 = vpack.c.bf16 %v1464_v61, %v1463_v60 }
 0x373   : > { %1748 = vmatmul.mubr.msk.f32.vlgmr.msra.gmra.mrb[6].mxu1 %vm567_vm2, %v827_v7  ;;  %v1469_v7 = vld [vmem:[%s2199_s10 + $0x30] sm:$0xff] }
 0x374   : > { %1756 = vmatpush3.msra.mxu1 %v996_v9  ;;  %1757 = vmatprep.mubr.msk.f32.mxu1 %vm1897_vm0, %v1898_v6  ;;  %v1470_v9 = vld [vmem:[%s2199_s10 + $0x38] sm:$0xff] }
 0x375   : > { %1765 = vmatprep.subr.mxu1 %v1898_v6 }
 0x396   : > { %v992_v10 = vpop.xlane.xlu0 %991 }
 0x397   : > { %1878 = vrcp.f32 %v992_v10  ;;  %v1839_v10 = vpack.c.bf16 %v1470_v9, %v1469_v7 }
 0x398   : > { %1880 = vrcp.f32 %v1159_v4  ;;  %v1468_v4 = vld [vmem:[%s2199_s10 + $0x28] sm:$0xff] }
 0x399   : > { %v1836_v5 = vpack.c.bf16 %v1468_v4, %v1467_v2 }
 0x39a   : > { %v1163_v14 = vpop.permute.xlu0 %1162 }
 0x3a1   : > { %v1879_v11 = vpop.eup %1878 }
 0x3a2   : > { %v994_v12 = vmul.f32 %v1879_v11, %v1873_v59  ;;  %v1881_v13 = vpop.eup %1880  ;;  %v1671_v11 = vld [vmem:[%s2198_s9] ss:$0 sm:$0xff] }
 0x3a3   : > { %v1161_v15 = vmul.f32 %v1881_v13, %v1871_v54 }
 0x3a4   : > { %1758 = vmatmul.mubr.msk.f32.vlgmr.msra.gmra.mrb[8].mxu1 %vm567_vm2, %v994_v12 }
 0x3a5   : > { %1766 = vmatpush3.msra.mxu1 %v1163_v14  ;;  %1767 = vmatprep.mubr.msk.f32.mxu1 %vm1897_vm0, %v1898_v6 }
 0x3a6   : > { %1823 = vmatprep.subr.bf16.mxu1 %v1896_v3 }
 0x3a8   : > { %1768 = vmatmul.mubr.msk.f32.vlgmr.msra.gmra.mrb[10].mxu1 %vm567_vm2, %v1161_v15 }
 0x3a9   : > { %1789 = vmatprep.mubr.msk.f32.mxu1 %vm1897_vm0, %v1898_v6 }
 0x442   : > { %v733_v19 = vpop.f32.mrb[4].mxu1 }
 0x443   : > { %v1739_v20 = vpop.f32.mrb[5].mxu1 }
 0x446   : > { %v900_v21 = vpop.f32.mrb[6].mxu1 }
 0x447   : > { %1239 = vrot.lane.b32.xlu1 %v900_v21, %s1910_s20  ;;  %v1749_v22 = vpop.f32.mrb[7].mxu1 }
 0x477   : > { %v1067_v26 = vpop.f32.mrb[8].mxu1 }
 0x478   : > { %1243 = vrot.lane.b32.xlu0 %v1067_v26, %s1911_s26  ;;  %v1759_v27 = vpop.f32.mrb[9].mxu1 }
 0x47b   : > { %v1234_v28 = vpop.f32.mrb[10].mxu1 }
 0x47c   : > { %1247 = vrot.lane.b32.xlu1 %v1234_v28, %s1912_s27  ;;  %v1769_v29 = vpop.f32.mrb[11].mxu1 }
 0x4b9   : > { %v1240_v30 = vpop.permute.xlu1 %1239 }
 0x4ba   : > { %v1250_v32 = vsel %vm567_vm2, %v733_v19, %v1240_v30 }
 0x4ea   : > { %v1244_v31 = vpop.permute.xlu0 %1243 }
 0x4eb   : > { %v1252_v33 = vsel %vm1251_vm3, %v1250_v32, %v1244_v31 }
 0x4ee   : > { %v1248_v34 = vpop.permute.xlu1 %1247 }
 0x4ef   : > { %v1254_v35 = vsel %vm1253_vm4, %v1252_v33, %v1248_v34 }
 0x4f0   : > { %1779 = vmatmul.mubr.msk.f32.vlgmr.msra.gmra.mrb[6].mxu0 %vm490_vm1, %v1254_v35 }
 0x4f1   : > { %1808 = vmatprep.mubr.msk.f32.mxu0 %vm1897_vm0, %v1898_v6  ;;  %v1370_v6 = vld [vmem:[%s2197_s8] sm:$0xff]  ;;  %1831 = vmatpush3.bf16.msra.mxu0 %v1830_v62 }
 0x4f2   : > { %v1824_v48 = vpack.c.bf16 %v1371_v47, %v1370_v6  ;;  %1832 = vmatprep.subr.bf16.mxu0 %v1896_v3 }
 0x4f4   : > { %1825 = vmatpush3.bf16.msra.mxu1 %v1824_v48 }
 0x4f5   : > { %1826 = vmatprep.subr.bf16.mxu1 %v1896_v3  ;;  %1834 = vmatpush3.bf16.msra.mxu0 %v1833_v1 }
 0x4f6   : > { %1835 = vmatprep.subr.bf16.mxu0 %v1896_v3 }
 0x4f9   : > { %1837 = vmatpush3.bf16.msra.mxu0 %v1836_v5 }
 0x4fa   : > { %1838 = vmatprep.subr.bf16.mxu0 %v1896_v3  ;;  %v1673_v3 = vld [vmem:[%s2200_s11] ss:$0 sm:$0xff] }
 0x4fd   : > { %1840 = vmatpush3.bf16.msra.mxu0 %v1839_v10 }
 0x5c3   : > { %v1335_v37 = vpop.f32.mrb[6].mxu0 }
 0x5c4   : > { %v1336_v38 = vadd.f32 %v1667_v36, %v1335_v37  ;;  %v1780_v39 = vpop.f32.mrb[7].mxu0 }
 0x5c6   : > { %v1339_v40 = vadd.f32 %v1336_v38, %v2023_v8  ;;  %v1372_v8 = vld [vmem:[%s2197_s8 + $0x10] sm:$0xff]  ;;  %v1675_v38 = vld [vmem:[%s2201_s12] ss:$0 sm:$0xff] }
 0x5c7   : > { %v1827_v50 = vpack.c.bf16 %v1373_v49, %v1372_v8 }
 0x5c8   : > { %v1342_v41 = vsel %vm490_vm1, %v1339_v40, 0.0 }
 0x5c9   : > { %1343 = vadd.xlane.f32.xlu0 %v1342_v41  ;;  %1828 = vmatpush3.bf16.msra.mxu1 %v1827_v50 }
 0x656   : > { %v1344_v42 = vpop.xlane.xlu0 %1343 }
 0x657   : > { %v1346_v43 = vmul.f32 0.03125, %v1344_v42 }
 0x659   : > { %v1347_v44 = vsub.f32 %v1339_v40, %v1346_v43  ;;  %v1676_v40 = vld [vmem:[%s2202_s13] ss:$0 sm:$0xff] }
 0x65b   : > { %v1348_v45 = vmul.f32 %v1347_v44, %v1347_v44 }
 0x65d   : > { %v1349_v46 = vsel %vm490_vm1, %v1348_v45, 0.0 }
 0x65e   : > { %1350 = vadd.xlane.f32.xlu1 %v1349_v46 }
 0x6eb   : > { %v1351_v51 = vpop.xlane.xlu1 %1350 }
 0x6ec   : > { %v1352_v52 = vmul.f32 0.03125, %v1351_v51 }
 0x6ee   : > { %v1353_v53 = vadd.f32 1e-12, %v1352_v52 }
 0x6f0   : > { %1882 = vrsqrt.f32 %v1353_v53 }
 0x6fa   : > { %v1883_v54 = vpop.eup %1882 }
 0x6fb   : > { %v1355_v56 = vmul.f32 %v1883_v54, %v1347_v44 }
 0x6fd   : > { %v1362_v58 = vmul.f32 %v1669_v55, %v1355_v56 }
 0x6ff   : > { %v1369_v59 = vadd.f32 %v1670_v57, %v1362_v58 }
 0x701   : > { %1790 = vmatmul.mubr.msk.f32.vlgmr.msra.gmra.mrb[12].mxu1 %vm490_vm1, %v1369_v59 }
 0x7d4   : > { %v1450_v12 = vpop.f32.mrb[12].mxu1 }
 0x7d5   : > { %v1451_v13 = vadd.f32 %v1671_v11, %v1450_v12  ;;  %v1791_v14 = vpop.f32.mrb[13].mxu1 }
 0x7d7   : > { %v1455_v15 = vmul.f32 0.044715, %v1451_v13  ;;  %v1454_v21 = vmul.f32 0.5, %v1451_v13 }
 0x7d9   : > { %v1456_v16 = vmul.f32 %v1455_v15, %v1451_v13 }
 0x7db   : > { %v1457_v17 = vmul.f32 %v1456_v16, %v1451_v13 }
 0x7dd   : > { %v1458_v18 = vadd.f32 %v1457_v17, %v1451_v13 }
 0x7df   : > { %v1459_v19 = vmul.f32 0.7978846, %v1458_v18 }
 0x7e1   : > { %1884 = vtanh.f32 %v1459_v19 }
 0x7eb   : > { %v1885_v20 = vpop.eup %1884 }
 0x7ec   : > { %v1461_v22 = vadd.f32 1.0, %v1885_v20 }
 0x7ee   : > { %v1462_v23 = vmul.f32 %v1461_v22, %v1454_v21 }
 0x7f0   : > { %1809 = vmatmul.mubr.msk.f32.vlgmr.msra.gmra.mrb[8].mxu0 %vm1478_vm5, %v1462_v23 }
 0x8c3   : > { %v1548_v24 = vpop.f32.mrb[8].mxu0 }
 0x8c4   : > { %v1549_v25 = vadd.f32 %v1673_v3, %v1548_v24  ;;  %v1810_v26 = vpop.f32.mrb[9].mxu0 }
 0x8c6   : > { %v1552_v27 = vadd.f32 %v1549_v25, %v1369_v59 }
 0x8c8   : > { %v1555_v28 = vsel %vm490_vm1, %v1552_v27, 0.0 }
 0x8c9   : > { %1556 = vadd.xlane.f32.xlu0 %v1555_v28 }
 0x956   : > { %v1557_v29 = vpop.xlane.xlu0 %1556 }
 0x957   : > { %v1558_v30 = vmul.f32 0.03125, %v1557_v29 }
 0x959   : > { %v1559_v31 = vsub.f32 %v1552_v27, %v1558_v30 }
 0x95b   : > { %v1560_v32 = vmul.f32 %v1559_v31, %v1559_v31 }
 0x95d   : > { %v1561_v33 = vsel %vm490_vm1, %v1560_v32, 0.0 }
 0x95e   : > { %1562 = vadd.xlane.f32.xlu0 %v1561_v33 }
 0x9eb   : > { %v1563_v34 = vpop.xlane.xlu0 %1562 }
 0x9ec   : > { %v1564_v35 = vmul.f32 0.03125, %v1563_v34 }
 0x9ee   : > { %v1565_v36 = vadd.f32 1e-12, %v1564_v35 }
 0x9f0   : > { %1886 = vrsqrt.f32 %v1565_v36 }
 0x9fa   : > { %v1887_v37 = vpop.eup %1886 }
 0x9fb   : > { %v1567_v39 = vmul.f32 %v1887_v37, %v1559_v31 }
 0x9fd   : > { %v1574_v41 = vmul.f32 %v1675_v38, %v1567_v39 }
 0x9ff   : > { %v1581_v42 = vadd.f32 %v1676_v40, %v1574_v41 }
 0xa01   : > { %1582 = vst.msk [vmem:[%s476_s15] sm:$0xff] %vm490_vm1, %v1581_v42 }
 0xa02 PF: > { %s24_s29 = sadd.s32 1, %s1894_s29  }
 0xa03   : > { %p21_p4 = scmp.ge.s32.totalorder %s24_s29, 4  }
 0xa05   :  { %23 = sbr.rel (!%p21_p4) target bundleno = 1 (0x1), region = 109 }

// kernel: bert_lstm_forward.7
= control target key start
LH: loop header
LB: loop body
LE: loop exit
PB: predicated region body
PF: predicated region fallthrough
CT: control target
= control target key end

     0   :  { %s2886_s30 = smov 0   ;;  %s3254_s0 = inlined_call_operand.vmem [shape: f32[2,8,32], index: 0, kind: input, shape index: {}]   ;;  %s3255_s1 = inlined_call_operand.vmem [shape: f32[32,64], index: 1, kind: input, shape index: {}]   ;;  %s3256_s2 = inlined_call_operand.vmem [shape: f32[16,64], index: 2, kind: input, shape index: {}]   ;;  %s3257_s3 = inlined_call_operand.vmem [shape: f32[1,64], index: 3, kind: input, shape index: {}]   ;;  %s3258_s4 = inlined_call_operand.vmem [shape: f32[32,64], index: 4, kind: input, shape index: {}]   ;;  %s3259_s5 = inlined_call_operand.vmem [shape: f32[16,64], index: 5, kind: input, shape index: {}]   ;;  %s3260_s6 = inlined_call_operand.vmem [shape: f32[1,64], index: 6, kind: input, shape index: {}]   ;;  %s3261_s7 = inlined_call_operand.vmem [shape: f32[32,5], index: 7, kind: input, shape index: {}]   ;;  %s3262_s8 = inlined_call_operand.vmem [shape: f32[1,5], index: 8, kind: input, shape index: {}]   ;;  %s3263_s9 = inlined_call_operand.vmem [shape: f32[2,8,5], index: 9, kind: output, shape index: {}]  }
   0x1 LB: > { %s2359_s10 = sadd.s32 4294967295, %s2827_s30   ;;  %p2363_p0 = scmp.ge.s32.totalorder %s2827_s30, 1  ;;  %s2827_s30 = sphi %s2886_s30, %s19_s30  }
   0x2   : > { %p286_p1 = scmp.lt.s32.totalorder %s2827_s30, 3 }
   0x4   : > { %p287_p2 = pnand %p2363_p0, %p286_p1 }
   0x5   : > { %v414_v0 = vld [vmem:[%s3258_s4] sm:$0xff] (!%p287_p2)  ;;  %v415_v1 = vld [vmem:[%s3258_s4 + $0x8] sm:$0xff] (!%p287_p2)  ;;  %v2829_v3 = vmov (!%p287_p2), 0.0|0.0   ;;  %v416_v6 = vld [vmem:[%s3258_s4 + $0x10] sm:$0xff] (!%p287_p2)  ;;  %p320_p3 = scmp.lt.s32.totalorder (!%p287_p2), %s2359_s10, 1  ;;  %vm2830_vm0 = vmmov (!%p287_p2), 0  }
   0x6   : > { %290 = sbr.rel (%p287_p2) target bundleno = 5892 (0x1704), region = 56  ;;  %v329_v2 = vld [vmem:[%s3255_s1] sm:$0xff] (!%p287_p2)  ;;  %2618 = vmatprep.subr.bf16.mxu1 (!%p287_p2), %v2829_v3  ;;  %v2619_v4 = vpack.c.bf16 (!%p287_p2), %v415_v1, %v414_v0  ;;  %2612 = vmatprep.subr.bf16.mxu0 (!%p287_p2), %v2829_v3  ;;  %v330_v5 = vld [vmem:[%s3255_s1 + $0x8] sm:$0xff] (!%p287_p2)  ;;  %v417_v7 = vld [vmem:[%s3258_s4 + $0x18] sm:$0xff] (!%p287_p2)  ;;  %v2831_v9 = vmov (!%p287_p2), 0.0   ;;  %vm340_vm1 = vcmask (!%p287_p2), 261120  }
   0x7   : > { %v2613_v8 = vpack.c.bf16 (!%p287_p2), %v330_v5, %v329_v2  ;;  %2486 = vmatprep.mubr.msk.f32.mxu1 (!%p287_p2), %vm2830_vm0, %v2831_v9  ;;  %v331_v10 = vld [vmem:[%s3255_s1 + $0x10] sm:$0xff] (!%p287_p2)  ;;  %v332_v11 = vld [vmem:[%s3255_s1 + $0x18] sm:$0xff] (!%p287_p2)  ;;  %2475 = vmatprep.mubr.msk.f32.mxu0 (!%p287_p2), %vm2830_vm0, %v2831_v9  ;;  %v2622_v12 = vpack.c.bf16 (!%p287_p2), %v417_v7, %v416_v6  ;;  %v495_v14 = vld [vmem:[%s3256_s2] sm:$0xff] (!%p287_p2)  ;;  %s2832_s24 = smov (!%p287_p2), 96   ;;  %s2833_s25 = smov (!%p287_p2), 16   ;;  %vm497_vm2 = vcmask (!%p287_p2), 130048  }
   0x8   : > { %2620 = vmatpush3.bf16.msra.mxu1 (!%p287_p2), %v2619_v4  ;;  %v2616_v13 = vpack.c.bf16 (!%p287_p2), %v332_v11, %v331_v10  ;;  %v496_v15 = vld [vmem:[%s3256_s2 + $0x8] sm:$0xff] (!%p287_p2)  ;;  %v596_v18 = vld [vmem:[%s3259_s5] sm:$0xff] (!%p287_p2)  ;;  %s2834_s26 = smov (!%p287_p2), 32   ;;  %s2835_s27 = smov (!%p287_p2), 80   ;;  %vm2190_vm3 = vcmask (!%p287_p2), 1040384   ;;  %vm2192_vm4 = vcmask (!%p287_p2), 1041408  }
   0x9   : > { %2614 = vmatpush3.bf16.msra.mxu0 (!%p287_p2), %v2613_v8  ;;  %2621 = vmatprep.subr.bf16.mxu1 (!%p287_p2), %v2829_v3  ;;  %v2940_v17 = vpack.c.bf16 (!%p287_p2), %v496_v15, %v495_v14  ;;  %v597_v19 = vld [vmem:[%s3259_s5 + $0x8] sm:$0xff] (!%p287_p2)  ;;  %v2368_v27 = vld [vmem:[%s3260_s6] ss:$0 sm:$0xff] (!%p287_p2)  ;;  %vm2194_vm5 = vcmask (!%p287_p2), 1042432   ;;  %vm2196_vm6 = vcmask (!%p287_p2), 1043456   ;;  %vm2198_vm7 = vcmask (!%p287_p2), 1044480  }
   0xa   : > { %2615 = vmatprep.subr.bf16.mxu0 (!%p287_p2), %v2829_v3  ;;  %v2953_v20 = vpack.c.bf16 (!%p287_p2), %v597_v19, %v596_v18  ;;  %v2366_v28 = vld [vmem:[%s3257_s3] ss:$0 sm:$0xff] (!%p287_p2)  ;;  %vm2200_vm8 = vcmask (!%p287_p2), 1045504   ;;  %vm2202_vm9 = vcmask (!%p287_p2), 1046528   ;;  %vm2304_vm10 = vcmask (!%p287_p2), 39936  }
   0xc   : > { %2623 = vmatpush3.bf16.msra.mxu1 (!%p287_p2), %v2622_v12 }
   0xd   : > { %s3265_s10 = smov (!%p320_p3, %s2359_s10), 1  ;;  %2617 = vmatpush3.bf16.msra.mxu0 %v2616_v13  ;;  %2624 = vmatprep.subr.bf16.mxu1 %v2829_v3 }
   0xe   : > { %s2364_s12 = sshll.u32 %s3265_s10, 3  ;;  %2630 = vmatprep.subr.bf16.mxu0 %v2829_v3 }
   0xf   : > { %s323_s15 = scalar_lea.vmem %s3254_s0, %s2364_s12  ;;  %s327_s22 = scalar_lea.vmem %s3263_s9, %s2364_s12 }
  0x10   : > { %v328_v16 = vld [vmem:[%s323_s15] sm:$0xff] }
  0x11   : > { %2487 = vmatmul.mubr.msk.f32.vlgmr.msra.gmra.mrb[0].mxu1 %vm340_vm1, %v328_v16  ;;  %2476 = vmatmul.mubr.msk.f32.vlgmr.msra.gmra.mrb[0].mxu0 %vm340_vm1, %v328_v16 }
  0x12   : > { %2626 = vmatpush3.bf16.msra.mxu1 %v2940_v17  ;;  %2493 = vmatprep.mubr.msk.f32.mxu1 %vm2830_vm0, %v2831_v9 }
  0x13   : > { %2627 = vmatprep.subr.bf16.mxu1 %v2829_v3  ;;  %2632 = vmatpush3.bf16.msra.mxu0 %v2940_v17 }
  0x14   : > { %2507 = vmatprep.mubr.msk.f32.mxu0 %vm2830_vm0, %v2831_v9  ;;  %2636 = vmatprep.subr.bf16.mxu0 %v2829_v3 }
  0x15   : > { %2494 = vmatmul.mubr.f32.vlgmr.msra.gmra.mrb[2].mxu1 %v2831_v9 }
  0x16   : > { %2629 = vmatpush3.bf16.msra.mxu1 %v2953_v20  ;;  %2500 = vmatprep.mubr.msk.f32.mxu1 %vm2830_vm0, %v2831_v9 }
  0x17   : > { %2633 = vmatprep.subr.bf16.mxu1 %v2829_v3 }
  0x19   : > { %2501 = vmatmul.mubr.f32.vlgmr.msra.gmra.mrb[4].mxu1 %v2831_v9 }
  0x1a   : > { %2635 = vmatpush3.bf16.msra.mxu1 %v2953_v20  ;;  %2514 = vmatprep.mubr.msk.f32.mxu1 %vm2830_vm0, %v2831_v9 }
  0x1b   : > { %2639 = vmatprep.subr.bf16.mxu1 %v2829_v3 }
  0xe4   : > { %v491_v21 = vpop.f32.mrb[0].mxu1  ;;  %v410_v23 = vpop.f32.mrb[0].mxu0 }
  0xe5   : > { %v2488_v22 = vpop.f32.mrb[1].mxu1  ;;  %v2477_v24 = vpop.f32.mrb[1].mxu0  ;;  %v2978_v30 = vadd.f32 %v2368_v27, %v491_v21  ;;  %v2980_v31 = vadd.f32 %v2366_v28, %v410_v23 }
  0xe8   : > { %v567_v25 = vpop.f32.mrb[2].mxu1 }
  0xe9   : > { %v2495_v26 = vpop.f32.mrb[3].mxu1  ;;  %v571_v35 = vadd.f32 %v567_v25, %v2980_v31 }
  0xeb   : > { %v2370_v39 = vmul.f32 -1.442695, %v571_v35 }
  0xec   : > { %v664_v29 = vpop.f32.mrb[4].mxu1 }
  0xed   : > { %v669_v32 = vrot.slane %v664_v29, 1  ;;  %v2502_v33 = vpop.f32.mrb[5].mxu1 }
  0xef   : > { %v671_v34 = vadd.f32 %v669_v32, %v2978_v30 }
  0xf1   : > { %2693 = vtanh.f32 %v671_v34  ;;  %v2371_v38 = vmul.f32 -1.442695, %v671_v34 }
  0xf2   : > { %2695 = vtanh.f32 %v571_v35 }
  0xf3   : > { %2697 = vpow2.f32 %v2371_v38 }
  0xf4   : > { %2699 = vpow2.f32 %v2370_v39 }
  0xfb   : > { %v2694_v36 = vpop.eup %2693 }
  0xfc   : > { %681 = vrot.lane.b32.xlu0 %v2694_v36, %s2832_s24  ;;  %v2696_v37 = vpop.eup %2695 }
  0xfd   : > { %v2698_v40 = vpop.eup %2697 }
  0xfe   : > { %v675_v41 = vadd.f32 1.0, %v2698_v40  ;;  %v2700_v42 = vpop.eup %2699 }
  0xff   : > { %v575_v43 = vadd.f32 1.0, %v2700_v42 }
 0x100   : > { %581 = vrot.lane.b32.xlu0 %v2696_v37, %s2832_s24  ;;  %2701 = vrcp.f32 %v675_v41 }
 0x101   : > { %2703 = vrcp.f32 %v575_v43 }
 0x10a   : > { %v2702_v44 = vpop.eup %2701 }
 0x10b   : > { %v2704_v47 = vpop.eup %2703  ;;  %v679_v50 = vmul.f32 0.0, %v2702_v44 }
 0x10c   : > { %v579_v53 = vmul.f32 0.0, %v2704_v47 }
 0x16e   : > { %v682_v45 = vpop.permute.xlu0 %681 }
 0x16f   : > { %v684_v46 = vmul.f32 %v2702_v44, %v682_v45 }
 0x171   : > { %686 = vrot.lane.b32.xlu1 %v684_v46, %s2833_s25 }
 0x172   : > { %v582_v48 = vpop.permute.xlu0 %581 }
 0x173   : > { %v584_v49 = vmul.f32 %v2704_v47, %v582_v48 }
 0x175   : > { %586 = vrot.lane.b32.xlu1 %v584_v49, %s2833_s25 }
 0x1e3   : > { %v687_v51 = vpop.permute.xlu1 %686 }
 0x1e4   : > { %v2988_v52 = vadd.f32 %v687_v51, %v679_v50 }
 0x1e6   : > { %2705 = vtanh.f32 %v2988_v52  ;;  %v890_v27 = vrot.slane %v2988_v52, 1 }
 0x1e7   : > { %v587_v54 = vpop.permute.xlu1 %586 }
 0x1e8   : > { %v2991_v55 = vadd.f32 %v587_v54, %v579_v53 }
 0x1ea   : > { %2707 = vtanh.f32 %v2991_v55  ;;  %v783_v29 = vrot.slane %v2991_v55, 7 }
 0x1f0   : > { %v2706_v56 = vpop.eup %2705 }
 0x1f1   : > { %692 = vrot.lane.b32.xlu0 %v2706_v56, %s2834_s26 }
 0x1f4   : > { %v2708_v57 = vpop.eup %2707 }
 0x1f5   : > { %592 = vrot.lane.b32.xlu1 %v2708_v57, %s2834_s26 }
 0x263   : > { %v693_v58 = vpop.permute.xlu0 %692 }
 0x264   : > { %v2996_v59 = vmul.f32 %v2702_v44, %v693_v58 }
 0x266   : > { %v803_v60 = vrot.slane %v2996_v59, 7 }
 0x267   : > { %v593_v61 = vpop.permute.xlu1 %592 }
 0x268   : > { %v2999_v62 = vmul.f32 %v2704_v47, %v593_v61  ;;  %804 = vrot.lane.b32.xlu0 %v803_v60, %s2835_s27 }
 0x26a   : > { %697 = vrot.lane.b32.xlu1 %v2999_v62, %s2835_s27 }
 0x2da   : > { %v805_v63 = vpop.permute.xlu0 %804 }
 0x2db   : > { %2515 = vmatmul.mubr.msk.f32.vlgmr.msra.gmra.mrb[6].mxu1 %vm497_vm2, %v805_v63 }
 0x2dc   : > { %v698_v0 = vpop.permute.xlu1 %697  ;;  %2641 = vmatpush3.bf16.msra.mxu1 %v2953_v20  ;;  %2528 = vmatprep.mubr.msk.f32.mxu1 %vm2830_vm0, %v2831_v9 }
 0x2dd   : > { %2508 = vmatmul.mubr.msk.f32.vlgmr.msra.gmra.mrb[2].mxu0 %vm497_vm2, %v698_v0  ;;  %2645 = vmatprep.subr.bf16.mxu1 %v2829_v3 }
 0x2de   : > { %2638 = vmatpush3.bf16.msra.mxu0 %v2940_v17  ;;  %2521 = vmatprep.mubr.msk.f32.mxu0 %vm2830_vm0, %v2831_v9 }
 0x2df   : > { %2642 = vmatprep.subr.bf16.mxu0 %v2829_v3 }
 0x3ae   : > { %v874_v1 = vpop.f32.mrb[6].mxu1 }
 0x3af   : > { %v879_v2 = vrot.slane %v874_v1, 2  ;;  %v2516_v4 = vpop.f32.mrb[7].mxu1 }
 0x3b0   : > { %v767_v5 = vpop.f32.mrb[2].mxu0 }
 0x3b1   : > { %v881_v6 = vadd.f32 %v879_v2, %v2978_v30  ;;  %v772_v7 = vrot.slane %v767_v5, 7  ;;  %v2509_v8 = vpop.f32.mrb[3].mxu0 }
 0x3b3   : > { %2709 = vtanh.f32 %v881_v6  ;;  %v774_v10 = vadd.f32 %v772_v7, %v2980_v31  ;;  %v2375_v13 = vmul.f32 -1.442695, %v881_v6 }
 0x3b5   : > { %2711 = vtanh.f32 %v774_v10  ;;  %v2373_v14 = vmul.f32 -1.442695, %v774_v10 }
 0x3b6   : > { %2713 = vpow2.f32 %v2375_v13 }
 0x3b7   : > { %2715 = vpow2.f32 %v2373_v14 }
 0x3bd   : > { %v2710_v11 = vpop.eup %2709 }
 0x3be   : > { %894 = vrot.lane.b32.xlu0 %v2710_v11, %s2832_s24 }
 0x3bf   : > { %v2712_v12 = vpop.eup %2711 }
 0x3c0   : > { %787 = vrot.lane.b32.xlu1 %v2712_v12, %s2832_s24  ;;  %v2714_v15 = vpop.eup %2713 }
 0x3c1   : > { %v2716_v16 = vpop.eup %2715  ;;  %v885_v18 = vadd.f32 1.0, %v2714_v15 }
 0x3c2   : > { %v778_v19 = vadd.f32 1.0, %v2716_v16 }
 0x3c3   : > { %2717 = vrcp.f32 %v885_v18 }
 0x3c4   : > { %2719 = vrcp.f32 %v778_v19 }
 0x3cd   : > { %v2718_v21 = vpop.eup %2717 }
 0x3ce   : > { %v2720_v24 = vpop.eup %2719  ;;  %v892_v28 = vmul.f32 %v2718_v21, %v890_v27 }
 0x3cf   : > { %v785_v34 = vmul.f32 %v2720_v24, %v783_v29 }
 0x430   : > { %v895_v22 = vpop.permute.xlu0 %894 }
 0x431   : > { %v897_v23 = vmul.f32 %v2718_v21, %v895_v22 }
 0x432   : > { %v788_v25 = vpop.permute.xlu1 %787 }
 0x433   : > { %899 = vrot.lane.b32.xlu0 %v897_v23, %s2833_s25  ;;  %v790_v26 = vmul.f32 %v2720_v24, %v788_v25 }
 0x435   : > { %792 = vrot.lane.b32.xlu1 %v790_v26, %s2833_s25 }
 0x4a5   : > { %v900_v32 = vpop.permute.xlu0 %899 }
 0x4a6   : > { %v902_v33 = vadd.f32 %v900_v32, %v892_v28 }
 0x4a7   : > { %v793_v35 = vpop.permute.xlu1 %792 }
 0x4a8   : > { %2721 = vtanh.f32 %v902_v33  ;;  %v795_v36 = vadd.f32 %v793_v35, %v785_v34  ;;  %v1104_v8 = vrot.slane %v902_v33, 1 }
 0x4aa   : > { %2723 = vtanh.f32 %v795_v36  ;;  %v997_v11 = vrot.slane %v795_v36, 7 }
 0x4b2   : > { %v2722_v37 = vpop.eup %2721 }
 0x4b3   : > { %905 = vrot.lane.b32.xlu0 %v2722_v37, %s2834_s26 }
 0x4b4   : > { %v2724_v38 = vpop.eup %2723 }
 0x4b5   : > { %798 = vrot.lane.b32.xlu1 %v2724_v38, %s2834_s26 }
 0x525   : > { %v906_v39 = vpop.permute.xlu0 %905 }
 0x526   : > { %v3024_v40 = vmul.f32 %v2718_v21, %v906_v39 }
 0x527   : > { %v799_v42 = vpop.permute.xlu1 %798 }
 0x528   : > { %v1017_v41 = vrot.slane %v3024_v40, 6  ;;  %v3027_v43 = vmul.f32 %v2720_v24, %v799_v42 }
 0x52a   : > { %1018 = vrot.lane.b32.xlu0 %v1017_v41, %s2835_s27  ;;  %v910_v44 = vrot.slane %v3027_v43, 1  ;;  %v2191_v26 = vsel %vm2190_vm3, %v2999_v62, %v3027_v43 }
 0x52c   : > { %911 = vrot.lane.b32.xlu1 %v910_v44, %s2835_s27 }
 0x59c   : > { %v1019_v45 = vpop.permute.xlu0 %1018 }
 0x59d   : > { %2529 = vmatmul.mubr.msk.f32.vlgmr.msra.gmra.mrb[8].mxu1 %vm497_vm2, %v1019_v45 }
 0x59e   : > { %2647 = vmatpush3.bf16.msra.mxu1 %v2953_v20  ;;  %2542 = vmatprep.mubr.msk.f32.mxu1 %vm2830_vm0, %v2831_v9  ;;  %v912_v46 = vpop.permute.xlu1 %911 }
 0x59f   : > { %2651 = vmatprep.subr.bf16.mxu1 %v2829_v3  ;;  %2522 = vmatmul.mubr.msk.f32.vlgmr.msra.gmra.mrb[4].mxu0 %vm497_vm2, %v912_v46 }
 0x5a0   : > { %2644 = vmatpush3.bf16.msra.mxu0 %v2940_v17  ;;  %2535 = vmatprep.mubr.msk.f32.mxu0 %vm2830_vm0, %v2831_v9 }
 0x5a1   : > { %2648 = vmatprep.subr.bf16.mxu0 %v2829_v3 }
 0x670   : > { %v1088_v47 = vpop.f32.mrb[8].mxu1 }
 0x671   : > { %v1093_v48 = vrot.slane %v1088_v47, 3  ;;  %v2530_v49 = vpop.f32.mrb[9].mxu1 }
 0x672   : > { %v981_v51 = vpop.f32.mrb[4].mxu0 }
 0x673   : > { %v1095_v50 = vadd.f32 %v1093_v48, %v2978_v30  ;;  %v986_v52 = vrot.slane %v981_v51, 6  ;;  %v2523_v53 = vpop.f32.mrb[5].mxu0 }
 0x675   : > { %2725 = vtanh.f32 %v1095_v50  ;;  %v988_v54 = vadd.f32 %v986_v52, %v2980_v31  ;;  %v2379_v57 = vmul.f32 -1.442695, %v1095_v50 }
 0x677   : > { %2727 = vtanh.f32 %v988_v54  ;;  %v2377_v58 = vmul.f32 -1.442695, %v988_v54 }
 0x678   : > { %2729 = vpow2.f32 %v2379_v57 }
 0x679   : > { %2731 = vpow2.f32 %v2377_v58 }
 0x67f   : > { %v2726_v55 = vpop.eup %2725 }
 0x680   : > { %1108 = vrot.lane.b32.xlu0 %v2726_v55, %s2832_s24 }
 0x681   : > { %v2728_v56 = vpop.eup %2727 }
 0x682   : > { %1001 = vrot.lane.b32.xlu1 %v2728_v56, %s2832_s24  ;;  %v2730_v60 = vpop.eup %2729 }
 0x683   : > { %v2732_v61 = vpop.eup %2731  ;;  %v1099_v63 = vadd.f32 1.0, %v2730_v60 }
 0x684   : > { %v992_v0 = vadd.f32 1.0, %v2732_v61 }
 0x685   : > { %2733 = vrcp.f32 %v1099_v63 }
 0x686   : > { %2735 = vrcp.f32 %v992_v0 }
 0x68f   : > { %v2734_v1 = vpop.eup %2733 }
 0x690   : > { %v2736_v5 = vpop.eup %2735  ;;  %v1106_v10 = vmul.f32 %v2734_v1, %v1104_v8 }
 0x691   : > { %v999_v14 = vmul.f32 %v2736_v5, %v997_v11 }
 0x6f2   : > { %v1109_v2 = vpop.permute.xlu0 %1108 }
 0x6f3   : > { %v1111_v4 = vmul.f32 %v2734_v1, %v1109_v2 }
 0x6f4   : > { %v1002_v6 = vpop.permute.xlu1 %1001 }
 0x6f5   : > { %1113 = vrot.lane.b32.xlu0 %v1111_v4, %s2833_s25  ;;  %v1004_v7 = vmul.f32 %v2736_v5, %v1002_v6 }
 0x6f7   : > { %1006 = vrot.lane.b32.xlu1 %v1004_v7, %s2833_s25 }
 0x767   : > { %v1114_v12 = vpop.permute.xlu0 %1113 }
 0x768   : > { %v3048_v13 = vadd.f32 %v1114_v12, %v1106_v10 }
 0x769   : > { %v1007_v15 = vpop.permute.xlu1 %1006 }
 0x76a   : > { %2737 = vtanh.f32 %v3048_v13  ;;  %v3051_v16 = vadd.f32 %v1007_v15, %v999_v14  ;;  %v1318_v55 = vrot.slane %v3048_v13, 1 }
 0x76c   : > { %2739 = vtanh.f32 %v3051_v16  ;;  %v1211_v57 = vrot.slane %v3051_v16, 7 }
 0x774   : > { %v2738_v18 = vpop.eup %2737 }
 0x775   : > { %1119 = vrot.lane.b32.xlu0 %v2738_v18, %s2834_s26 }
 0x776   : > { %v2740_v19 = vpop.eup %2739 }
 0x777   : > { %1012 = vrot.lane.b32.xlu1 %v2740_v19, %s2834_s26 }
 0x7e7   : > { %v1120_v21 = vpop.permute.xlu0 %1119 }
 0x7e8   : > { %v3056_v22 = vmul.f32 %v2734_v1, %v1120_v21 }
 0x7e9   : > { %v1013_v24 = vpop.permute.xlu1 %1012 }
 0x7ea   : > { %v1231_v23 = vrot.slane %v3056_v22, 5  ;;  %v1015_v25 = vmul.f32 %v2736_v5, %v1013_v24 }
 0x7ec   : > { %1232 = vrot.lane.b32.xlu0 %v1231_v23, %s2835_s27  ;;  %v1124_v27 = vrot.slane %v1015_v25, 2  ;;  %v3064_v28 = vsel %vm2192_vm4, %v2191_v26, %v1015_v25 }
 0x7ee   : > { %1125 = vrot.lane.b32.xlu1 %v1124_v27, %s2835_s27 }
 0x85e   : > { %v1233_v29 = vpop.permute.xlu0 %1232 }
 0x85f   : > { %2543 = vmatmul.mubr.msk.f32.vlgmr.msra.gmra.mrb[10].mxu1 %vm497_vm2, %v1233_v29 }
 0x860   : > { %2653 = vmatpush3.bf16.msra.mxu1 %v2953_v20  ;;  %2556 = vmatprep.mubr.msk.f32.mxu1 %vm2830_vm0, %v2831_v9  ;;  %v1126_v32 = vpop.permute.xlu1 %1125 }
 0x861   : > { %2657 = vmatprep.subr.bf16.mxu1 %v2829_v3  ;;  %2536 = vmatmul.mubr.msk.f32.vlgmr.msra.gmra.mrb[6].mxu0 %vm497_vm2, %v1126_v32 }
 0x862   : > { %2650 = vmatpush3.bf16.msra.mxu0 %v2940_v17  ;;  %2549 = vmatprep.mubr.msk.f32.mxu0 %vm2830_vm0, %v2831_v9 }
 0x863   : > { %2654 = vmatprep.subr.bf16.mxu0 %v2829_v3 }
 0x932   : > { %v1302_v62 = vpop.f32.mrb[10].mxu1 }
 0x933   : > { %v1307_v33 = vrot.slane %v1302_v62, 4  ;;  %v2544_v34 = vpop.f32.mrb[11].mxu1 }
 0x934   : > { %v1195_v36 = vpop.f32.mrb[6].mxu0 }
 0x935   : > { %v1309_v35 = vadd.f32 %v1307_v33, %v2978_v30  ;;  %v1200_v37 = vrot.slane %v1195_v36, 5  ;;  %v2537_v38 = vpop.f32.mrb[7].mxu0 }
 0x937   : > { %2741 = vtanh.f32 %v1309_v35  ;;  %v1202_v39 = vadd.f32 %v1200_v37, %v2980_v31  ;;  %v2383_v43 = vmul.f32 -1.442695, %v1309_v35 }
 0x939   : > { %2743 = vtanh.f32 %v1202_v39  ;;  %v2381_v44 = vmul.f32 -1.442695, %v1202_v39 }
 0x93a   : > { %2745 = vpow2.f32 %v2383_v43 }
 0x93b   : > { %2747 = vpow2.f32 %v2381_v44 }
 0x941   : > { %v2742_v41 = vpop.eup %2741 }
 0x942   : > { %1322 = vrot.lane.b32.xlu0 %v2742_v41, %s2832_s24 }
 0x943   : > { %v2744_v42 = vpop.eup %2743 }
 0x944   : > { %1215 = vrot.lane.b32.xlu1 %v2744_v42, %s2832_s24  ;;  %v2746_v45 = vpop.eup %2745 }
 0x945   : > { %v2748_v46 = vpop.eup %2747  ;;  %v1313_v47 = vadd.f32 1.0, %v2746_v45 }
 0x946   : > { %v1206_v48 = vadd.f32 1.0, %v2748_v46 }
 0x947   : > { %2749 = vrcp.f32 %v1313_v47 }
 0x948   : > { %2751 = vrcp.f32 %v1206_v48 }
 0x951   : > { %v2750_v49 = vpop.eup %2749 }
 0x952   : > { %v2752_v52 = vpop.eup %2751  ;;  %v1320_v56 = vmul.f32 %v2750_v49, %v1318_v55 }
 0x953   : > { %v1213_v61 = vmul.f32 %v2752_v52, %v1211_v57 }
 0x9b4   : > { %v1323_v50 = vpop.permute.xlu0 %1322 }
 0x9b5   : > { %v1325_v51 = vmul.f32 %v2750_v49, %v1323_v50 }
 0x9b6   : > { %v1216_v53 = vpop.permute.xlu1 %1215 }
 0x9b7   : > { %1327 = vrot.lane.b32.xlu0 %v1325_v51, %s2833_s25  ;;  %v1218_v54 = vmul.f32 %v2752_v52, %v1216_v53 }
 0x9b9   : > { %1220 = vrot.lane.b32.xlu1 %v1218_v54, %s2833_s25 }
 0xa29   : > { %v1328_v58 = vpop.permute.xlu0 %1327 }
 0xa2a   : > { %v3085_v60 = vadd.f32 %v1328_v58, %v1320_v56 }
 0xa2b   : > { %v1221_v63 = vpop.permute.xlu1 %1220 }
 0xa2c   : > { %2753 = vtanh.f32 %v3085_v60  ;;  %v3088_v0 = vadd.f32 %v1221_v63, %v1213_v61  ;;  %v1532_v41 = vrot.slane %v3085_v60, 1 }
 0xa2e   : > { %2755 = vtanh.f32 %v3088_v0  ;;  %v1425_v43 = vrot.slane %v3088_v0, 7 }
 0xa36   : > { %v2754_v1 = vpop.eup %2753 }
 0xa37   : > { %1333 = vrot.lane.b32.xlu0 %v2754_v1, %s2834_s26 }
 0xa38   : > { %v2756_v2 = vpop.eup %2755 }
 0xa39   : > { %1226 = vrot.lane.b32.xlu1 %v2756_v2, %s2834_s26 }
 0xaa9   : > { %v1334_v4 = vpop.permute.xlu0 %1333 }
 0xaaa   : > { %v3093_v5 = vmul.f32 %v2750_v49, %v1334_v4 }
 0xaab   : > { %v1227_v7 = vpop.permute.xlu1 %1226 }
 0xaac   : > { %v1445_v6 = vrot.slane %v3093_v5, 4  ;;  %v1229_v8 = vmul.f32 %v2752_v52, %v1227_v7 }
 0xaae   : > { %1446 = vrot.lane.b32.xlu0 %v1445_v6, %s2835_s27  ;;  %v1338_v10 = vrot.slane %v1229_v8, 3  ;;  %v3099_v11 = vsel %vm2194_vm5, %v3064_v28, %v1229_v8 }
 0xab0   : > { %1339 = vrot.lane.b32.xlu1 %v1338_v10, %s2835_s27 }
 0xb20   : > { %v1447_v12 = vpop.permute.xlu0 %1446 }
 0xb21   : > { %2557 = vmatmul.mubr.msk.f32.vlgmr.msra.gmra.mrb[12].mxu1 %vm497_vm2, %v1447_v12 }
 0xb22   : > { %2659 = vmatpush3.bf16.msra.mxu1 %v2953_v20  ;;  %2570 = vmatprep.mubr.msk.f32.mxu1 %vm2830_vm0, %v2831_v9  ;;  %v1340_v13 = vpop.permute.xlu1 %1339 }
 0xb23   : > { %2663 = vmatprep.subr.bf16.mxu1 %v2829_v3  ;;  %2550 = vmatmul.mubr.msk.f32.vlgmr.msra.gmra.mrb[8].mxu0 %vm497_vm2, %v1340_v13 }
 0xb24   : > { %2656 = vmatpush3.bf16.msra.mxu0 %v2940_v17  ;;  %2563 = vmatprep.mubr.msk.f32.mxu0 %vm2830_vm0, %v2831_v9 }
 0xb25   : > { %2660 = vmatprep.subr.bf16.mxu0 %v2829_v3 }
 0xbf4   : > { %v1516_v14 = vpop.f32.mrb[12].mxu1 }
 0xbf5   : > { %v1521_v15 = vrot.slane %v1516_v14, 5  ;;  %v2558_v16 = vpop.f32.mrb[13].mxu1 }
 0xbf6   : > { %v1409_v19 = vpop.f32.mrb[8].mxu0 }
 0xbf7   : > { %v1523_v18 = vadd.f32 %v1521_v15, %v2978_v30  ;;  %v1414_v21 = vrot.slane %v1409_v19, 4  ;;  %v2551_v23 = vpop.f32.mrb[9].mxu0 }
 0xbf9   : > { %2757 = vtanh.f32 %v1523_v18  ;;  %v1416_v24 = vadd.f32 %v1414_v21, %v2980_v31  ;;  %v2387_v27 = vmul.f32 -1.442695, %v1523_v18 }
 0xbfb   : > { %2759 = vtanh.f32 %v1416_v24  ;;  %v2385_v28 = vmul.f32 -1.442695, %v1416_v24 }
 0xbfc   : > { %2761 = vpow2.f32 %v2387_v27 }
 0xbfd   : > { %2763 = vpow2.f32 %v2385_v28 }
 0xc03   : > { %v2758_v25 = vpop.eup %2757 }
 0xc04   : > { %1536 = vrot.lane.b32.xlu0 %v2758_v25, %s2832_s24 }
 0xc05   : > { %v2760_v26 = vpop.eup %2759 }
 0xc06   : > { %1429 = vrot.lane.b32.xlu1 %v2760_v26, %s2832_s24  ;;  %v2762_v29 = vpop.eup %2761 }
 0xc07   : > { %v2764_v32 = vpop.eup %2763  ;;  %v1527_v62 = vadd.f32 1.0, %v2762_v29 }
 0xc08   : > { %v1420_v33 = vadd.f32 1.0, %v2764_v32 }
 0xc09   : > { %2765 = vrcp.f32 %v1527_v62 }
 0xc0a   : > { %2767 = vrcp.f32 %v1420_v33 }
 0xc13   : > { %v2766_v34 = vpop.eup %2765 }
 0xc14   : > { %v2768_v37 = vpop.eup %2767  ;;  %v1534_v42 = vmul.f32 %v2766_v34, %v1532_v41 }
 0xc15   : > { %v1427_v46 = vmul.f32 %v2768_v37, %v1425_v43 }
 0xc76   : > { %v1537_v35 = vpop.permute.xlu0 %1536 }
 0xc77   : > { %v1539_v36 = vmul.f32 %v2766_v34, %v1537_v35 }
 0xc78   : > { %v1430_v38 = vpop.permute.xlu1 %1429 }
 0xc79   : > { %1541 = vrot.lane.b32.xlu0 %v1539_v36, %s2833_s25  ;;  %v1432_v39 = vmul.f32 %v2768_v37, %v1430_v38 }
 0xc7b   : > { %1434 = vrot.lane.b32.xlu1 %v1432_v39, %s2833_s25 }
 0xceb   : > { %v1542_v44 = vpop.permute.xlu0 %1541 }
 0xcec   : > { %v3120_v45 = vadd.f32 %v1542_v44, %v1534_v42 }
 0xced   : > { %v1435_v47 = vpop.permute.xlu1 %1434 }
 0xcee   : > { %2769 = vtanh.f32 %v3120_v45  ;;  %v3123_v48 = vadd.f32 %v1435_v47, %v1427_v46  ;;  %v1746_v26 = vrot.slane %v3120_v45, 1 }
 0xcf0   : > { %2771 = vtanh.f32 %v3123_v48  ;;  %v1639_v28 = vrot.slane %v3123_v48, 7 }
 0xcf8   : > { %v2770_v49 = vpop.eup %2769 }
 0xcf9   : > { %1547 = vrot.lane.b32.xlu0 %v2770_v49, %s2834_s26 }
 0xcfa   : > { %v2772_v50 = vpop.eup %2771 }
 0xcfb   : > { %1440 = vrot.lane.b32.xlu1 %v2772_v50, %s2834_s26 }
 0xd6b   : > { %v1548_v51 = vpop.permute.xlu0 %1547 }
 0xd6c   : > { %v3128_v52 = vmul.f32 %v2766_v34, %v1548_v51 }
 0xd6d   : > { %v1441_v54 = vpop.permute.xlu1 %1440 }
 0xd6e   : > { %v1659_v53 = vrot.slane %v3128_v52, 3  ;;  %v1443_v55 = vmul.f32 %v2768_v37, %v1441_v54 }
 0xd70   : > { %1660 = vrot.lane.b32.xlu0 %v1659_v53, %s2835_s27  ;;  %v1552_v56 = vrot.slane %v1443_v55, 4  ;;  %v3134_v57 = vsel %vm2196_vm6, %v3099_v11, %v1443_v55 }
 0xd72   : > { %1553 = vrot.lane.b32.xlu1 %v1552_v56, %s2835_s27 }
 0xde2   : > { %v1661_v58 = vpop.permute.xlu0 %1660 }
 0xde3   : > { %2571 = vmatmul.mubr.msk.f32.vlgmr.msra.gmra.mrb[14].mxu1 %vm497_vm2, %v1661_v58 }
 0xde4   : > { %2665 = vmatpush3.bf16.msra.mxu1 %v2953_v20  ;;  %2584 = vmatprep.mubr.msk.f32.mxu1 %vm2830_vm0, %v2831_v9  ;;  %v1554_v60 = vpop.permute.xlu1 %1553 }
 0xde5   : > { %2669 = vmatprep.subr.bf16.mxu1 %v2829_v3  ;;  %2564 = vmatmul.mubr.msk.f32.vlgmr.msra.gmra.mrb[10].mxu0 %vm497_vm2, %v1554_v60 }
 0xde6   : > { %2662 = vmatpush3.bf16.msra.mxu0 %v2940_v17  ;;  %2577 = vmatprep.mubr.msk.f32.mxu0 %vm2830_vm0, %v2831_v9 }
 0xde7   : > { %2666 = vmatprep.subr.bf16.mxu0 %v2829_v3 }
 0xeb6   : > { %v1730_v61 = vpop.f32.mrb[14].mxu1 }
 0xeb7   : > { %v1735_v63 = vrot.slane %v1730_v61, 6  ;;  %v2572_v0 = vpop.f32.mrb[15].mxu1 }
 0xeb8   : > { %v1623_v2 = vpop.f32.mrb[10].mxu0 }
 0xeb9   : > { %v1737_v1 = vadd.f32 %v1735_v63, %v2978_v30  ;;  %v1628_v4 = vrot.slane %v1623_v2, 3  ;;  %v2565_v6 = vpop.f32.mrb[11].mxu0 }
 0xebb   : > { %2773 = vtanh.f32 %v1737_v1  ;;  %v1630_v7 = vadd.f32 %v1628_v4, %v2980_v31  ;;  %v2391_v11 = vmul.f32 -1.442695, %v1737_v1 }
 0xebd   : > { %2775 = vtanh.f32 %v1630_v7  ;;  %v2389_v12 = vmul.f32 -1.442695, %v1630_v7 }
 0xebe   : > { %2777 = vpow2.f32 %v2391_v11 }
 0xebf   : > { %2779 = vpow2.f32 %v2389_v12 }
 0xec5   : > { %v2774_v8 = vpop.eup %2773 }
 0xec6   : > { %1750 = vrot.lane.b32.xlu0 %v2774_v8, %s2832_s24 }
 0xec7   : > { %v2776_v10 = vpop.eup %2775 }
 0xec8   : > { %1643 = vrot.lane.b32.xlu1 %v2776_v10, %s2832_s24  ;;  %v2778_v13 = vpop.eup %2777 }
 0xec9   : > { %v2780_v14 = vpop.eup %2779  ;;  %v1741_v15 = vadd.f32 1.0, %v2778_v13 }
 0xeca   : > { %v1634_v16 = vadd.f32 1.0, %v2780_v14 }
 0xecb   : > { %2781 = vrcp.f32 %v1741_v15 }
 0xecc   : > { %2783 = vrcp.f32 %v1634_v16 }
 0xed5   : > { %v2782_v18 = vpop.eup %2781 }
 0xed6   : > { %v2784_v23 = vpop.eup %2783  ;;  %v1748_v27 = vmul.f32 %v2782_v18, %v1746_v26 }
 0xed7   : > { %v1641_v62 = vmul.f32 %v2784_v23, %v1639_v28 }
 0xf38   : > { %v1751_v19 = vpop.permute.xlu0 %1750 }
 0xf39   : > { %v1753_v21 = vmul.f32 %v2782_v18, %v1751_v19 }
 0xf3a   : > { %v1644_v24 = vpop.permute.xlu1 %1643 }
 0xf3b   : > { %1755 = vrot.lane.b32.xlu0 %v1753_v21, %s2833_s25  ;;  %v1646_v25 = vmul.f32 %v2784_v23, %v1644_v24 }
 0xf3d   : > { %1648 = vrot.lane.b32.xlu1 %v1646_v25, %s2833_s25 }
 0xfad   : > { %v1756_v29 = vpop.permute.xlu0 %1755 }
 0xfae   : > { %v3155_v32 = vadd.f32 %v1756_v29, %v1748_v27 }
 0xfaf   : > { %v1649_v33 = vpop.permute.xlu1 %1648 }
 0xfb0   : > { %2785 = vtanh.f32 %v3155_v32  ;;  %v3158_v34 = vadd.f32 %v1649_v33, %v1641_v62  ;;  %v1960_v8 = vrot.slane %v3155_v32, 1 }
 0xfb2   : > { %2787 = vtanh.f32 %v3158_v34  ;;  %v1853_v11 = vrot.slane %v3158_v34, 7 }
 0xfba   : > { %v2786_v35 = vpop.eup %2785 }
 0xfbb   : > { %1761 = vrot.lane.b32.xlu0 %v2786_v35, %s2834_s26 }
 0xfbc   : > { %v2788_v36 = vpop.eup %2787 }
 0xfbd   : > { %1654 = vrot.lane.b32.xlu1 %v2788_v36, %s2834_s26 }
0x102d   : > { %v1762_v37 = vpop.permute.xlu0 %1761 }
0x102e   : > { %v3163_v38 = vmul.f32 %v2782_v18, %v1762_v37 }
0x102f   : > { %v1655_v41 = vpop.permute.xlu1 %1654 }
0x1030   : > { %v1873_v39 = vrot.slane %v3163_v38, 2  ;;  %v1657_v42 = vmul.f32 %v2784_v23, %v1655_v41 }
0x1032   : > { %1874 = vrot.lane.b32.xlu0 %v1873_v39, %s2835_s27  ;;  %v1766_v43 = vrot.slane %v1657_v42, 5  ;;  %v3169_v44 = vsel %vm2198_vm7, %v3134_v57, %v1657_v42 }
0x1034   : > { %1767 = vrot.lane.b32.xlu1 %v1766_v43, %s2835_s27 }
0x10a4   : > { %v1875_v45 = vpop.permute.xlu0 %1874 }
0x10a5   : > { %2585 = vmatmul.mubr.msk.f32.vlgmr.msra.gmra.mrb[16].mxu1 %vm497_vm2, %v1875_v45 }
0x10a6   : > { %2671 = vmatpush3.bf16.msra.mxu1 %v2953_v20  ;;  %2598 = vmatprep.mubr.msk.f32.mxu1 %vm2830_vm0, %v2831_v9  ;;  %v1768_v46 = vpop.permute.xlu1 %1767 }
0x10a7   : > { %2578 = vmatmul.mubr.msk.f32.vlgmr.msra.gmra.mrb[12].mxu0 %vm497_vm2, %v1768_v46 }
0x10a8   : > { %2668 = vmatpush3.bf16.msra.mxu0 %v2940_v17  ;;  %2591 = vmatprep.mubr.msk.f32.mxu0 %vm2830_vm0, %v2831_v9 }
0x10a9   : > { %2672 = vmatprep.subr.bf16.mxu0 %v2829_v3 }
0x1178   : > { %v1944_v47 = vpop.f32.mrb[16].mxu1 }
0x1179   : > { %v1949_v48 = vrot.slane %v1944_v47, 7  ;;  %v2586_v49 = vpop.f32.mrb[17].mxu1 }
0x117a   : > { %v1837_v51 = vpop.f32.mrb[12].mxu0 }
0x117b   : > { %v1951_v50 = vadd.f32 %v1949_v48, %v2978_v30  ;;  %v1842_v20 = vrot.slane %v1837_v51, 2  ;;  %v2579_v53 = vpop.f32.mrb[13].mxu0 }
0x117d   : > { %2789 = vtanh.f32 %v1951_v50  ;;  %v1844_v54 = vadd.f32 %v1842_v20, %v2980_v31  ;;  %v2395_v56 = vmul.f32 -1.442695, %v1951_v50 }
0x117f   : > { %2791 = vtanh.f32 %v1844_v54  ;;  %v2393_v57 = vmul.f32 -1.442695, %v1844_v54 }
0x1180   : > { %2793 = vpow2.f32 %v2395_v56 }
0x1181   : > { %2795 = vpow2.f32 %v2393_v57 }
0x1187   : > { %v2790_v55 = vpop.eup %2789 }
0x1188   : > { %1964 = vrot.lane.b32.xlu0 %v2790_v55, %s2832_s24 }
0x1189   : > { %v2792_v17 = vpop.eup %2791 }
0x118a   : > { %1857 = vrot.lane.b32.xlu1 %v2792_v17, %s2832_s24  ;;  %v2794_v58 = vpop.eup %2793 }
0x118b   : > { %v2796_v60 = vpop.eup %2795  ;;  %v1955_v61 = vadd.f32 1.0, %v2794_v58 }
0x118c   : > { %v1848_v63 = vadd.f32 1.0, %v2796_v60  ;;  %v2220_v60 = vld [vmem:[%s3261_s7] sm:$0xff] }
0x118d   : > { %2797 = vrcp.f32 %v1955_v61  ;;  %v2221_v61 = vld [vmem:[%s3261_s7 + $0x8] sm:$0xff] }
0x118e   : > { %2799 = vrcp.f32 %v1848_v63  ;;  %v2673_v63 = vpack.c.bf16 %v2221_v61, %v2220_v60 }
0x1197   : > { %v2798_v0 = vpop.eup %2797 }
0x1198   : > { %v2800_v4 = vpop.eup %2799  ;;  %v1962_v10 = vmul.f32 %v2798_v0, %v1960_v8 }
0x1199   : > { %v1855_v14 = vmul.f32 %v2800_v4, %v1853_v11 }
0x11fa   : > { %v1965_v1 = vpop.permute.xlu0 %1964 }
0x11fb   : > { %v1967_v2 = vmul.f32 %v2798_v0, %v1965_v1 }
0x11fc   : > { %v1858_v6 = vpop.permute.xlu1 %1857 }
0x11fd   : > { %1969 = vrot.lane.b32.xlu0 %v1967_v2, %s2833_s25  ;;  %v1860_v7 = vmul.f32 %v2800_v4, %v1858_v6  ;;  %v2222_v2 = vld [vmem:[%s3261_s7 + $0x10] sm:$0xff] }
0x11ff   : > { %1862 = vrot.lane.b32.xlu1 %v1860_v7, %s2833_s25 }
0x126f   : > { %v1970_v12 = vpop.permute.xlu0 %1969 }
0x1270   : > { %v1972_v13 = vadd.f32 %v1970_v12, %v1962_v10 }
0x1271   : > { %v1863_v15 = vpop.permute.xlu1 %1862 }
0x1272   : > { %2801 = vtanh.f32 %v1972_v13  ;;  %v1865_v16 = vadd.f32 %v1863_v15, %v1855_v14  ;;  %v2171_v20 = vrot.slane %v1972_v13, 1 }
0x1274   : > { %2803 = vtanh.f32 %v1865_v16  ;;  %v2067_v17 = vrot.slane %v1865_v16, 7 }
0x127c   : > { %v2802_v18 = vpop.eup %2801 }
0x127d   : > { %1975 = vrot.lane.b32.xlu0 %v2802_v18, %s2834_s26 }
0x127e   : > { %v2804_v19 = vpop.eup %2803 }
0x127f   : > { %1868 = vrot.lane.b32.xlu1 %v2804_v19, %s2834_s26 }
0x12ef   : > { %v1976_v21 = vpop.permute.xlu0 %1975 }
0x12f0   : > { %v3191_v23 = vmul.f32 %v2798_v0, %v1976_v21 }
0x12f1   : > { %v1869_v25 = vpop.permute.xlu1 %1868 }
0x12f2   : > { %v2087_v24 = vrot.slane %v3191_v23, 1  ;;  %v1871_v26 = vmul.f32 %v2800_v4, %v1869_v25  ;;  %v2223_v4 = vld [vmem:[%s3261_s7 + $0x18] sm:$0xff] }
0x12f3   : > { %v2676_v6 = vpack.c.bf16 %v2223_v4, %v2222_v2 }
0x12f4   : > { %2088 = vrot.lane.b32.xlu0 %v2087_v24, %s2835_s27  ;;  %v1980_v27 = vrot.slane %v1871_v26, 6  ;;  %v3197_v28 = vsel %vm2200_vm8, %v3169_v44, %v1871_v26 }
0x12f6   : > { %1981 = vrot.lane.b32.xlu1 %v1980_v27, %s2835_s27 }
0x1366   : > { %v2089_v29 = vpop.permute.xlu0 %2088 }
0x1367   : > { %2599 = vmatmul.mubr.msk.f32.vlgmr.msra.gmra.mrb[18].mxu1 %vm497_vm2, %v2089_v29 }
0x1368   : > { %v1982_v32 = vpop.permute.xlu1 %1981 }
0x1369   : > { %2592 = vmatmul.mubr.msk.f32.vlgmr.msra.gmra.mrb[14].mxu0 %vm497_vm2, %v1982_v32 }
0x136a   : > { %2609 = vmatprep.mubr.msk.f32.mxu0 %vm2830_vm0, %v2831_v9  ;;  %2674 = vmatpush3.bf16.msra.mxu0 %v2673_v63 }
0x136b   : > { %2675 = vmatprep.subr.bf16.mxu0 %v2829_v3 }
0x136e   : > { %2677 = vmatpush3.bf16.msra.mxu0 %v2676_v6 }
0x143a   : > { %v2158_v62 = vpop.f32.mrb[18].mxu1 }
0x143b   : > { %v2162_v33 = vadd.f32 %v2158_v62, %v2978_v30  ;;  %v2600_v34 = vpop.f32.mrb[19].mxu1 }
0x143c   : > { %v2051_v35 = vpop.f32.mrb[14].mxu0 }
0x143d   : > { %2805 = vtanh.f32 %v2162_v33  ;;  %v2056_v36 = vrot.slane %v2051_v35, 1  ;;  %v2593_v37 = vpop.f32.mrb[15].mxu0  ;;  %v2399_v43 = vmul.f32 -1.442695, %v2162_v33 }
0x143f   : > { %v2058_v39 = vadd.f32 %v2056_v36, %v2980_v31 }
0x1441   : > { %2807 = vtanh.f32 %v2058_v39  ;;  %v2397_v9 = vmul.f32 -1.442695, %v2058_v39 }
0x1442   : > { %2809 = vpow2.f32 %v2399_v43 }
0x1443   : > { %2811 = vpow2.f32 %v2397_v9 }
0x1447   : > { %v2806_v41 = vpop.eup %2805 }
0x1448   : > { %2175 = vrot.lane.b32.xlu0 %v2806_v41, %s2832_s24 }
0x144b   : > { %v2808_v42 = vpop.eup %2807 }
0x144c   : > { %2071 = vrot.lane.b32.xlu1 %v2808_v42, %s2832_s24  ;;  %v2810_v44 = vpop.eup %2809 }
0x144d   : > { %v2166_v30 = vadd.f32 1.0, %v2810_v44  ;;  %v2812_v45 = vpop.eup %2811 }
0x144e   : > { %v2062_v46 = vadd.f32 1.0, %v2812_v45 }
0x144f   : > { %2813 = vrcp.f32 %v2166_v30 }
0x1450   : > { %2815 = vrcp.f32 %v2062_v46 }
0x1459   : > { %v2814_v47 = vpop.eup %2813 }
0x145a   : > { %v2816_v49 = vpop.eup %2815  ;;  %v2173_v53 = vmul.f32 %v2814_v47, %v2171_v20 }
0x145b   : > { %v2069_v56 = vmul.f32 %v2816_v49, %v2067_v17 }
0x14ba   : > { %v2176_v48 = vpop.permute.xlu0 %2175 }
0x14bb   : > { %v2178_v31 = vmul.f32 %v2814_v47, %v2176_v48 }
0x14bd   : > { %2180 = vrot.lane.b32.xlu0 %v2178_v31, %s2833_s25 }
0x14be   : > { %v2072_v50 = vpop.permute.xlu1 %2071 }
0x14bf   : > { %v2074_v51 = vmul.f32 %v2816_v49, %v2072_v50 }
0x14c1   : > { %2076 = vrot.lane.b32.xlu1 %v2074_v51, %s2833_s25 }
0x152f   : > { %v2181_v54 = vpop.permute.xlu0 %2180 }
0x1530   : > { %v2183_v55 = vadd.f32 %v2181_v54, %v2173_v53 }
0x1532   : > { %2817 = vtanh.f32 %v2183_v55 }
0x1533   : > { %v2077_v57 = vpop.permute.xlu1 %2076 }
0x1534   : > { %v2079_v58 = vadd.f32 %v2077_v57, %v2069_v56 }
0x1536   : > { %2819 = vtanh.f32 %v2079_v58 }
0x153c   : > { %v2818_v0 = vpop.eup %2817 }
0x153d   : > { %2186 = vrot.lane.b32.xlu0 %v2818_v0, %s2834_s26 }
0x1540   : > { %v2820_v1 = vpop.eup %2819 }
0x1541   : > { %2082 = vrot.lane.b32.xlu1 %v2820_v1, %s2834_s26 }
0x15af   : > { %v2187_v7 = vpop.permute.xlu0 %2186 }
0x15b0   : > { %v2189_v8 = vmul.f32 %v2814_v47, %v2187_v7 }
0x15b2   : > { %v2204_v10 = vsel %vm2190_vm3, %v2189_v8, %v3191_v23 }
0x15b3   : > { %v2205_v3 = vsel %vm2192_vm4, %v2204_v10, %v3163_v38  ;;  %v2083_v12 = vpop.permute.xlu1 %2082 }
0x15b4   : > { %v2206_v11 = vsel %vm2194_vm5, %v2205_v3, %v3128_v52  ;;  %v2085_v13 = vmul.f32 %v2816_v49, %v2083_v12 }
0x15b5   : > { %v2207_v14 = vsel %vm2196_vm6, %v2206_v11, %v3093_v5 }
0x15b6   : > { %v2208_v15 = vsel %vm2198_vm7, %v2207_v14, %v3056_v22  ;;  %v2203_v16 = vsel %vm2202_vm9, %v3197_v28, %v2085_v13  ;;  %v2400_v22 = vld [vmem:[%s3262_s8] ss:$0 sm:$0xff] }
0x15b7   : > { %v2209_v18 = vsel %vm2200_vm8, %v2208_v15, %v3024_v40  ;;  %2212 = vrot.lane.b32.xlu0 %v2203_v16, %s2835_s27 }
0x15b8   : > { %v2210_v38 = vsel %vm2202_vm9, %v2209_v18, %v2996_v59 }
0x15b9   : > { %2216 = vrot.lane.b32.xlu1 %v2210_v38, %s2832_s24 }
0x1629   : > { %v2213_v52 = vpop.permute.xlu0 %2212 }
0x162b   : > { %v2217_v19 = vpop.permute.xlu1 %2216 }
0x162c   : > { %v2219_v21 = vsel %vm497_vm2, %v2213_v52, %v2217_v19 }
0x162d   : > { %2610 = vmatmul.mubr.msk.f32.vlgmr.msra.gmra.mrb[16].mxu0 %vm340_vm1, %v2219_v21 }
0x1700   : > { %v2300_v40 = vpop.f32.mrb[16].mxu0 }
0x1701   : > { %v2301_v59 = vadd.f32 %v2400_v22, %v2300_v40  ;;  %v2611_v5 = vpop.f32.mrb[17].mxu0 }
0x1703   : > { %2305 = vst.msk [vmem:[%s327_s22] sm:$0xff] %vm2304_vm10, %v2301_v59 }
0x1704 PF: > { %s19_s30 = sadd.s32 1, %s2827_s30  }
0x1705   : > { %p16_p4 = scmp.ge.s32.totalorder %s19_s30, 4  }
0x1707   :  { %18 = sbr.rel (!%p16_p4) target bundleno = 1 (0x1), region = 86 }

</bundles_post_ra>
